<compile_context>
chip_gen: v7x
topology: tpu7x:2x2x1
jax: 0.10.0
libtpu: 0.0.40
codegen_flags: <defaults>
</compile_context>

<pallas_src>
import functools

import jax
import jax.numpy as jnp
from jax.experimental import pallas as pl
from jax.experimental.pallas import tpu as pltpu

NUM_RESIDUE_TYPES = 21
RES_PAD = 32          # padded residue one-hot width
B_PAD = 8             # padded number of graphs (sublane friendly)
OUT_PAD = 128         # lane-dense classifier output width (column 0 is real)
NUM_AUX = 8           # per-residue aux features: x, y, z, batch, seq, valid, 0, 0


def _tower_spec(shape):
    """BlockSpec selecting one tower slice (leading axis) per grid step."""
    ndim = len(shape)
    return pl.BlockSpec((1,) + tuple(shape[1:]),
                        lambda t, _nd=ndim: (t,) + (0,) * (_nd - 1))


def _vmem_limit_bytes():
    """Generation-aware scoped-VMEM limit (~3/4 of physical, capped 100 MiB)."""
    try:
        info = pltpu.get_tpu_info()
        cap = int(getattr(info, "vmem_capacity_bytes", 0) or 0)
        if cap <= 0:
            return None
        return int(min(100 * 1024 * 1024, (3 * cap) // 4))
    except Exception:
        return None


# --------------------------------------------------------------------------
# Fused per-tower kernel (embedding -> CDConv layers -> pool -> classifier)
# --------------------------------------------------------------------------
def _binding_tower_kernel(onehot_ref, colf_ref, rowf_ref, pmat_ref, w1_ref,
                          ew_ref, eb_ref, *rest,
                          n, kc, radii, khalf, num_layers):
    f32 = jnp.float32
    bf16 = jnp.bfloat16
    lyr = rest[:2 * num_layers]
    cw1_ref, cb1_ref, cw2_ref, cb2_ref = rest[2 * num_layers:
                                              2 * num_layers + 4]
    out_ref = rest[-1]
    t = pl.program_id(0)

    # ---- residue embedding (one-hot @ table, MXU, bf16 operands / f32 acc) --
    x = jnp.dot(onehot_ref[0], ew_ref[0],
                preferred_element_type=f32) + eb_ref[0]              # [n, emb]

    # ---- pairwise geometry / masks at [n, n] (computed ONCE, un-replicated) -
    cf = colf_ref[0]                                                 # [n, 8]
    rf = rowf_ref[0]                                                 # [8, n]
    dx = rf[0:1, :] - cf[:, 0:1]
    dy = rf[1:2, :] - cf[:, 1:2]
    dz = rf[2:3, :] - cf[:, 2:3]
    dd = jnp.sqrt(dx * dx + dy * dy + dz * dz + 1e-12)
    same = cf[:, 3:4] == rf[3:4, :]
    near = jnp.abs(cf[:, 4:5] - rf[4:5, :]) <= khalf
    valid = jnp.logical_and(cf[:, 5:6] > 0.5, rf[5:6, :] > 0.5)
    base = jnp.where(same & near & valid, 1.0, 0.0)                  # [n, n]

    def w1s(li, row, m):
        # kernel-MLP layer-1 coefficient (already divided by radius) from SMEM
        return w1_ref[t, (li * 8 + row) * kc + m]

    # ---- continuous-discrete convolution layers ----------------------------
    for li in range(num_layers):
        wtld = lyr[2 * li + 0][0]   # [cin, (kc+1)*cout]  bf16 (wk2/bk2 folded)
        bo = lyr[2 * li + 1][0]     # [1, cout]           f32
        r = radii[li]
        cout = bo.shape[1]

        maskr = base * jnp.where(dd < r, 1.0, 0.0)                   # [n, n]
        deg = jnp.maximum(jnp.sum(maskr, axis=1, keepdims=True), 1.0)
        inv_deg = pl.reciprocal(deg, approx=True)                    # EUP

        # kernel-generating MLP layer 1: per-plane FMAs on the un-replicated
        # geometry; plane kc is the folded bk2 bias term (identity kernel).
        planes = []
        for m in range(kc):
            hm = jnp.maximum(dx * w1s(li, 0, m) + dy * w1s(li, 1, m)
                             + dz * w1s(li, 2, m) + dd * w1s(li, 3, m)
                             + w1s(li, 4, m), 0.0)
            planes.append(hm * maskr)
        planes.append(maskr)
        khid = jnp.concatenate(planes, axis=1).astype(bf16)          # [n,(kc+1)n]

        # feature transform: ONE MXU matmul with N = (kc+1)*cout lanes
        y = jnp.dot(x.astype(bf16), wtld,
                    preferred_element_type=f32).astype(bf16)         # [n,(kc+1)c]
        xtld = jnp.concatenate(
            [y[:, m * cout:(m + 1) * cout] for m in range(kc + 1)],
            axis=0)                                                  # [(kc+1)n,c]

        # neighbor aggregation: ONE MXU matmul, contraction K = (kc+1)*n
        agg = jnp.dot(khid, xtld, preferred_element_type=f32)        # [n, cout]
        x = jnp.maximum(agg * inv_deg + bo, 0.0)

    # ---- graph mean-pool + 2-layer classifier (lane-dense padded output) ----
    pooled = jnp.dot(pmat_ref[0], x, preferred_element_type=f32)     # [B_PAD, c]
    hcls = jnp.maximum(
        jnp.dot(pooled, cw1_ref[0], preferred_element_type=f32) + cb1_ref[0],
        0.0)
    out_ref[0] = (jnp.dot(hcls, cw2_ref[0], preferred_element_type=f32)
                  + cb2_ref[0])                                      # [B_PAD,128]


# --------------------------------------------------------------------------
# Parameter init (deterministic, in-script)
# --------------------------------------------------------------------------
def init_cdconv_params(key, args):
    radii = [c * args['CDConv_radius']
             for c in args['CDConv_geometric_raddi_coeff']]
    kc = args['CDConv_kernel_channels'][0]
    channels = list(args['CDConv_channels'])
    emb = args['embedding_dim']
    num_class = 1
    ks = iter(jax.random.split(key, 8 + 4 * len(radii)))

    params = {}
    params['embed_w'] = (1.0 / jnp.sqrt(float(NUM_RESIDUE_TYPES))) * \
        jax.random.normal(next(ks), (NUM_RESIDUE_TYPES, emb), jnp.float32)
    params['embed_b'] = jnp.zeros((emb,), jnp.float32)

    layers = []
    cin = emb
    for radius, cout in zip(radii, channels):
        wk1 = 0.5 * jax.random.normal(next(ks), (4, kc), jnp.float32)
        bk1 = 0.1 * jax.random.normal(next(ks), (kc,), jnp.float32)
        wk2 = (1.0 / jnp.sqrt(float(kc))) * jax.random.normal(
            next(ks), (kc, kc), jnp.float32)
        bk2 = 0.1 * jax.random.normal(next(ks), (kc,), jnp.float32)
        wout = (1.0 / jnp.sqrt(float(kc * cin))) * jax.random.normal(
            next(ks), (kc, cin, cout), jnp.float32)
        bout = jnp.zeros((cout,), jnp.float32)
        layers.append(dict(radius=float(radius), wk1=wk1, bk1=bk1, wk2=wk2,
                           bk2=bk2, wout=wout, bout=bout))
        cin = cout
    params['layers'] = layers

    mid = max(channels[-1], num_class)
    params['cls'] = dict(
        w1=(1.0 / jnp.sqrt(float(channels[-1]))) * jax.random.normal(
            next(ks), (channels[-1], mid), jnp.float32),
        b1=jnp.zeros((mid,), jnp.float32),
        w2=(1.0 / jnp.sqrt(float(mid))) * jax.random.normal(
            next(ks), (mid, num_class), jnp.float32),
        b2=jnp.zeros((num_class,), jnp.float32))
    params['seq_kernel_half'] = args['CDConv_kernel_size'] // 2
    # TODO(synk): CDConv_base_width (bottleneck width of the original
    # BasicBlock) has no effect in this simplified tower.
    return params


# --------------------------------------------------------------------------
# Host-side prep: per-tower kernel inputs (all tiny, O(N) or O(params))
# --------------------------------------------------------------------------
def _prep_tower_data(pos, residue, batch, num_graphs, n_pad):
    n = residue.shape[0]
    pad = n_pad - n
    onehot = jax.nn.one_hot(residue, RES_PAD, dtype=jnp.float32)
    onehot = jnp.pad(onehot, ((0, pad), (0, 0))).astype(jnp.bfloat16)

    first = jnp.argmax(batch[None, :] == jnp.arange(num_graphs)[:, None], axis=1)
    seq_pos = (jnp.arange(n) - first[batch]).astype(jnp.float32)

    colf = jnp.zeros((n_pad, NUM_AUX), jnp.float32)
    colf = colf.at[:n, 0:3].set(pos.astype(jnp.float32))
    colf = colf.at[:n, 3].set(batch.astype(jnp.float32))
    colf = colf.at[:n, 4].set(seq_pos)
    colf = colf.at[:n, 5].set(1.0)
    colf = colf.at[n:, 3].set(-1.0)          # padding: impossible graph id
    rowf = colf.T                            # [8, n_pad] -- single row slab

    gmask = (jnp.arange(B_PAD)[:, None] == batch[None, :]).astype(jnp.float32)
    gmask = jnp.pad(gmask, ((0, 0), (0, pad)))                       # [B_PAD, n_pad]
    pmat = gmask / jnp.maximum(gmask.sum(axis=1, keepdims=True), 1.0)
    return [onehot, colf, rowf, pmat]


def _prep_tower_params(params):
    emb = params['embed_w'].shape[1]
    ew = jnp.zeros((RES_PAD, emb), jnp.float32).at[:NUM_RESIDUE_TYPES].set(
        params['embed_w']).astype(jnp.bfloat16)
    eb = params['embed_b'].reshape(1, -1)

    kc = params['layers'][0]['wk1'].shape[1]
    num_layers = len(params['layers'])

    # kernel-MLP layer-1 coefficients (radius folded in), flattened for SMEM
    w1stack = jnp.zeros((num_layers, 8, kc), jnp.float32)
    layer_arrs = []
    for li, lp in enumerate(params['layers']):
        r = lp['radius']
        w1stack = w1stack.at[li, 0:4, :].set(lp['wk1'] / r)
        w1stack = w1stack.at[li, 4, :].set(lp['bk1'])
        # fold kernel-MLP layer 2 into the output weights:
        #   plane m: sum_k wk2[m,k] * wout[k];  plane kc: sum_k bk2[k] * wout[k]
        wtld = jnp.einsum('mk,kio->mio', lp['wk2'], lp['wout'])      # [kc,cin,cout]
        wb2 = jnp.einsum('k,kio->io', lp['bk2'], lp['wout'])         # [cin,cout]
        wtld2d = jnp.concatenate([wtld[m] for m in range(kc)] + [wb2],
                                 axis=1).astype(jnp.bfloat16)        # [cin,(kc+1)c]
        layer_arrs += [wtld2d, lp['bout'].reshape(1, -1)]
    w1flat = w1stack.reshape(num_layers * 8 * kc)                    # SMEM-friendly

    cls = params['cls']
    mid = cls['w1'].shape[1]
    cw2 = jnp.zeros((mid, OUT_PAD), jnp.float32).at[:, :cls['w2'].shape[1]].set(
        cls['w2'])
    cb2 = jnp.zeros((1, OUT_PAD), jnp.float32).at[:, :cls['b2'].shape[0]].set(
        cls['b2'][None, :])
    other = [ew, eb] + layer_arrs + [cls['w1'], cls['b1'].reshape(1, -1),
                                     cw2, cb2]
    return w1flat, other


# --------------------------------------------------------------------------
# Forward pass: one fused pallas_call for the whole BindingModel
# --------------------------------------------------------------------------
def binding_model_forward(params,
                          protein_residue, protein_pos_N, protein_pos_Ca,
                          protein_pos_C, protein_batch,
                          peptide_residue, peptide_pos_N, peptide_pos_Ca,
                          peptide_pos_C, peptide_batch,
                          num_graphs):
    # Like the PyTorch module, only C-alpha positions + residue ids are used.
    del protein_pos_N, protein_pos_C, peptide_pos_N, peptide_pos_C
    assert num_graphs <= B_PAD

    pp = params['protein_model']
    qp = params['peptide_model']
    kc = pp['layers'][0]['wk1'].shape[1]
    radii = tuple(float(lp['radius']) for lp in pp['layers'])
    khalf = float(pp['seq_kernel_half'])
    num_layers = len(radii)

    # Common padded residue count (multiple of 32 keeps tiles aligned).
    n_pad = 32 * max((protein_residue.shape[0] + 31) // 32,
                     (peptide_residue.shape[0] + 31) // 32)

    p_w1, p_other = _prep_tower_params(pp)
    q_w1, q_other = _prep_tower_params(qp)
    prot_in = (_prep_tower_data(protein_pos_Ca, protein_residue, protein_batch,
                                num_graphs, n_pad) + [p_w1] + p_other)
    pep_in = (_prep_tower_data(peptide_pos_Ca, peptide_residue, peptide_batch,
                               num_graphs, n_pad) + [q_w1] + q_other)
    inputs = [jnp.stack([a, b], axis=0) for a, b in zip(prot_in, pep_in)]

    W1_IDX = 4  # onehot, colf, rowf, pmat, w1flat, ...
    in_specs = []
    for idx, a in enumerate(inputs):
        if idx == W1_IDX:
            in_specs.append(pl.BlockSpec(memory_space=pltpu.MemorySpace.SMEM))
        else:
            in_specs.append(_tower_spec(a.shape))

    kernel = functools.partial(_binding_tower_kernel, n=n_pad, kc=kc,
                               radii=radii, khalf=khalf,
                               num_layers=num_layers)
    out = pl.pallas_call(
        kernel,
        out_shape=jax.ShapeDtypeStruct((2, B_PAD, OUT_PAD), jnp.float32),
        grid=(2,),   # tower axis: protein / peptide; parallel -> 2 TCs on v7x
        in_specs=in_specs,
        out_specs=_tower_spec((2, B_PAD, OUT_PAD)),
        compiler_params=pltpu.CompilerParams(
            dimension_semantics=("parallel",),
            vmem_limit_bytes=_vmem_limit_bytes()),
    )(*inputs)

    # binding_energy = protein_repr + peptide_repr
    return out[0, :num_graphs, 0:1] + out[1, :num_graphs, 0:1]      # [B, 1]


# --------------------------------------------------------------------------
if __name__ == "__main__":
    args = dict(CDConv_radius=4.0,
                CDConv_geometric_raddi_coeff=[2.0, 3.0],
                CDConv_kernel_size=5,
                CDConv_kernel_channels=[8],
                CDConv_channels=[16, 32],
                CDConv_base_width=16.0,
                embedding_dim=16)

    kp, kq = jax.random.split(jax.random.PRNGKey(42))
    params = dict(protein_model=init_cdconv_params(kp, args),
                  peptide_model=init_cdconv_params(kq, args))

    key = jax.random.PRNGKey(0)
    keys = jax.random.split(key, 8)
    num_graphs = 2
    n_prot, n_pep = 24, 16
    protein_batch = jnp.concatenate(
        [jnp.zeros(12, jnp.int32), jnp.ones(12, jnp.int32)])
    peptide_batch = jnp.concatenate(
        [jnp.zeros(8, jnp.int32), jnp.ones(8, jnp.int32)])
    protein_residue = jax.random.randint(keys[0], (n_prot,), 0,
                                         NUM_RESIDUE_TYPES)
    peptide_residue = jax.random.randint(keys[1], (n_pep,), 0,
                                         NUM_RESIDUE_TYPES)
    protein_pos_Ca = 3.0 * jax.random.normal(keys[2], (n_prot, 3), jnp.float32)
    peptide_pos_Ca = 3.0 * jax.random.normal(keys[3], (n_pep, 3), jnp.float32)
    protein_pos_N = protein_pos_Ca + 0.1 * jax.random.normal(
        keys[4], (n_prot, 3), jnp.float32)
    protein_pos_C = protein_pos_Ca + 0.1 * jax.random.normal(
        keys[5], (n_prot, 3), jnp.float32)
    peptide_pos_N = peptide_pos_Ca + 0.1 * jax.random.normal(
        keys[6], (n_pep, 3), jnp.float32)
    peptide_pos_C = peptide_pos_Ca + 0.1 * jax.random.normal(
        keys[7], (n_pep, 3), jnp.float32)

    binding_energy = binding_model_forward(
        params,
        protein_residue, protein_pos_N, protein_pos_Ca, protein_pos_C,
        protein_batch,
        peptide_residue, peptide_pos_N, peptide_pos_Ca, peptide_pos_C,
        peptide_batch,
        num_graphs=num_graphs)
    binding_energy = jax.block_until_ready(binding_energy)
    assert binding_energy.shape == (num_graphs, 1)
    assert bool(jnp.all(jnp.isfinite(binding_energy)))
    print("KERNEL_OK")
</pallas_src>

<mosaic_0001>
module attributes {stable_mosaic.version = 11 : i64} {
  func.func @_binding_tower_kernel(%arg0: i32, %arg1: memref<1x32x32xbf16, #tpu.memory_space<vmem>>, %arg2: memref<1x32x8xf32, #tpu.memory_space<vmem>>, %arg3: memref<1x8x32xf32, #tpu.memory_space<vmem>>, %arg4: memref<1x8x32xf32, #tpu.memory_space<vmem>>, %arg5: memref<2x128xf32, #tpu.memory_space<smem>>, %arg6: memref<1x32x16xbf16, #tpu.memory_space<vmem>>, %arg7: memref<1x1x16xf32, #tpu.memory_space<vmem>>, %arg8: memref<1x16x144xbf16, #tpu.memory_space<vmem>>, %arg9: memref<1x1x16xf32, #tpu.memory_space<vmem>>, %arg10: memref<1x16x288xbf16, #tpu.memory_space<vmem>>, %arg11: memref<1x1x32xf32, #tpu.memory_space<vmem>>, %arg12: memref<1x32x32xf32, #tpu.memory_space<vmem>>, %arg13: memref<1x1x32xf32, #tpu.memory_space<vmem>>, %arg14: memref<1x32x128xf32, #tpu.memory_space<vmem>>, %arg15: memref<1x1x128xf32, #tpu.memory_space<vmem>>, %arg16: memref<1x8x128xf32, #tpu.memory_space<vmem>>) attributes {dimension_semantics = [#tpu.dimension_semantics<parallel>], iteration_bounds = array<i64: 2>, scalar_prefetch = 0 : i64, scratch_operands = 0 : i64, tpu.core_type = #tpu.core_type<tc>, window_params = [{transform_indices = @transform_0, window_bounds = array<i64: 1, 32, 32>}, {transform_indices = @transform_1, window_bounds = array<i64: 1, 32, 8>}, {transform_indices = @transform_2, window_bounds = array<i64: 1, 8, 32>}, {transform_indices = @transform_3, window_bounds = array<i64: 1, 8, 32>}, {transform_indices = @transform_4, window_bounds = array<i64: 2, 128>}, {transform_indices = @transform_5, window_bounds = array<i64: 1, 32, 16>}, {transform_indices = @transform_6, window_bounds = array<i64: 1, 1, 16>}, {transform_indices = @transform_7, window_bounds = array<i64: 1, 16, 144>}, {transform_indices = @transform_8, window_bounds = array<i64: 1, 1, 16>}, {transform_indices = @transform_9, window_bounds = array<i64: 1, 16, 288>}, {transform_indices = @transform_10, window_bounds = array<i64: 1, 1, 32>}, {transform_indices = @transform_11, window_bounds = array<i64: 1, 32, 32>}, {transform_indices = @transform_12, window_bounds = array<i64: 1, 1, 32>}, {transform_indices = @transform_13, window_bounds = array<i64: 1, 32, 128>}, {transform_indices = @transform_14, window_bounds = array<i64: 1, 1, 128>}, {transform_indices = @transform_15, window_bounds = array<i64: 1, 8, 128>}]} {
    %c0 = arith.constant 0 : index
    %c0_0 = arith.constant 0 : index
    %c0_1 = arith.constant 0 : index
    %0 = vector.load %arg1[%c0, %c0_0, %c0_1] : memref<1x32x32xbf16, #tpu.memory_space<vmem>>, vector<1x32x32xbf16>
    %1 = vector.shape_cast %0 : vector<1x32x32xbf16> to vector<32x32xbf16>
    %c0_2 = arith.constant 0 : index
    %c0_3 = arith.constant 0 : index
    %c0_4 = arith.constant 0 : index
    %2 = vector.load %arg6[%c0_2, %c0_3, %c0_4] : memref<1x32x16xbf16, #tpu.memory_space<vmem>>, vector<1x32x16xbf16>
    %3 = vector.shape_cast %2 : vector<1x32x16xbf16> to vector<32x16xbf16>
    %cst = arith.constant dense<0.000000e+00> : vector<32x16xf32>
    %4 = tpu.matmul %1, %3, %cst {dimension_numbers = #tpu.dot_dimension_numbers<[1], [0], [0], [1], [0, 0, 1, 1], [], []>} : vector<32x32xbf16>, vector<32x16xbf16>, vector<32x16xf32> -> vector<32x16xf32>
    %c0_5 = arith.constant 0 : index
    %c0_6 = arith.constant 0 : index
    %c0_7 = arith.constant 0 : index
    %5 = vector.load %arg7[%c0_5, %c0_6, %c0_7] : memref<1x1x16xf32, #tpu.memory_space<vmem>>, vector<1x1x16xf32>
    %6 = vector.shape_cast %5 : vector<1x1x16xf32> to vector<1x16xf32>
    %7 = vector.broadcast %6 : vector<1x16xf32> to vector<32x16xf32>
    %8 = arith.addf %4, %7 : vector<32x16xf32>
    %c0_8 = arith.constant 0 : index
    %c0_9 = arith.constant 0 : index
    %c0_10 = arith.constant 0 : index
    %9 = vector.load %arg2[%c0_8, %c0_9, %c0_10] : memref<1x32x8xf32, #tpu.memory_space<vmem>>, vector<1x32x8xf32>
    %10 = vector.shape_cast %9 : vector<1x32x8xf32> to vector<32x8xf32>
    %c0_11 = arith.constant 0 : index
    %c0_12 = arith.constant 0 : index
    %c0_13 = arith.constant 0 : index
    %11 = vector.load %arg3[%c0_11, %c0_12, %c0_13] : memref<1x8x32xf32, #tpu.memory_space<vmem>>, vector<1x8x32xf32>
    %12 = vector.shape_cast %11 : vector<1x8x32xf32> to vector<8x32xf32>
    %13 = vector.extract_strided_slice %12 {offsets = [0, 0], sizes = [1, 32], strides = [1, 1]} : vector<8x32xf32> to vector<1x32xf32>
    %14 = vector.extract_strided_slice %10 {offsets = [0, 0], sizes = [32, 1], strides = [1, 1]} : vector<32x8xf32> to vector<32x1xf32>
    %15 = vector.broadcast %13 : vector<1x32xf32> to vector<32x32xf32>
    %16 = vector.broadcast %14 : vector<32x1xf32> to vector<32x32xf32>
    %17 = arith.subf %15, %16 : vector<32x32xf32>
    %18 = vector.extract_strided_slice %12 {offsets = [1, 0], sizes = [1, 32], strides = [1, 1]} : vector<8x32xf32> to vector<1x32xf32>
    %19 = vector.extract_strided_slice %10 {offsets = [0, 1], sizes = [32, 1], strides = [1, 1]} : vector<32x8xf32> to vector<32x1xf32>
    %20 = vector.broadcast %18 : vector<1x32xf32> to vector<32x32xf32>
    %21 = vector.broadcast %19 : vector<32x1xf32> to vector<32x32xf32>
    %22 = arith.subf %20, %21 : vector<32x32xf32>
    %23 = vector.extract_strided_slice %12 {offsets = [2, 0], sizes = [1, 32], strides = [1, 1]} : vector<8x32xf32> to vector<1x32xf32>
    %24 = vector.extract_strided_slice %10 {offsets = [0, 2], sizes = [32, 1], strides = [1, 1]} : vector<32x8xf32> to vector<32x1xf32>
    %25 = vector.broadcast %23 : vector<1x32xf32> to vector<32x32xf32>
    %26 = vector.broadcast %24 : vector<32x1xf32> to vector<32x32xf32>
    %27 = arith.subf %25, %26 : vector<32x32xf32>
    %28 = arith.mulf %17, %17 : vector<32x32xf32>
    %29 = arith.mulf %22, %22 : vector<32x32xf32>
    %30 = arith.addf %28, %29 : vector<32x32xf32>
    %31 = arith.mulf %27, %27 : vector<32x32xf32>
    %32 = arith.addf %30, %31 : vector<32x32xf32>
    %cst_14 = arith.constant 9.99999996E-13 : f32
    %33 = vector.broadcast %cst_14 : f32 to vector<32x32xf32>
    %34 = arith.addf %32, %33 : vector<32x32xf32>
    %35 = math.sqrt %34 : vector<32x32xf32>
    %36 = vector.extract_strided_slice %10 {offsets = [0, 3], sizes = [32, 1], strides = [1, 1]} : vector<32x8xf32> to vector<32x1xf32>
    %37 = vector.extract_strided_slice %12 {offsets = [3, 0], sizes = [1, 32], strides = [1, 1]} : vector<8x32xf32> to vector<1x32xf32>
    %38 = vector.broadcast %36 : vector<32x1xf32> to vector<32x32xf32>
    %39 = vector.broadcast %37 : vector<1x32xf32> to vector<32x32xf32>
    %40 = arith.cmpf oeq, %38, %39 : vector<32x32xf32>
    %41 = vector.extract_strided_slice %10 {offsets = [0, 4], sizes = [32, 1], strides = [1, 1]} : vector<32x8xf32> to vector<32x1xf32>
    %42 = vector.extract_strided_slice %12 {offsets = [4, 0], sizes = [1, 32], strides = [1, 1]} : vector<8x32xf32> to vector<1x32xf32>
    %43 = vector.broadcast %41 : vector<32x1xf32> to vector<32x32xf32>
    %44 = vector.broadcast %42 : vector<1x32xf32> to vector<32x32xf32>
    %45 = arith.subf %43, %44 : vector<32x32xf32>
    %46 = math.absf %45 : vector<32x32xf32>
    %cst_15 = arith.constant 2.000000e+00 : f32
    %47 = vector.broadcast %cst_15 : f32 to vector<32x32xf32>
    %48 = arith.cmpf ole, %46, %47 : vector<32x32xf32>
    %49 = vector.extract_strided_slice %10 {offsets = [0, 5], sizes = [32, 1], strides = [1, 1]} : vector<32x8xf32> to vector<32x1xf32>
    %cst_16 = arith.constant 5.000000e-01 : f32
    %50 = vector.broadcast %cst_16 : f32 to vector<32x1xf32>
    %51 = arith.cmpf ogt, %49, %50 : vector<32x1xf32>
    %52 = vector.extract_strided_slice %12 {offsets = [5, 0], sizes = [1, 32], strides = [1, 1]} : vector<8x32xf32> to vector<1x32xf32>
    %cst_17 = arith.constant 5.000000e-01 : f32
    %53 = vector.broadcast %cst_17 : f32 to vector<1x32xf32>
    %54 = arith.cmpf ogt, %52, %53 : vector<1x32xf32>
    %55 = vector.broadcast %51 : vector<32x1xi1> to vector<32x32xi1>
    %56 = vector.broadcast %54 : vector<1x32xi1> to vector<32x32xi1>
    %57 = arith.andi %55, %56 : vector<32x32xi1>
    %58 = arith.andi %40, %48 : vector<32x32xi1>
    %59 = arith.andi %58, %57 : vector<32x32xi1>
    %cst_18 = arith.constant 1.000000e+00 : f32
    %cst_19 = arith.constant 0.000000e+00 : f32
    %60 = vector.broadcast %cst_18 : f32 to vector<32x32xf32>
    %61 = vector.broadcast %cst_19 : f32 to vector<32x32xf32>
    %62 = arith.select %59, %60, %61 : vector<32x32xi1>, vector<32x32xf32>
    %c0_20 = arith.constant 0 : index
    %c0_21 = arith.constant 0 : index
    %c0_22 = arith.constant 0 : index
    %63 = vector.load %arg8[%c0_20, %c0_21, %c0_22] : memref<1x16x144xbf16, #tpu.memory_space<vmem>>, vector<1x16x144xbf16>
    %64 = vector.shape_cast %63 : vector<1x16x144xbf16> to vector<16x144xbf16>
    %c0_23 = arith.constant 0 : index
    %c0_24 = arith.constant 0 : index
    %c0_25 = arith.constant 0 : index
    %65 = vector.load %arg9[%c0_23, %c0_24, %c0_25] : memref<1x1x16xf32, #tpu.memory_space<vmem>>, vector<1x1x16xf32>
    %66 = vector.shape_cast %65 : vector<1x1x16xf32> to vector<1x16xf32>
    %cst_26 = arith.constant 8.000000e+00 : f32
    %67 = vector.broadcast %cst_26 : f32 to vector<32x32xf32>
    %68 = arith.cmpf olt, %35, %67 : vector<32x32xf32>
    %cst_27 = arith.constant 1.000000e+00 : f32
    %cst_28 = arith.constant 0.000000e+00 : f32
    %69 = vector.broadcast %cst_27 : f32 to vector<32x32xf32>
    %70 = vector.broadcast %cst_28 : f32 to vector<32x32xf32>
    %71 = arith.select %68, %69, %70 : vector<32x32xi1>, vector<32x32xf32>
    %72 = arith.mulf %62, %71 : vector<32x32xf32>
    %cst_29 = arith.constant dense<0.000000e+00> : vector<32xf32>
    %73 = vector.multi_reduction <add>, %72, %cst_29 [1] : vector<32x32xf32> to vector<32xf32>
    %74 = vector.shape_cast %73 : vector<32xf32> to vector<32x1xf32>
    %cst_30 = arith.constant 1.000000e+00 : f32
    %75 = vector.broadcast %cst_30 : f32 to vector<32x1xf32>
    %76 = arith.maximumf %74, %75 : vector<32x1xf32>
    %77 = tpu.reciprocal %76 {approx = true} : vector<32x1xf32> -> vector<32x1xf32>
    %78 = arith.index_cast %arg0 : i32 to index
    %c0_31 = arith.constant 0 : index
    %79 = memref.load %arg5[%78, %c0_31] : memref<2x128xf32, #tpu.memory_space<smem>>
    %80 = vector.broadcast %79 : f32 to vector<32x32xf32>
    %81 = arith.mulf %17, %80 : vector<32x32xf32>
    %82 = arith.index_cast %arg0 : i32 to index
    %c8 = arith.constant 8 : index
    %83 = memref.load %arg5[%82, %c8] : memref<2x128xf32, #tpu.memory_space<smem>>
    %84 = vector.broadcast %83 : f32 to vector<32x32xf32>
    %85 = arith.mulf %22, %84 : vector<32x32xf32>
    %86 = arith.addf %81, %85 : vector<32x32xf32>
    %87 = arith.index_cast %arg0 : i32 to index
    %c16 = arith.constant 16 : index
    %88 = memref.load %arg5[%87, %c16] : memref<2x128xf32, #tpu.memory_space<smem>>
    %89 = vector.broadcast %88 : f32 to vector<32x32xf32>
    %90 = arith.mulf %27, %89 : vector<32x32xf32>
    %91 = arith.addf %86, %90 : vector<32x32xf32>
    %92 = arith.index_cast %arg0 : i32 to index
    %c24 = arith.constant 24 : index
    %93 = memref.load %arg5[%92, %c24] : memref<2x128xf32, #tpu.memory_space<smem>>
    %94 = vector.broadcast %93 : f32 to vector<32x32xf32>
    %95 = arith.mulf %35, %94 : vector<32x32xf32>
    %96 = arith.addf %91, %95 : vector<32x32xf32>
    %97 = arith.index_cast %arg0 : i32 to index
    %c32 = arith.constant 32 : index
    %98 = memref.load %arg5[%97, %c32] : memref<2x128xf32, #tpu.memory_space<smem>>
    %99 = vector.broadcast %98 : f32 to vector<32x32xf32>
    %100 = arith.addf %96, %99 : vector<32x32xf32>
    %cst_32 = arith.constant 0.000000e+00 : f32
    %101 = vector.broadcast %cst_32 : f32 to vector<32x32xf32>
    %102 = arith.maximumf %100, %101 : vector<32x32xf32>
    %103 = arith.mulf %102, %72 : vector<32x32xf32>
    %104 = arith.index_cast %arg0 : i32 to index
    %c1 = arith.constant 1 : index
    %105 = memref.load %arg5[%104, %c1] : memref<2x128xf32, #tpu.memory_space<smem>>
    %106 = vector.broadcast %105 : f32 to vector<32x32xf32>
    %107 = arith.mulf %17, %106 : vector<32x32xf32>
    %108 = arith.index_cast %arg0 : i32 to index
    %c9 = arith.constant 9 : index
    %109 = memref.load %arg5[%108, %c9] : memref<2x128xf32, #tpu.memory_space<smem>>
    %110 = vector.broadcast %109 : f32 to vector<32x32xf32>
    %111 = arith.mulf %22, %110 : vector<32x32xf32>
    %112 = arith.addf %107, %111 : vector<32x32xf32>
    %113 = arith.index_cast %arg0 : i32 to index
    %c17 = arith.constant 17 : index
    %114 = memref.load %arg5[%113, %c17] : memref<2x128xf32, #tpu.memory_space<smem>>
    %115 = vector.broadcast %114 : f32 to vector<32x32xf32>
    %116 = arith.mulf %27, %115 : vector<32x32xf32>
    %117 = arith.addf %112, %116 : vector<32x32xf32>
    %118 = arith.index_cast %arg0 : i32 to index
    %c25 = arith.constant 25 : index
    %119 = memref.load %arg5[%118, %c25] : memref<2x128xf32, #tpu.memory_space<smem>>
    %120 = vector.broadcast %119 : f32 to vector<32x32xf32>
    %121 = arith.mulf %35, %120 : vector<32x32xf32>
    %122 = arith.addf %117, %121 : vector<32x32xf32>
    %123 = arith.index_cast %arg0 : i32 to index
    %c33 = arith.constant 33 : index
    %124 = memref.load %arg5[%123, %c33] : memref<2x128xf32, #tpu.memory_space<smem>>
    %125 = vector.broadcast %124 : f32 to vector<32x32xf32>
    %126 = arith.addf %122, %125 : vector<32x32xf32>
    %cst_33 = arith.constant 0.000000e+00 : f32
    %127 = vector.broadcast %cst_33 : f32 to vector<32x32xf32>
    %128 = arith.maximumf %126, %127 : vector<32x32xf32>
    %129 = arith.mulf %128, %72 : vector<32x32xf32>
    %130 = arith.index_cast %arg0 : i32 to index
    %c2 = arith.constant 2 : index
    %131 = memref.load %arg5[%130, %c2] : memref<2x128xf32, #tpu.memory_space<smem>>
    %132 = vector.broadcast %131 : f32 to vector<32x32xf32>
    %133 = arith.mulf %17, %132 : vector<32x32xf32>
    %134 = arith.index_cast %arg0 : i32 to index
    %c10 = arith.constant 10 : index
    %135 = memref.load %arg5[%134, %c10] : memref<2x128xf32, #tpu.memory_space<smem>>
    %136 = vector.broadcast %135 : f32 to vector<32x32xf32>
    %137 = arith.mulf %22, %136 : vector<32x32xf32>
    %138 = arith.addf %133, %137 : vector<32x32xf32>
    %139 = arith.index_cast %arg0 : i32 to index
    %c18 = arith.constant 18 : index
    %140 = memref.load %arg5[%139, %c18] : memref<2x128xf32, #tpu.memory_space<smem>>
    %141 = vector.broadcast %140 : f32 to vector<32x32xf32>
    %142 = arith.mulf %27, %141 : vector<32x32xf32>
    %143 = arith.addf %138, %142 : vector<32x32xf32>
    %144 = arith.index_cast %arg0 : i32 to index
    %c26 = arith.constant 26 : index
    %145 = memref.load %arg5[%144, %c26] : memref<2x128xf32, #tpu.memory_space<smem>>
    %146 = vector.broadcast %145 : f32 to vector<32x32xf32>
    %147 = arith.mulf %35, %146 : vector<32x32xf32>
    %148 = arith.addf %143, %147 : vector<32x32xf32>
    %149 = arith.index_cast %arg0 : i32 to index
    %c34 = arith.constant 34 : index
    %150 = memref.load %arg5[%149, %c34] : memref<2x128xf32, #tpu.memory_space<smem>>
    %151 = vector.broadcast %150 : f32 to vector<32x32xf32>
    %152 = arith.addf %148, %151 : vector<32x32xf32>
    %cst_34 = arith.constant 0.000000e+00 : f32
    %153 = vector.broadcast %cst_34 : f32 to vector<32x32xf32>
    %154 = arith.maximumf %152, %153 : vector<32x32xf32>
    %155 = arith.mulf %154, %72 : vector<32x32xf32>
    %156 = arith.index_cast %arg0 : i32 to index
    %c3 = arith.constant 3 : index
    %157 = memref.load %arg5[%156, %c3] : memref<2x128xf32, #tpu.memory_space<smem>>
    %158 = vector.broadcast %157 : f32 to vector<32x32xf32>
    %159 = arith.mulf %17, %158 : vector<32x32xf32>
    %160 = arith.index_cast %arg0 : i32 to index
    %c11 = arith.constant 11 : index
    %161 = memref.load %arg5[%160, %c11] : memref<2x128xf32, #tpu.memory_space<smem>>
    %162 = vector.broadcast %161 : f32 to vector<32x32xf32>
    %163 = arith.mulf %22, %162 : vector<32x32xf32>
    %164 = arith.addf %159, %163 : vector<32x32xf32>
    %165 = arith.index_cast %arg0 : i32 to index
    %c19 = arith.constant 19 : index
    %166 = memref.load %arg5[%165, %c19] : memref<2x128xf32, #tpu.memory_space<smem>>
    %167 = vector.broadcast %166 : f32 to vector<32x32xf32>
    %168 = arith.mulf %27, %167 : vector<32x32xf32>
    %169 = arith.addf %164, %168 : vector<32x32xf32>
    %170 = arith.index_cast %arg0 : i32 to index
    %c27 = arith.constant 27 : index
    %171 = memref.load %arg5[%170, %c27] : memref<2x128xf32, #tpu.memory_space<smem>>
    %172 = vector.broadcast %171 : f32 to vector<32x32xf32>
    %173 = arith.mulf %35, %172 : vector<32x32xf32>
    %174 = arith.addf %169, %173 : vector<32x32xf32>
    %175 = arith.index_cast %arg0 : i32 to index
    %c35 = arith.constant 35 : index
    %176 = memref.load %arg5[%175, %c35] : memref<2x128xf32, #tpu.memory_space<smem>>
    %177 = vector.broadcast %176 : f32 to vector<32x32xf32>
    %178 = arith.addf %174, %177 : vector<32x32xf32>
    %cst_35 = arith.constant 0.000000e+00 : f32
    %179 = vector.broadcast %cst_35 : f32 to vector<32x32xf32>
    %180 = arith.maximumf %178, %179 : vector<32x32xf32>
    %181 = arith.mulf %180, %72 : vector<32x32xf32>
    %182 = arith.index_cast %arg0 : i32 to index
    %c4 = arith.constant 4 : index
    %183 = memref.load %arg5[%182, %c4] : memref<2x128xf32, #tpu.memory_space<smem>>
    %184 = vector.broadcast %183 : f32 to vector<32x32xf32>
    %185 = arith.mulf %17, %184 : vector<32x32xf32>
    %186 = arith.index_cast %arg0 : i32 to index
    %c12 = arith.constant 12 : index
    %187 = memref.load %arg5[%186, %c12] : memref<2x128xf32, #tpu.memory_space<smem>>
    %188 = vector.broadcast %187 : f32 to vector<32x32xf32>
    %189 = arith.mulf %22, %188 : vector<32x32xf32>
    %190 = arith.addf %185, %189 : vector<32x32xf32>
    %191 = arith.index_cast %arg0 : i32 to index
    %c20 = arith.constant 20 : index
    %192 = memref.load %arg5[%191, %c20] : memref<2x128xf32, #tpu.memory_space<smem>>
    %193 = vector.broadcast %192 : f32 to vector<32x32xf32>
    %194 = arith.mulf %27, %193 : vector<32x32xf32>
    %195 = arith.addf %190, %194 : vector<32x32xf32>
    %196 = arith.index_cast %arg0 : i32 to index
    %c28 = arith.constant 28 : index
    %197 = memref.load %arg5[%196, %c28] : memref<2x128xf32, #tpu.memory_space<smem>>
    %198 = vector.broadcast %197 : f32 to vector<32x32xf32>
    %199 = arith.mulf %35, %198 : vector<32x32xf32>
    %200 = arith.addf %195, %199 : vector<32x32xf32>
    %201 = arith.index_cast %arg0 : i32 to index
    %c36 = arith.constant 36 : index
    %202 = memref.load %arg5[%201, %c36] : memref<2x128xf32, #tpu.memory_space<smem>>
    %203 = vector.broadcast %202 : f32 to vector<32x32xf32>
    %204 = arith.addf %200, %203 : vector<32x32xf32>
    %cst_36 = arith.constant 0.000000e+00 : f32
    %205 = vector.broadcast %cst_36 : f32 to vector<32x32xf32>
    %206 = arith.maximumf %204, %205 : vector<32x32xf32>
    %207 = arith.mulf %206, %72 : vector<32x32xf32>
    %208 = arith.index_cast %arg0 : i32 to index
    %c5 = arith.constant 5 : index
    %209 = memref.load %arg5[%208, %c5] : memref<2x128xf32, #tpu.memory_space<smem>>
    %210 = vector.broadcast %209 : f32 to vector<32x32xf32>
    %211 = arith.mulf %17, %210 : vector<32x32xf32>
    %212 = arith.index_cast %arg0 : i32 to index
    %c13 = arith.constant 13 : index
    %213 = memref.load %arg5[%212, %c13] : memref<2x128xf32, #tpu.memory_space<smem>>
    %214 = vector.broadcast %213 : f32 to vector<32x32xf32>
    %215 = arith.mulf %22, %214 : vector<32x32xf32>
    %216 = arith.addf %211, %215 : vector<32x32xf32>
    %217 = arith.index_cast %arg0 : i32 to index
    %c21 = arith.constant 21 : index
    %218 = memref.load %arg5[%217, %c21] : memref<2x128xf32, #tpu.memory_space<smem>>
    %219 = vector.broadcast %218 : f32 to vector<32x32xf32>
    %220 = arith.mulf %27, %219 : vector<32x32xf32>
    %221 = arith.addf %216, %220 : vector<32x32xf32>
    %222 = arith.index_cast %arg0 : i32 to index
    %c29 = arith.constant 29 : index
    %223 = memref.load %arg5[%222, %c29] : memref<2x128xf32, #tpu.memory_space<smem>>
    %224 = vector.broadcast %223 : f32 to vector<32x32xf32>
    %225 = arith.mulf %35, %224 : vector<32x32xf32>
    %226 = arith.addf %221, %225 : vector<32x32xf32>
    %227 = arith.index_cast %arg0 : i32 to index
    %c37 = arith.constant 37 : index
    %228 = memref.load %arg5[%227, %c37] : memref<2x128xf32, #tpu.memory_space<smem>>
    %229 = vector.broadcast %228 : f32 to vector<32x32xf32>
    %230 = arith.addf %226, %229 : vector<32x32xf32>
    %cst_37 = arith.constant 0.000000e+00 : f32
    %231 = vector.broadcast %cst_37 : f32 to vector<32x32xf32>
    %232 = arith.maximumf %230, %231 : vector<32x32xf32>
    %233 = arith.mulf %232, %72 : vector<32x32xf32>
    %234 = arith.index_cast %arg0 : i32 to index
    %c6 = arith.constant 6 : index
    %235 = memref.load %arg5[%234, %c6] : memref<2x128xf32, #tpu.memory_space<smem>>
    %236 = vector.broadcast %235 : f32 to vector<32x32xf32>
    %237 = arith.mulf %17, %236 : vector<32x32xf32>
    %238 = arith.index_cast %arg0 : i32 to index
    %c14 = arith.constant 14 : index
    %239 = memref.load %arg5[%238, %c14] : memref<2x128xf32, #tpu.memory_space<smem>>
    %240 = vector.broadcast %239 : f32 to vector<32x32xf32>
    %241 = arith.mulf %22, %240 : vector<32x32xf32>
    %242 = arith.addf %237, %241 : vector<32x32xf32>
    %243 = arith.index_cast %arg0 : i32 to index
    %c22 = arith.constant 22 : index
    %244 = memref.load %arg5[%243, %c22] : memref<2x128xf32, #tpu.memory_space<smem>>
    %245 = vector.broadcast %244 : f32 to vector<32x32xf32>
    %246 = arith.mulf %27, %245 : vector<32x32xf32>
    %247 = arith.addf %242, %246 : vector<32x32xf32>
    %248 = arith.index_cast %arg0 : i32 to index
    %c30 = arith.constant 30 : index
    %249 = memref.load %arg5[%248, %c30] : memref<2x128xf32, #tpu.memory_space<smem>>
    %250 = vector.broadcast %249 : f32 to vector<32x32xf32>
    %251 = arith.mulf %35, %250 : vector<32x32xf32>
    %252 = arith.addf %247, %251 : vector<32x32xf32>
    %253 = arith.index_cast %arg0 : i32 to index
    %c38 = arith.constant 38 : index
    %254 = memref.load %arg5[%253, %c38] : memref<2x128xf32, #tpu.memory_space<smem>>
    %255 = vector.broadcast %254 : f32 to vector<32x32xf32>
    %256 = arith.addf %252, %255 : vector<32x32xf32>
    %cst_38 = arith.constant 0.000000e+00 : f32
    %257 = vector.broadcast %cst_38 : f32 to vector<32x32xf32>
    %258 = arith.maximumf %256, %257 : vector<32x32xf32>
    %259 = arith.mulf %258, %72 : vector<32x32xf32>
    %260 = arith.index_cast %arg0 : i32 to index
    %c7 = arith.constant 7 : index
    %261 = memref.load %arg5[%260, %c7] : memref<2x128xf32, #tpu.memory_space<smem>>
    %262 = vector.broadcast %261 : f32 to vector<32x32xf32>
    %263 = arith.mulf %17, %262 : vector<32x32xf32>
    %264 = arith.index_cast %arg0 : i32 to index
    %c15 = arith.constant 15 : index
    %265 = memref.load %arg5[%264, %c15] : memref<2x128xf32, #tpu.memory_space<smem>>
    %266 = vector.broadcast %265 : f32 to vector<32x32xf32>
    %267 = arith.mulf %22, %266 : vector<32x32xf32>
    %268 = arith.addf %263, %267 : vector<32x32xf32>
    %269 = arith.index_cast %arg0 : i32 to index
    %c23 = arith.constant 23 : index
    %270 = memref.load %arg5[%269, %c23] : memref<2x128xf32, #tpu.memory_space<smem>>
    %271 = vector.broadcast %270 : f32 to vector<32x32xf32>
    %272 = arith.mulf %27, %271 : vector<32x32xf32>
    %273 = arith.addf %268, %272 : vector<32x32xf32>
    %274 = arith.index_cast %arg0 : i32 to index
    %c31 = arith.constant 31 : index
    %275 = memref.load %arg5[%274, %c31] : memref<2x128xf32, #tpu.memory_space<smem>>
    %276 = vector.broadcast %275 : f32 to vector<32x32xf32>
    %277 = arith.mulf %35, %276 : vector<32x32xf32>
    %278 = arith.addf %273, %277 : vector<32x32xf32>
    %279 = arith.index_cast %arg0 : i32 to index
    %c39 = arith.constant 39 : index
    %280 = memref.load %arg5[%279, %c39] : memref<2x128xf32, #tpu.memory_space<smem>>
    %281 = vector.broadcast %280 : f32 to vector<32x32xf32>
    %282 = arith.addf %278, %281 : vector<32x32xf32>
    %cst_39 = arith.constant 0.000000e+00 : f32
    %283 = vector.broadcast %cst_39 : f32 to vector<32x32xf32>
    %284 = arith.maximumf %282, %283 : vector<32x32xf32>
    %285 = arith.mulf %284, %72 : vector<32x32xf32>
    %286 = tpu.concatenate %103, %129, %155, %181, %207, %233, %259, %285, %72 in 1 : vector<32x32xf32>, vector<32x32xf32>, vector<32x32xf32>, vector<32x32xf32>, vector<32x32xf32>, vector<32x32xf32>, vector<32x32xf32>, vector<32x32xf32>, vector<32x32xf32> -> vector<32x288xf32>
    %287 = arith.truncf %286 : vector<32x288xf32> to vector<32x288xbf16>
    %288 = arith.truncf %8 : vector<32x16xf32> to vector<32x16xbf16>
    %cst_40 = arith.constant dense<0.000000e+00> : vector<32x144xf32>
    %289 = tpu.matmul %288, %64, %cst_40 {dimension_numbers = #tpu.dot_dimension_numbers<[1], [0], [0], [1], [0, 0, 1, 1], [], []>} : vector<32x16xbf16>, vector<16x144xbf16>, vector<32x144xf32> -> vector<32x144xf32>
    %290 = arith.truncf %289 : vector<32x144xf32> to vector<32x144xbf16>
    %291 = vector.extract_strided_slice %290 {offsets = [0, 0], sizes = [32, 16], strides = [1, 1]} : vector<32x144xbf16> to vector<32x16xbf16>
    %292 = vector.extract_strided_slice %290 {offsets = [0, 16], sizes = [32, 16], strides = [1, 1]} : vector<32x144xbf16> to vector<32x16xbf16>
    %293 = vector.extract_strided_slice %290 {offsets = [0, 32], sizes = [32, 16], strides = [1, 1]} : vector<32x144xbf16> to vector<32x16xbf16>
    %294 = vector.extract_strided_slice %290 {offsets = [0, 48], sizes = [32, 16], strides = [1, 1]} : vector<32x144xbf16> to vector<32x16xbf16>
    %295 = vector.extract_strided_slice %290 {offsets = [0, 64], sizes = [32, 16], strides = [1, 1]} : vector<32x144xbf16> to vector<32x16xbf16>
    %296 = vector.extract_strided_slice %290 {offsets = [0, 80], sizes = [32, 16], strides = [1, 1]} : vector<32x144xbf16> to vector<32x16xbf16>
    %297 = vector.extract_strided_slice %290 {offsets = [0, 96], sizes = [32, 16], strides = [1, 1]} : vector<32x144xbf16> to vector<32x16xbf16>
    %298 = vector.extract_strided_slice %290 {offsets = [0, 112], sizes = [32, 16], strides = [1, 1]} : vector<32x144xbf16> to vector<32x16xbf16>
    %299 = vector.extract_strided_slice %290 {offsets = [0, 128], sizes = [32, 16], strides = [1, 1]} : vector<32x144xbf16> to vector<32x16xbf16>
    %300 = tpu.concatenate %291, %292, %293, %294, %295, %296, %297, %298, %299 in 0 : vector<32x16xbf16>, vector<32x16xbf16>, vector<32x16xbf16>, vector<32x16xbf16>, vector<32x16xbf16>, vector<32x16xbf16>, vector<32x16xbf16>, vector<32x16xbf16>, vector<32x16xbf16> -> vector<288x16xbf16>
    %cst_41 = arith.constant dense<0.000000e+00> : vector<32x16xf32>
    %301 = tpu.matmul %287, %300, %cst_41 {dimension_numbers = #tpu.dot_dimension_numbers<[1], [0], [0], [1], [0, 0, 1, 1], [], []>} : vector<32x288xbf16>, vector<288x16xbf16>, vector<32x16xf32> -> vector<32x16xf32>
    %302 = vector.broadcast %77 : vector<32x1xf32> to vector<32x16xf32>
    %303 = arith.mulf %301, %302 : vector<32x16xf32>
    %304 = vector.broadcast %66 : vector<1x16xf32> to vector<32x16xf32>
    %305 = arith.addf %303, %304 : vector<32x16xf32>
    %cst_42 = arith.constant 0.000000e+00 : f32
    %306 = vector.broadcast %cst_42 : f32 to vector<32x16xf32>
    %307 = arith.maximumf %305, %306 : vector<32x16xf32>
    %c0_43 = arith.constant 0 : index
    %c0_44 = arith.constant 0 : index
    %c0_45 = arith.constant 0 : index
    %308 = vector.load %arg10[%c0_43, %c0_44, %c0_45] : memref<1x16x288xbf16, #tpu.memory_space<vmem>>, vector<1x16x288xbf16>
    %309 = vector.shape_cast %308 : vector<1x16x288xbf16> to vector<16x288xbf16>
    %c0_46 = arith.constant 0 : index
    %c0_47 = arith.constant 0 : index
    %c0_48 = arith.constant 0 : index
    %310 = vector.load %arg11[%c0_46, %c0_47, %c0_48] : memref<1x1x32xf32, #tpu.memory_space<vmem>>, vector<1x1x32xf32>
    %311 = vector.shape_cast %310 : vector<1x1x32xf32> to vector<1x32xf32>
    %cst_49 = arith.constant 1.200000e+01 : f32
    %312 = vector.broadcast %cst_49 : f32 to vector<32x32xf32>
    %313 = arith.cmpf olt, %35, %312 : vector<32x32xf32>
    %cst_50 = arith.constant 1.000000e+00 : f32
    %cst_51 = arith.constant 0.000000e+00 : f32
    %314 = vector.broadcast %cst_50 : f32 to vector<32x32xf32>
    %315 = vector.broadcast %cst_51 : f32 to vector<32x32xf32>
    %316 = arith.select %313, %314, %315 : vector<32x32xi1>, vector<32x32xf32>
    %317 = arith.mulf %62, %316 : vector<32x32xf32>
    %cst_52 = arith.constant dense<0.000000e+00> : vector<32xf32>
    %318 = vector.multi_reduction <add>, %317, %cst_52 [1] : vector<32x32xf32> to vector<32xf32>
    %319 = vector.shape_cast %318 : vector<32xf32> to vector<32x1xf32>
    %cst_53 = arith.constant 1.000000e+00 : f32
    %320 = vector.broadcast %cst_53 : f32 to vector<32x1xf32>
    %321 = arith.maximumf %319, %320 : vector<32x1xf32>
    %322 = tpu.reciprocal %321 {approx = true} : vector<32x1xf32> -> vector<32x1xf32>
    %323 = arith.index_cast %arg0 : i32 to index
    %c64 = arith.constant 64 : index
    %324 = memref.load %arg5[%323, %c64] : memref<2x128xf32, #tpu.memory_space<smem>>
    %325 = vector.broadcast %324 : f32 to vector<32x32xf32>
    %326 = arith.mulf %17, %325 : vector<32x32xf32>
    %327 = arith.index_cast %arg0 : i32 to index
    %c72 = arith.constant 72 : index
    %328 = memref.load %arg5[%327, %c72] : memref<2x128xf32, #tpu.memory_space<smem>>
    %329 = vector.broadcast %328 : f32 to vector<32x32xf32>
    %330 = arith.mulf %22, %329 : vector<32x32xf32>
    %331 = arith.addf %326, %330 : vector<32x32xf32>
    %332 = arith.index_cast %arg0 : i32 to index
    %c80 = arith.constant 80 : index
    %333 = memref.load %arg5[%332, %c80] : memref<2x128xf32, #tpu.memory_space<smem>>
    %334 = vector.broadcast %333 : f32 to vector<32x32xf32>
    %335 = arith.mulf %27, %334 : vector<32x32xf32>
    %336 = arith.addf %331, %335 : vector<32x32xf32>
    %337 = arith.index_cast %arg0 : i32 to index
    %c88 = arith.constant 88 : index
    %338 = memref.load %arg5[%337, %c88] : memref<2x128xf32, #tpu.memory_space<smem>>
    %339 = vector.broadcast %338 : f32 to vector<32x32xf32>
    %340 = arith.mulf %35, %339 : vector<32x32xf32>
    %341 = arith.addf %336, %340 : vector<32x32xf32>
    %342 = arith.index_cast %arg0 : i32 to index
    %c96 = arith.constant 96 : index
    %343 = memref.load %arg5[%342, %c96] : memref<2x128xf32, #tpu.memory_space<smem>>
    %344 = vector.broadcast %343 : f32 to vector<32x32xf32>
    %345 = arith.addf %341, %344 : vector<32x32xf32>
    %cst_54 = arith.constant 0.000000e+00 : f32
    %346 = vector.broadcast %cst_54 : f32 to vector<32x32xf32>
    %347 = arith.maximumf %345, %346 : vector<32x32xf32>
    %348 = arith.mulf %347, %317 : vector<32x32xf32>
    %349 = arith.index_cast %arg0 : i32 to index
    %c65 = arith.constant 65 : index
    %350 = memref.load %arg5[%349, %c65] : memref<2x128xf32, #tpu.memory_space<smem>>
    %351 = vector.broadcast %350 : f32 to vector<32x32xf32>
    %352 = arith.mulf %17, %351 : vector<32x32xf32>
    %353 = arith.index_cast %arg0 : i32 to index
    %c73 = arith.constant 73 : index
    %354 = memref.load %arg5[%353, %c73] : memref<2x128xf32, #tpu.memory_space<smem>>
    %355 = vector.broadcast %354 : f32 to vector<32x32xf32>
    %356 = arith.mulf %22, %355 : vector<32x32xf32>
    %357 = arith.addf %352, %356 : vector<32x32xf32>
    %358 = arith.index_cast %arg0 : i32 to index
    %c81 = arith.constant 81 : index
    %359 = memref.load %arg5[%358, %c81] : memref<2x128xf32, #tpu.memory_space<smem>>
    %360 = vector.broadcast %359 : f32 to vector<32x32xf32>
    %361 = arith.mulf %27, %360 : vector<32x32xf32>
    %362 = arith.addf %357, %361 : vector<32x32xf32>
    %363 = arith.index_cast %arg0 : i32 to index
    %c89 = arith.constant 89 : index
    %364 = memref.load %arg5[%363, %c89] : memref<2x128xf32, #tpu.memory_space<smem>>
    %365 = vector.broadcast %364 : f32 to vector<32x32xf32>
    %366 = arith.mulf %35, %365 : vector<32x32xf32>
    %367 = arith.addf %362, %366 : vector<32x32xf32>
    %368 = arith.index_cast %arg0 : i32 to index
    %c97 = arith.constant 97 : index
    %369 = memref.load %arg5[%368, %c97] : memref<2x128xf32, #tpu.memory_space<smem>>
    %370 = vector.broadcast %369 : f32 to vector<32x32xf32>
    %371 = arith.addf %367, %370 : vector<32x32xf32>
    %cst_55 = arith.constant 0.000000e+00 : f32
    %372 = vector.broadcast %cst_55 : f32 to vector<32x32xf32>
    %373 = arith.maximumf %371, %372 : vector<32x32xf32>
    %374 = arith.mulf %373, %317 : vector<32x32xf32>
    %375 = arith.index_cast %arg0 : i32 to index
    %c66 = arith.constant 66 : index
    %376 = memref.load %arg5[%375, %c66] : memref<2x128xf32, #tpu.memory_space<smem>>
    %377 = vector.broadcast %376 : f32 to vector<32x32xf32>
    %378 = arith.mulf %17, %377 : vector<32x32xf32>
    %379 = arith.index_cast %arg0 : i32 to index
    %c74 = arith.constant 74 : index
    %380 = memref.load %arg5[%379, %c74] : memref<2x128xf32, #tpu.memory_space<smem>>
    %381 = vector.broadcast %380 : f32 to vector<32x32xf32>
    %382 = arith.mulf %22, %381 : vector<32x32xf32>
    %383 = arith.addf %378, %382 : vector<32x32xf32>
    %384 = arith.index_cast %arg0 : i32 to index
    %c82 = arith.constant 82 : index
    %385 = memref.load %arg5[%384, %c82] : memref<2x128xf32, #tpu.memory_space<smem>>
    %386 = vector.broadcast %385 : f32 to vector<32x32xf32>
    %387 = arith.mulf %27, %386 : vector<32x32xf32>
    %388 = arith.addf %383, %387 : vector<32x32xf32>
    %389 = arith.index_cast %arg0 : i32 to index
    %c90 = arith.constant 90 : index
    %390 = memref.load %arg5[%389, %c90] : memref<2x128xf32, #tpu.memory_space<smem>>
    %391 = vector.broadcast %390 : f32 to vector<32x32xf32>
    %392 = arith.mulf %35, %391 : vector<32x32xf32>
    %393 = arith.addf %388, %392 : vector<32x32xf32>
    %394 = arith.index_cast %arg0 : i32 to index
    %c98 = arith.constant 98 : index
    %395 = memref.load %arg5[%394, %c98] : memref<2x128xf32, #tpu.memory_space<smem>>
    %396 = vector.broadcast %395 : f32 to vector<32x32xf32>
    %397 = arith.addf %393, %396 : vector<32x32xf32>
    %cst_56 = arith.constant 0.000000e+00 : f32
    %398 = vector.broadcast %cst_56 : f32 to vector<32x32xf32>
    %399 = arith.maximumf %397, %398 : vector<32x32xf32>
    %400 = arith.mulf %399, %317 : vector<32x32xf32>
    %401 = arith.index_cast %arg0 : i32 to index
    %c67 = arith.constant 67 : index
    %402 = memref.load %arg5[%401, %c67] : memref<2x128xf32, #tpu.memory_space<smem>>
    %403 = vector.broadcast %402 : f32 to vector<32x32xf32>
    %404 = arith.mulf %17, %403 : vector<32x32xf32>
    %405 = arith.index_cast %arg0 : i32 to index
    %c75 = arith.constant 75 : index
    %406 = memref.load %arg5[%405, %c75] : memref<2x128xf32, #tpu.memory_space<smem>>
    %407 = vector.broadcast %406 : f32 to vector<32x32xf32>
    %408 = arith.mulf %22, %407 : vector<32x32xf32>
    %409 = arith.addf %404, %408 : vector<32x32xf32>
    %410 = arith.index_cast %arg0 : i32 to index
    %c83 = arith.constant 83 : index
    %411 = memref.load %arg5[%410, %c83] : memref<2x128xf32, #tpu.memory_space<smem>>
    %412 = vector.broadcast %411 : f32 to vector<32x32xf32>
    %413 = arith.mulf %27, %412 : vector<32x32xf32>
    %414 = arith.addf %409, %413 : vector<32x32xf32>
    %415 = arith.index_cast %arg0 : i32 to index
    %c91 = arith.constant 91 : index
    %416 = memref.load %arg5[%415, %c91] : memref<2x128xf32, #tpu.memory_space<smem>>
    %417 = vector.broadcast %416 : f32 to vector<32x32xf32>
    %418 = arith.mulf %35, %417 : vector<32x32xf32>
    %419 = arith.addf %414, %418 : vector<32x32xf32>
    %420 = arith.index_cast %arg0 : i32 to index
    %c99 = arith.constant 99 : index
    %421 = memref.load %arg5[%420, %c99] : memref<2x128xf32, #tpu.memory_space<smem>>
    %422 = vector.broadcast %421 : f32 to vector<32x32xf32>
    %423 = arith.addf %419, %422 : vector<32x32xf32>
    %cst_57 = arith.constant 0.000000e+00 : f32
    %424 = vector.broadcast %cst_57 : f32 to vector<32x32xf32>
    %425 = arith.maximumf %423, %424 : vector<32x32xf32>
    %426 = arith.mulf %425, %317 : vector<32x32xf32>
    %427 = arith.index_cast %arg0 : i32 to index
    %c68 = arith.constant 68 : index
    %428 = memref.load %arg5[%427, %c68] : memref<2x128xf32, #tpu.memory_space<smem>>
    %429 = vector.broadcast %428 : f32 to vector<32x32xf32>
    %430 = arith.mulf %17, %429 : vector<32x32xf32>
    %431 = arith.index_cast %arg0 : i32 to index
    %c76 = arith.constant 76 : index
    %432 = memref.load %arg5[%431, %c76] : memref<2x128xf32, #tpu.memory_space<smem>>
    %433 = vector.broadcast %432 : f32 to vector<32x32xf32>
    %434 = arith.mulf %22, %433 : vector<32x32xf32>
    %435 = arith.addf %430, %434 : vector<32x32xf32>
    %436 = arith.index_cast %arg0 : i32 to index
    %c84 = arith.constant 84 : index
    %437 = memref.load %arg5[%436, %c84] : memref<2x128xf32, #tpu.memory_space<smem>>
    %438 = vector.broadcast %437 : f32 to vector<32x32xf32>
    %439 = arith.mulf %27, %438 : vector<32x32xf32>
    %440 = arith.addf %435, %439 : vector<32x32xf32>
    %441 = arith.index_cast %arg0 : i32 to index
    %c92 = arith.constant 92 : index
    %442 = memref.load %arg5[%441, %c92] : memref<2x128xf32, #tpu.memory_space<smem>>
    %443 = vector.broadcast %442 : f32 to vector<32x32xf32>
    %444 = arith.mulf %35, %443 : vector<32x32xf32>
    %445 = arith.addf %440, %444 : vector<32x32xf32>
    %446 = arith.index_cast %arg0 : i32 to index
    %c100 = arith.constant 100 : index
    %447 = memref.load %arg5[%446, %c100] : memref<2x128xf32, #tpu.memory_space<smem>>
    %448 = vector.broadcast %447 : f32 to vector<32x32xf32>
    %449 = arith.addf %445, %448 : vector<32x32xf32>
    %cst_58 = arith.constant 0.000000e+00 : f32
    %450 = vector.broadcast %cst_58 : f32 to vector<32x32xf32>
    %451 = arith.maximumf %449, %450 : vector<32x32xf32>
    %452 = arith.mulf %451, %317 : vector<32x32xf32>
    %453 = arith.index_cast %arg0 : i32 to index
    %c69 = arith.constant 69 : index
    %454 = memref.load %arg5[%453, %c69] : memref<2x128xf32, #tpu.memory_space<smem>>
    %455 = vector.broadcast %454 : f32 to vector<32x32xf32>
    %456 = arith.mulf %17, %455 : vector<32x32xf32>
    %457 = arith.index_cast %arg0 : i32 to index
    %c77 = arith.constant 77 : index
    %458 = memref.load %arg5[%457, %c77] : memref<2x128xf32, #tpu.memory_space<smem>>
    %459 = vector.broadcast %458 : f32 to vector<32x32xf32>
    %460 = arith.mulf %22, %459 : vector<32x32xf32>
    %461 = arith.addf %456, %460 : vector<32x32xf32>
    %462 = arith.index_cast %arg0 : i32 to index
    %c85 = arith.constant 85 : index
    %463 = memref.load %arg5[%462, %c85] : memref<2x128xf32, #tpu.memory_space<smem>>
    %464 = vector.broadcast %463 : f32 to vector<32x32xf32>
    %465 = arith.mulf %27, %464 : vector<32x32xf32>
    %466 = arith.addf %461, %465 : vector<32x32xf32>
    %467 = arith.index_cast %arg0 : i32 to index
    %c93 = arith.constant 93 : index
    %468 = memref.load %arg5[%467, %c93] : memref<2x128xf32, #tpu.memory_space<smem>>
    %469 = vector.broadcast %468 : f32 to vector<32x32xf32>
    %470 = arith.mulf %35, %469 : vector<32x32xf32>
    %471 = arith.addf %466, %470 : vector<32x32xf32>
    %472 = arith.index_cast %arg0 : i32 to index
    %c101 = arith.constant 101 : index
    %473 = memref.load %arg5[%472, %c101] : memref<2x128xf32, #tpu.memory_space<smem>>
    %474 = vector.broadcast %473 : f32 to vector<32x32xf32>
    %475 = arith.addf %471, %474 : vector<32x32xf32>
    %cst_59 = arith.constant 0.000000e+00 : f32
    %476 = vector.broadcast %cst_59 : f32 to vector<32x32xf32>
    %477 = arith.maximumf %475, %476 : vector<32x32xf32>
    %478 = arith.mulf %477, %317 : vector<32x32xf32>
    %479 = arith.index_cast %arg0 : i32 to index
    %c70 = arith.constant 70 : index
    %480 = memref.load %arg5[%479, %c70] : memref<2x128xf32, #tpu.memory_space<smem>>
    %481 = vector.broadcast %480 : f32 to vector<32x32xf32>
    %482 = arith.mulf %17, %481 : vector<32x32xf32>
    %483 = arith.index_cast %arg0 : i32 to index
    %c78 = arith.constant 78 : index
    %484 = memref.load %arg5[%483, %c78] : memref<2x128xf32, #tpu.memory_space<smem>>
    %485 = vector.broadcast %484 : f32 to vector<32x32xf32>
    %486 = arith.mulf %22, %485 : vector<32x32xf32>
    %487 = arith.addf %482, %486 : vector<32x32xf32>
    %488 = arith.index_cast %arg0 : i32 to index
    %c86 = arith.constant 86 : index
    %489 = memref.load %arg5[%488, %c86] : memref<2x128xf32, #tpu.memory_space<smem>>
    %490 = vector.broadcast %489 : f32 to vector<32x32xf32>
    %491 = arith.mulf %27, %490 : vector<32x32xf32>
    %492 = arith.addf %487, %491 : vector<32x32xf32>
    %493 = arith.index_cast %arg0 : i32 to index
    %c94 = arith.constant 94 : index
    %494 = memref.load %arg5[%493, %c94] : memref<2x128xf32, #tpu.memory_space<smem>>
    %495 = vector.broadcast %494 : f32 to vector<32x32xf32>
    %496 = arith.mulf %35, %495 : vector<32x32xf32>
    %497 = arith.addf %492, %496 : vector<32x32xf32>
    %498 = arith.index_cast %arg0 : i32 to index
    %c102 = arith.constant 102 : index
    %499 = memref.load %arg5[%498, %c102] : memref<2x128xf32, #tpu.memory_space<smem>>
    %500 = vector.broadcast %499 : f32 to vector<32x32xf32>
    %501 = arith.addf %497, %500 : vector<32x32xf32>
    %cst_60 = arith.constant 0.000000e+00 : f32
    %502 = vector.broadcast %cst_60 : f32 to vector<32x32xf32>
    %503 = arith.maximumf %501, %502 : vector<32x32xf32>
    %504 = arith.mulf %503, %317 : vector<32x32xf32>
    %505 = arith.index_cast %arg0 : i32 to index
    %c71 = arith.constant 71 : index
    %506 = memref.load %arg5[%505, %c71] : memref<2x128xf32, #tpu.memory_space<smem>>
    %507 = vector.broadcast %506 : f32 to vector<32x32xf32>
    %508 = arith.mulf %17, %507 : vector<32x32xf32>
    %509 = arith.index_cast %arg0 : i32 to index
    %c79 = arith.constant 79 : index
    %510 = memref.load %arg5[%509, %c79] : memref<2x128xf32, #tpu.memory_space<smem>>
    %511 = vector.broadcast %510 : f32 to vector<32x32xf32>
    %512 = arith.mulf %22, %511 : vector<32x32xf32>
    %513 = arith.addf %508, %512 : vector<32x32xf32>
    %514 = arith.index_cast %arg0 : i32 to index
    %c87 = arith.constant 87 : index
    %515 = memref.load %arg5[%514, %c87] : memref<2x128xf32, #tpu.memory_space<smem>>
    %516 = vector.broadcast %515 : f32 to vector<32x32xf32>
    %517 = arith.mulf %27, %516 : vector<32x32xf32>
    %518 = arith.addf %513, %517 : vector<32x32xf32>
    %519 = arith.index_cast %arg0 : i32 to index
    %c95 = arith.constant 95 : index
    %520 = memref.load %arg5[%519, %c95] : memref<2x128xf32, #tpu.memory_space<smem>>
    %521 = vector.broadcast %520 : f32 to vector<32x32xf32>
    %522 = arith.mulf %35, %521 : vector<32x32xf32>
    %523 = arith.addf %518, %522 : vector<32x32xf32>
    %524 = arith.index_cast %arg0 : i32 to index
    %c103 = arith.constant 103 : index
    %525 = memref.load %arg5[%524, %c103] : memref<2x128xf32, #tpu.memory_space<smem>>
    %526 = vector.broadcast %525 : f32 to vector<32x32xf32>
    %527 = arith.addf %523, %526 : vector<32x32xf32>
    %cst_61 = arith.constant 0.000000e+00 : f32
    %528 = vector.broadcast %cst_61 : f32 to vector<32x32xf32>
    %529 = arith.maximumf %527, %528 : vector<32x32xf32>
    %530 = arith.mulf %529, %317 : vector<32x32xf32>
    %531 = tpu.concatenate %348, %374, %400, %426, %452, %478, %504, %530, %317 in 1 : vector<32x32xf32>, vector<32x32xf32>, vector<32x32xf32>, vector<32x32xf32>, vector<32x32xf32>, vector<32x32xf32>, vector<32x32xf32>, vector<32x32xf32>, vector<32x32xf32> -> vector<32x288xf32>
    %532 = arith.truncf %531 : vector<32x288xf32> to vector<32x288xbf16>
    %533 = arith.truncf %307 : vector<32x16xf32> to vector<32x16xbf16>
    %cst_62 = arith.constant dense<0.000000e+00> : vector<32x288xf32>
    %534 = tpu.matmul %533, %309, %cst_62 {dimension_numbers = #tpu.dot_dimension_numbers<[1], [0], [0], [1], [0, 0, 1, 1], [], []>} : vector<32x16xbf16>, vector<16x288xbf16>, vector<32x288xf32> -> vector<32x288xf32>
    %535 = arith.truncf %534 : vector<32x288xf32> to vector<32x288xbf16>
    %536 = vector.extract_strided_slice %535 {offsets = [0, 0], sizes = [32, 32], strides = [1, 1]} : vector<32x288xbf16> to vector<32x32xbf16>
    %537 = vector.extract_strided_slice %535 {offsets = [0, 32], sizes = [32, 32], strides = [1, 1]} : vector<32x288xbf16> to vector<32x32xbf16>
    %538 = vector.extract_strided_slice %535 {offsets = [0, 64], sizes = [32, 32], strides = [1, 1]} : vector<32x288xbf16> to vector<32x32xbf16>
    %539 = vector.extract_strided_slice %535 {offsets = [0, 96], sizes = [32, 32], strides = [1, 1]} : vector<32x288xbf16> to vector<32x32xbf16>
    %540 = vector.extract_strided_slice %535 {offsets = [0, 128], sizes = [32, 32], strides = [1, 1]} : vector<32x288xbf16> to vector<32x32xbf16>
    %541 = vector.extract_strided_slice %535 {offsets = [0, 160], sizes = [32, 32], strides = [1, 1]} : vector<32x288xbf16> to vector<32x32xbf16>
    %542 = vector.extract_strided_slice %535 {offsets = [0, 192], sizes = [32, 32], strides = [1, 1]} : vector<32x288xbf16> to vector<32x32xbf16>
    %543 = vector.extract_strided_slice %535 {offsets = [0, 224], sizes = [32, 32], strides = [1, 1]} : vector<32x288xbf16> to vector<32x32xbf16>
    %544 = vector.extract_strided_slice %535 {offsets = [0, 256], sizes = [32, 32], strides = [1, 1]} : vector<32x288xbf16> to vector<32x32xbf16>
    %545 = tpu.concatenate %536, %537, %538, %539, %540, %541, %542, %543, %544 in 0 : vector<32x32xbf16>, vector<32x32xbf16>, vector<32x32xbf16>, vector<32x32xbf16>, vector<32x32xbf16>, vector<32x32xbf16>, vector<32x32xbf16>, vector<32x32xbf16>, vector<32x32xbf16> -> vector<288x32xbf16>
    %cst_63 = arith.constant dense<0.000000e+00> : vector<32x32xf32>
    %546 = tpu.matmul %532, %545, %cst_63 {dimension_numbers = #tpu.dot_dimension_numbers<[1], [0], [0], [1], [0, 0, 1, 1], [], []>} : vector<32x288xbf16>, vector<288x32xbf16>, vector<32x32xf32> -> vector<32x32xf32>
    %547 = vector.broadcast %322 : vector<32x1xf32> to vector<32x32xf32>
    %548 = arith.mulf %546, %547 : vector<32x32xf32>
    %549 = vector.broadcast %311 : vector<1x32xf32> to vector<32x32xf32>
    %550 = arith.addf %548, %549 : vector<32x32xf32>
    %cst_64 = arith.constant 0.000000e+00 : f32
    %551 = vector.broadcast %cst_64 : f32 to vector<32x32xf32>
    %552 = arith.maximumf %550, %551 : vector<32x32xf32>
    %c0_65 = arith.constant 0 : index
    %c0_66 = arith.constant 0 : index
    %c0_67 = arith.constant 0 : index
    %553 = vector.load %arg4[%c0_65, %c0_66, %c0_67] : memref<1x8x32xf32, #tpu.memory_space<vmem>>, vector<1x8x32xf32>
    %554 = vector.shape_cast %553 : vector<1x8x32xf32> to vector<8x32xf32>
    %cst_68 = arith.constant dense<0.000000e+00> : vector<8x32xf32>
    %555 = tpu.matmul %554, %552, %cst_68 {dimension_numbers = #tpu.dot_dimension_numbers<[1], [0], [0], [1], [0, 0, 1, 1], [], []>} : vector<8x32xf32>, vector<32x32xf32>, vector<8x32xf32> -> vector<8x32xf32>
    %c0_69 = arith.constant 0 : index
    %c0_70 = arith.constant 0 : index
    %c0_71 = arith.constant 0 : index
    %556 = vector.load %arg12[%c0_69, %c0_70, %c0_71] : memref<1x32x32xf32, #tpu.memory_space<vmem>>, vector<1x32x32xf32>
    %557 = vector.shape_cast %556 : vector<1x32x32xf32> to vector<32x32xf32>
    %cst_72 = arith.constant dense<0.000000e+00> : vector<8x32xf32>
    %558 = tpu.matmul %555, %557, %cst_72 {dimension_numbers = #tpu.dot_dimension_numbers<[1], [0], [0], [1], [0, 0, 1, 1], [], []>} : vector<8x32xf32>, vector<32x32xf32>, vector<8x32xf32> -> vector<8x32xf32>
    %c0_73 = arith.constant 0 : index
    %c0_74 = arith.constant 0 : index
    %c0_75 = arith.constant 0 : index
    %559 = vector.load %arg13[%c0_73, %c0_74, %c0_75] : memref<1x1x32xf32, #tpu.memory_space<vmem>>, vector<1x1x32xf32>
    %560 = vector.shape_cast %559 : vector<1x1x32xf32> to vector<1x32xf32>
    %561 = vector.broadcast %560 : vector<1x32xf32> to vector<8x32xf32>
    %562 = arith.addf %558, %561 : vector<8x32xf32>
    %cst_76 = arith.constant 0.000000e+00 : f32
    %563 = vector.broadcast %cst_76 : f32 to vector<8x32xf32>
    %564 = arith.maximumf %562, %563 : vector<8x32xf32>
    %c0_77 = arith.constant 0 : index
    %c0_78 = arith.constant 0 : index
    %c0_79 = arith.constant 0 : index
    %565 = vector.load %arg14[%c0_77, %c0_78, %c0_79] : memref<1x32x128xf32, #tpu.memory_space<vmem>>, vector<1x32x128xf32>
    %566 = vector.shape_cast %565 : vector<1x32x128xf32> to vector<32x128xf32>
    %cst_80 = arith.constant dense<0.000000e+00> : vector<8x128xf32>
    %567 = tpu.matmul %564, %566, %cst_80 {dimension_numbers = #tpu.dot_dimension_numbers<[1], [0], [0], [1], [0, 0, 1, 1], [], []>} : vector<8x32xf32>, vector<32x128xf32>, vector<8x128xf32> -> vector<8x128xf32>
    %c0_81 = arith.constant 0 : index
    %c0_82 = arith.constant 0 : index
    %c0_83 = arith.constant 0 : index
    %568 = vector.load %arg15[%c0_81, %c0_82, %c0_83] : memref<1x1x128xf32, #tpu.memory_space<vmem>>, vector<1x1x128xf32>
    %569 = vector.shape_cast %568 : vector<1x1x128xf32> to vector<1x128xf32>
    %570 = vector.broadcast %569 : vector<1x128xf32> to vector<8x128xf32>
    %571 = arith.addf %567, %570 : vector<8x128xf32>
    %c0_84 = arith.constant 0 : index
    %c0_85 = arith.constant 0 : index
    %c0_86 = arith.constant 0 : index
    %572 = vector.load %arg16[%c0_84, %c0_85, %c0_86] : memref<1x8x128xf32, #tpu.memory_space<vmem>>, vector<1x8x128xf32>
    %573 = vector.shape_cast %572 : vector<1x8x128xf32> to vector<8x128xf32>
    %574 = vector.shape_cast %571 : vector<8x128xf32> to vector<1x8x128xf32>
    tpu.vector_store %arg16[%c0_84, %c0_85, %c0_86], %574 {strides = array<i32>} : memref<1x8x128xf32, #tpu.memory_space<vmem>>, vector<1x8x128xf32>,
    return
  }
  func.func @transform_0(%arg0: i32) -> (i32, i32, i32) {
    %c0_i32 = arith.constant 0 : i32
    %c0_i32_0 = arith.constant 0 : i32
    %c0_i32_1 = arith.constant 0 : i32
    return %arg0, %c0_i32, %c0_i32_0 : i32, i32, i32
  }
  func.func @transform_1(%arg0: i32) -> (i32, i32, i32) {
    %c0_i32 = arith.constant 0 : i32
    %c0_i32_0 = arith.constant 0 : i32
    %c0_i32_1 = arith.constant 0 : i32
    return %arg0, %c0_i32, %c0_i32_0 : i32, i32, i32
  }
  func.func @transform_2(%arg0: i32) -> (i32, i32, i32) {
    %c0_i32 = arith.constant 0 : i32
    %c0_i32_0 = arith.constant 0 : i32
    %c0_i32_1 = arith.constant 0 : i32
    return %arg0, %c0_i32, %c0_i32_0 : i32, i32, i32
  }
  func.func @transform_3(%arg0: i32) -> (i32, i32, i32) {
    %c0_i32 = arith.constant 0 : i32
    %c0_i32_0 = arith.constant 0 : i32
    %c0_i32_1 = arith.constant 0 : i32
    return %arg0, %c0_i32, %c0_i32_0 : i32, i32, i32
  }
  func.func @transform_4(%arg0: i32) -> (i32, i32) {
    %c0_i32 = arith.constant 0 : i32
    %c0_i32_0 = arith.constant 0 : i32
    %c0_i32_1 = arith.constant 0 : i32
    return %c0_i32, %c0_i32_0 : i32, i32
  }
  func.func @transform_5(%arg0: i32) -> (i32, i32, i32) {
    %c0_i32 = arith.constant 0 : i32
    %c0_i32_0 = arith.constant 0 : i32
    %c0_i32_1 = arith.constant 0 : i32
    return %arg0, %c0_i32, %c0_i32_0 : i32, i32, i32
  }
  func.func @transform_6(%arg0: i32) -> (i32, i32, i32) {
    %c0_i32 = arith.constant 0 : i32
    %c0_i32_0 = arith.constant 0 : i32
    %c0_i32_1 = arith.constant 0 : i32
    return %arg0, %c0_i32, %c0_i32_0 : i32, i32, i32
  }
  func.func @transform_7(%arg0: i32) -> (i32, i32, i32) {
    %c0_i32 = arith.constant 0 : i32
    %c0_i32_0 = arith.constant 0 : i32
    %c0_i32_1 = arith.constant 0 : i32
    return %arg0, %c0_i32, %c0_i32_0 : i32, i32, i32
  }
  func.func @transform_8(%arg0: i32) -> (i32, i32, i32) {
    %c0_i32 = arith.constant 0 : i32
    %c0_i32_0 = arith.constant 0 : i32
    %c0_i32_1 = arith.constant 0 : i32
    return %arg0, %c0_i32, %c0_i32_0 : i32, i32, i32
  }
  func.func @transform_9(%arg0: i32) -> (i32, i32, i32) {
    %c0_i32 = arith.constant 0 : i32
    %c0_i32_0 = arith.constant 0 : i32
    %c0_i32_1 = arith.constant 0 : i32
    return %arg0, %c0_i32, %c0_i32_0 : i32, i32, i32
  }
  func.func @transform_10(%arg0: i32) -> (i32, i32, i32) {
    %c0_i32 = arith.constant 0 : i32
    %c0_i32_0 = arith.constant 0 : i32
    %c0_i32_1 = arith.constant 0 : i32
    return %arg0, %c0_i32, %c0_i32_0 : i32, i32, i32
  }
  func.func @transform_11(%arg0: i32) -> (i32, i32, i32) {
    %c0_i32 = arith.constant 0 : i32
    %c0_i32_0 = arith.constant 0 : i32
    %c0_i32_1 = arith.constant 0 : i32
    return %arg0, %c0_i32, %c0_i32_0 : i32, i32, i32
  }
  func.func @transform_12(%arg0: i32) -> (i32, i32, i32) {
    %c0_i32 = arith.constant 0 : i32
    %c0_i32_0 = arith.constant 0 : i32
    %c0_i32_1 = arith.constant 0 : i32
    return %arg0, %c0_i32, %c0_i32_0 : i32, i32, i32
  }
  func.func @transform_13(%arg0: i32) -> (i32, i32, i32) {
    %c0_i32 = arith.constant 0 : i32
    %c0_i32_0 = arith.constant 0 : i32
    %c0_i32_1 = arith.constant 0 : i32
    return %arg0, %c0_i32, %c0_i32_0 : i32, i32, i32
  }
  func.func @transform_14(%arg0: i32) -> (i32, i32, i32) {
    %c0_i32 = arith.constant 0 : i32
    %c0_i32_0 = arith.constant 0 : i32
    %c0_i32_1 = arith.constant 0 : i32
    return %arg0, %c0_i32, %c0_i32_0 : i32, i32, i32
  }
  func.func @transform_15(%arg0: i32) -> (i32, i32, i32) {
    %c0_i32 = arith.constant 0 : i32
    %c0_i32_0 = arith.constant 0 : i32
    %c0_i32_1 = arith.constant 0 : i32
    return %arg0, %c0_i32, %c0_i32_0 : i32, i32, i32
  }
}

</mosaic_0001>

<bundles_post_ra>
// kernel: tpu_custom_call.1
= control target key start
LH: loop header
LB: loop body
LE: loop exit
PB: predicated region body
PF: predicated region fallthrough
CT: control target
= control target key end

     0   :  { %s6303_s0 = inlined_call_operand.hbm [shape: bf16[2,32,32], index: 0, kind: input, shape index: {}]   ;;  %s6304_s1 = inlined_call_operand.vmem [shape: f32[2,32,8], index: 1, kind: input, shape index: {}]   ;;  %s6305_s2 = inlined_call_operand.hbm [shape: f32[2,8,32], index: 2, kind: input, shape index: {}]   ;;  %s6306_s3 = inlined_call_operand.hbm [shape: f32[2,8,32], index: 3, kind: input, shape index: {}]   ;;  %s6307_s4 = inlined_call_operand.vmem [shape: f32[2,128], index: 4, kind: input, shape index: {}]   ;;  %s6308_s5 = inlined_call_operand.vmem [shape: bf16[2,32,16], index: 5, kind: input, shape index: {}]   ;;  %s6309_s6 = inlined_call_operand.vmem [shape: f32[2,1,16], index: 6, kind: input, shape index: {}]   ;;  %s6310_s7 = inlined_call_operand.hbm [shape: bf16[2,16,144], index: 7, kind: input, shape index: {}]   ;;  %s6311_s8 = inlined_call_operand.vmem [shape: f32[2,1,16], index: 8, kind: input, shape index: {}]   ;;  %s6312_s9 = inlined_call_operand.hbm [shape: bf16[2,16,288], index: 9, kind: input, shape index: {}]   ;;  %s6313_s10 = inlined_call_operand.vmem [shape: f32[2,1,32], index: 10, kind: input, shape index: {}]   ;;  %s6314_s11 = inlined_call_operand.vmem [shape: f32[2,32,32], index: 11, kind: input, shape index: {}]   ;;  %s6315_s12 = inlined_call_operand.vmem [shape: f32[2,1,32], index: 12, kind: input, shape index: {}]   ;;  %s6316_s13 = inlined_call_operand.vmem [shape: f32[2,32,128], index: 13, kind: input, shape index: {}]   ;;  %s6317_s14 = inlined_call_operand.vmem [shape: f32[2,1,128], index: 14, kind: input, shape index: {}]   ;;  %s6318_s15 = inlined_call_operand.hbm [shape: f32[2,8,128], index: 15, kind: output, shape index: {}]  }
   0x1   :  { %6489 = sst [smem:[#allocation111_spill]] %s6303_s0 }
   0x2   :  { %6490 = sst [smem:[#allocation112_spill]] %s6304_s1 }
   0x3   :  { %6491 = sst [smem:[#allocation113_spill]] %s6305_s2 }
   0x4   :  { %6492 = sst [smem:[#allocation114_spill]] %s6306_s3 }
   0x5   :  { %6493 = sst [smem:[#allocation115_spill]] %s6307_s4 }
   0x6   :  { %6494 = sst [smem:[#allocation116_spill]] %s6308_s5 }
   0x7   :  { %6495 = sst [smem:[#allocation117_spill]] %s6309_s6 }
   0x8   :  { %6496 = sst [smem:[#allocation118_spill]] %s6310_s7 }
   0x9   :  { %6497 = sst [smem:[#allocation119_spill]] %s6311_s8 }
   0xa   :  { %6498 = sst [smem:[#allocation120_spill]] %s6312_s9 }
   0xb   :  { %6499 = sst [smem:[#allocation121_spill]] %s6313_s10 }
   0xc   :  { %6500 = sst [smem:[#allocation122_spill]] %s6314_s11 }
   0xd   :  { %6501 = sst [smem:[#allocation123_spill]] %s6315_s12 }
   0xe   :  { %6502 = sst [smem:[#allocation124_spill]] %s6316_s13 }
   0xf   :  { %6503 = sst [smem:[#allocation125_spill]] %s6317_s14 }
  0x10   :  { %6504 = sst [smem:[#allocation126_spill]] %s6318_s15 }
  0x11   :  { %20 = vsyncpa [#allocation3], 0 }
  0x12   :  { %22 = vsyncpa [#allocation3 + $0x1], 0 }
  0x13   :  { %23 = vsyncpa [#allocation7], 0 }
  0x14   :  { %25 = vsyncpa [#allocation7 + $0x1], 0 }
  0x15   :  { %26 = vsyncpa [#allocation5], 0 }
  0x16   :  { %27 = vsyncpa [#allocation11], 0 }
  0x17   :  { %29 = vsyncpa [#allocation11 + $0x1], 0 }
  0x18   :  { %30 = vsyncpa [#allocation4], 0 }
  0x19   :  { %32 = vsyncpa [#allocation4 + $0x1], 0  ;;  %s4281_s18 = smov 0   ;;  %s4283_s19 = smov 0  }
  0x1a   :  { %s4285_s20 = smov 0   ;;  %s4287_s21 = smov 0  }
  0x1b LB: > { %6505 = sst [smem:[#allocation19_spill]] %s4158_s18  ;;  %s4302_s22 = sadd.s32 1, %s4170_s21   ;;  %s4170_s21 = sphi %s4287_s21, %s6754_s21   ;;  %s4166_s20 = sphi %s4285_s20, %s6757_s20   ;;  %s4162_s19 = sphi %s4283_s19, %s6756_s19   ;;  %s4158_s18 = sphi %s4281_s18, %s6755_s18  }
  0x1c   : > { %6506 = sst [smem:[#allocation20_spill]] %s4162_s19  ;;  %s45_s23 = sadd.s32 1, %s4166_s20 }
  0x1d   : > { %6507 = sst [smem:[#allocation21_spill]] %s4166_s20  ;;  %s42_s24 = ssub.s32 %s4170_s21, %s4302_s22 }
  0x1e   : > { %6508 = sst [smem:[#allocation22_spill]] %s4170_s21  ;;  %p6323_p0 = scmp.ne.s32.totalorder %s4166_s20, %s4162_s19 }
  0x1f   : > { %6509 = sst [smem:[#allocation23_spill]] %s4302_s22  ;;  %p43_p1 = scmp.eq.s32.totalorder %s42_s24, 0 }
  0x20   : > { %p53_p2 = scmp.eq.s32.totalorder %s4170_s21, 0  ;;  %p3697_p4 = scmp.lt.s32.totalorder %s4170_s21, 2 }
  0x21   : > { %s4313_s25 = scalar_select %p43_p1, %s4166_s20, %s45_s23  }
  0x22   : > { %p54_p5 = por %p53_p2, %p6323_p0  ;;  %s4319_s26 = sand.u32 1, %s4166_s20  }
  0x23   : > { %6510 = sst [smem:[#allocation24_spill]] %s4313_s25  ;;  %s6322_s28 = sshll.u32 %s4319_s26, 3 }
  0x24   : > { %p4323_p6 = pnand %p3697_p4, %p54_p5  ;;  %s3424_s30 = sshll.u32 %s4170_s21, 7 }
  0x25   : > { %s6512_s2 = sld [smem:[#allocation113_spill]]  ;;  %s511_s23 = scalar_lea.vmem [#allocation6], %s6322_s28 }
  0x26   : > { %s6511_s29 = scalar_select %p4323_p6, 1, 0 }
  0x27   : > { %s518_s25 = sshll.u32 %s511_s23, 4  ;;  %s6513_s3 = sld [smem:[#allocation114_spill]]  ;;  %s4335_s25 = int_to_ptr.vmem [resolvable:$true] %s518_s25 }
  0x28   : > { %s6514_s14 = sand.u32 1, %s4170_s21   ;;  %p4350_p8 = pneg %p4323_p6 }
  0x29   : > { %s4344_s12 = scalar_lea.sflag [#allocation7], %s6514_s14 }
  0x2b   : > { %s4331_s24 = scalar_lea.hbm %s6512_s2, %s3424_s30  ;;  %s3932_s22 = scalar_lea.hbm %s6512_s2, 256 }
  0x2c   : > { %s3927_s16 = scalar_lea.hbm %s4331_s24, 128  ;;  %p3933_p11 = scmp.lt.u32.totalorder %s4331_s24, %s6512_s2 }
  0x2d   : > { %s4340_s15 = scalar_lea.hbm %s6513_s3, %s3424_s30  ;;  %p3928_p7 = scmp.ne.s32.totalorder %s4331_s24, %s3927_s16 }
  0x2e   : > { %p3934_p12 = scmp.lt.u32.totalorder %s3932_s22, %s3927_s16  ;;  %p3936_p1 = scmp.lt.u32.totalorder %s3927_s16, %s4331_s24 }
  0x2f   : > { %p3930_p9 = pnand %p4350_p8, %p3928_p7 }
  0x30   : > { %p3935_p13 = por %p3934_p12, %p3933_p11 }
  0x31   : > { %p3931_p10 = pneg %p3930_p9 }
  0x32   : > { %p3937_p2 = por %p3936_p1, %p3935_p13 }
  0x34   : > { %p3938_p4 = pnand %p3937_p2, %p3931_p10 }
  0x36   : > { %3941 = shalt.err (!%p3938_p4)
}
  0x37   : > { %s3942_s14 = scalar_lea.vmem %s4335_s25, 128  ;;  %s4172_s28 = smov [#allocation6]  }
  0x38   : > { %p3943_p5 = scmp.ne.s32.totalorder %s4335_s25, %s3942_s14  ;;  %s3947_s23 = sshll.u32 %s4172_s28, 4  ;;  %s3948_s23 = int_to_ptr.vmem [resolvable:$false] %s3947_s23 }
  0x39   : > { %s3949_s27 = scalar_lea.vmem %s3948_s23, 256  ;;  %p3950_p3 = scmp.lt.s32.totalorder %s4335_s25, %s3948_s23 }
  0x3a   : > { %p3945_p7 = pnand %p3943_p5, %p4350_p8  ;;  %p3951_p0 = scmp.lt.s32.totalorder %s3949_s27, %s3942_s14 }
  0x3c   : > { %p3946_p9 = pneg %p3945_p7  ;;  %p3952_p11 = por %p3951_p0, %p3950_p3 }
  0x3e   : > { %p3953_p12 = pnand %p3952_p11, %p3946_p9 }
  0x40   : > { %3956 = shalt.err (!%p3953_p12)
}
  0x41   : > { %3682 = dma.hbm_to_vmem [thread:$0]  (!%p4323_p6), %s4331_s24, 128, %s4335_s25, %s4344_s12  }
  0x42   : > { %s6325_s16 = sshll.u32 %s4319_s26, 4  ;;  %s6324_s22 = sshll.u32 %s4170_s21, 8 }
  0x43   : > { %s6516_s7 = sld [smem:[#allocation118_spill]]  ;;  %s561_s23 = scalar_lea.vmem [#allocation10], %s6325_s16 }
  0x44   : > { %s568_s27 = sshll.u32 %s561_s23, 4  ;;  %s6517_s2 = sand.u32 1, %s4170_s21   ;;  %s4385_s27 = int_to_ptr.vmem [resolvable:$true] %s568_s27 }
  0x45   : > { %s4389_s13 = scalar_lea.sflag [#allocation11], %s6517_s2 }
  0x49   : > { %s4381_s28 = scalar_lea.hbm %s6516_s7, %s6324_s22  ;;  %s3962_s14 = scalar_lea.hbm %s6516_s7, 512 }
  0x4a   : > { %s3957_s25 = scalar_lea.hbm %s4381_s28, 256  ;;  %p3963_p13 = scmp.lt.u32.totalorder %s4381_s28, %s6516_s7 }
  0x4b   : > { %p3958_p0 = scmp.ne.s32.totalorder %s4381_s28, %s3957_s25  ;;  %p3964_p1 = scmp.lt.u32.totalorder %s3962_s14, %s3957_s25 }
  0x4c   : > { %p3966_p4 = scmp.lt.u32.totalorder %s3957_s25, %s4381_s28 }
  0x4d   : > { %p3960_p3 = pnand %p3958_p0, %p4350_p8  ;;  %p3965_p2 = por %p3964_p1, %p3963_p13 }
  0x4f   : > { %p3961_p10 = pneg %p3960_p3  ;;  %p3967_p5 = por %p3966_p4, %p3965_p2 }
  0x51   : > { %p3968_p7 = pnand %p3967_p5, %p3961_p10 }
  0x53   : > { %3971 = shalt.err (!%p3968_p7)
}
  0x54   : > { %s3972_s2 = scalar_lea.vmem %s4385_s27, 256  ;;  %s4173_s23 = smov [#allocation10]  }
  0x55   : > { %p3973_p9 = scmp.ne.s32.totalorder %s4385_s27, %s3972_s2  ;;  %s3977_s24 = sshll.u32 %s4173_s23, 4  ;;  %s3978_s24 = int_to_ptr.vmem [resolvable:$false] %s3977_s24 }
  0x56   : > { %s3979_s11 = scalar_lea.vmem %s3978_s24, 512  ;;  %p3980_p0 = scmp.lt.s32.totalorder %s4385_s27, %s3978_s24 }
  0x57   : > { %p3975_p11 = pnand %p3973_p9, %p4350_p8  ;;  %p3981_p3 = scmp.lt.s32.totalorder %s3979_s11, %s3972_s2 }
  0x59   : > { %p3976_p12 = pneg %p3975_p11  ;;  %p3982_p13 = por %p3981_p3, %p3980_p0 }
  0x5b   : > { %p3983_p1 = pnand %p3982_p13, %p3976_p12 }
  0x5d   : > { %3986 = shalt.err (!%p3983_p1)
}
  0x5e   : > { %s4174_s22 = smov 128   ;;  %s4175_s25 = smov 8  }
  0x5f   : > { %3688 = dma.hbm_to_vmem [thread:$0]  (!%p4323_p6), %s4381_s28, 256, %s4385_s27, %s4389_s13, %s4174_s22, %s4174_s22, %s4175_s25  }
  0x60   : > { %s4414_s30 = sadd.s32 4294967295, %s4170_s21   ;;  %s3416_s14 = sadd.s32 4294967294, %s4170_s21  }
  0x61   : > { %p58_p10 = scmp.ne.s32.totalorder %s4162_s19, %s4158_s18  ;;  %p6331_p2 = scmp.eq.s32.totalorder %s4414_s30, 0 }
  0x62   : > { %p441_p4 = scmp.eq.s32.totalorder %s4414_s30, 1  ;;  %p447_p5 = scmp.eq.s32.totalorder %s3416_s14, 1 }
  0x63   : > { %p3417_p7 = scmp.ge.s32.totalorder %s4170_s21, 1  ;;  %p4424_p9 = por %p6331_p2, %p58_p10 }
  0x64   : > { %p6519_p11 = scmp.ne.s32.totalorder %s4166_s20, %s4162_s19  ;;  %p4435_p0 = por %p447_p5, %p58_p10 }
  0x65   : > { %s6518_s2 = scalar_select %p4424_p9, 1, 0 }
  0x66   : > { %p4431_p12 = por %p441_p4, %p6519_p11  ;;  %p454_p3 = scmp.lt.s32.totalorder %s4170_s21, 3 }
  0x67   : > { %s6522_s27 = scalar_select %p4435_p0, 1, 0 }
  0x68   : > { %s6520_s28 = scalar_select %p4431_p12, 1, 0 }
  0x69   : > { %6523 = sst [smem:[#allocation26_spill]] %s6522_s27  ;;  %s6524_s4 = sld [smem:[#allocation115_spill]] }
  0x6a   : > { %6521 = sst [smem:[#allocation25_spill]] %s6520_s28  ;;  %p4443_p13 = pnand %p3417_p7, %p454_p3 }
  0x6b   : > { %s6526_s25 = sshll.u32 %s4170_s21, 8  ;;  %s6527_s0 = sld [smem:[#allocation111_spill]] }
  0x6c   : > { %s6525_s22 = scalar_select %p4443_p13, 1, 0 }
  0x6d   : > { %p3672_p1 = pneg %p4443_p13  ;;  %s6528_s20 = sshll.u32 %s4319_s26, 4 }
  0x6e   : > { %s482_s27 = scalar_lea.vmem [#allocation2], %s6528_s20  ;;  %s6530_s24 = sshll.u32 %s4319_s26, 3 }
  0x6f   : > { %s467_s11 = sshll.u32 %s6524_s4, 4  ;;  %s489_s18 = sshll.u32 %s482_s27, 4  ;;  %s468_s11 = int_to_ptr.vmem [resolvable:$true] %s467_s11  ;;  %s4464_s18 = int_to_ptr.vmem [resolvable:$true] %s489_s18 }
  0x70   : > { %p4460_p10 = pnand %p3672_p1, %p6331_p2  ;;  %s4468_s4 = scalar_lea.vmem [#allocation8], %s6530_s24 }
  0x71   : > { %s4454_s7 = scalar_lea.hbm %s6527_s0, %s6526_s25  ;;  %s3987_s10 = scalar_lea.vmem %s468_s11, 32 }
  0x72   : > { %p3988_p4 = scmp.ne.s32.totalorder %s468_s11, %s3987_s10  ;;  %p3989_p5 = pneg %p4460_p10 }
  0x73   : > { %p3995_p3 = scmp.lt.s32.totalorder %s468_s11, %s468_s11  ;;  %p3996_p0 = scmp.lt.s32.totalorder %s3987_s10, %s3987_s10 }
  0x74   : > { %p3990_p7 = pnand %p3989_p5, %p3988_p4 }
  0x75   : > { %p3997_p1 = por %p3996_p0, %p3995_p3 }
  0x76   : > { %p3991_p11 = pneg %p3990_p7 }
  0x78   : > { %p3998_p2 = pnand %p3997_p1, %p3991_p11 }
  0x7a   : > { %4001 = shalt.err (!%p3998_p2)
}
  0x7b   : > { %s4176_s20 = smov [#allocation9]   ;;  %s479_s16 = scalar_lea.sflag [#allocation3], %s4319_s26 }
  0x7c   : > { %3675 = dma.vmem_to_smem (!%p4460_p10), %s468_s11, 32, %s4176_s20, [#allocation5]  }
  0x7d   : > { %s4002_s27 = scalar_lea.hbm %s4454_s7, 256  ;;  %s4007_s14 = scalar_lea.hbm %s6527_s0, 512 }
  0x7e   : > { %p4003_p12 = scmp.ne.s32.totalorder %s4454_s7, %s4002_s27  ;;  %p4008_p2 = scmp.lt.u32.totalorder %s4454_s7, %s6527_s0 }
  0x7f   : > { %p4009_p0 = scmp.lt.u32.totalorder %s4007_s14, %s4002_s27  ;;  %p4011_p11 = scmp.lt.u32.totalorder %s4002_s27, %s4454_s7 }
  0x80   : > { %p4005_p4 = pnand %p4003_p12, %p4350_p8 }
  0x81   : > { %p4010_p7 = por %p4009_p0, %p4008_p2 }
  0x82   : > { %p4006_p5 = pneg %p4005_p4 }
  0x83   : > { %p4012_p3 = por %p4011_p11, %p4010_p7 }
  0x85   : > { %p4013_p1 = pnand %p4012_p3, %p4006_p5 }
  0x87   : > { %4016 = shalt.err (!%p4013_p1)
}
  0x88   : > { %s4017_s11 = scalar_lea.vmem %s4464_s18, 256  ;;  %s4177_s23 = smov [#allocation2]  }
  0x89   : > { %p4018_p12 = scmp.ne.s32.totalorder %s4464_s18, %s4017_s11  ;;  %s4022_s20 = sshll.u32 %s4177_s23, 4  ;;  %s4023_s20 = int_to_ptr.vmem [resolvable:$false] %s4022_s20 }
  0x8a   : > { %s4024_s28 = scalar_lea.vmem %s4023_s20, 512  ;;  %p4025_p9 = scmp.lt.s32.totalorder %s4464_s18, %s4023_s20 }
  0x8b   : > { %p4020_p10 = pnand %p4018_p12, %p4350_p8  ;;  %p4026_p13 = scmp.lt.s32.totalorder %s4024_s28, %s4017_s11 }
  0x8d   : > { %p4021_p4 = pneg %p4020_p10  ;;  %p4027_p2 = por %p4026_p13, %p4025_p9 }
  0x8f   : > { %p4028_p0 = pnand %p4027_p2, %p4021_p4 }
  0x91   : > { %4031 = shalt.err (!%p4028_p0)
}
  0x92   : > { %s4178_s27 = smov 64   ;;  %s4179_s10 = smov 4  }
  0x93   : > { %3679 = dma.hbm_to_vmem [thread:$0]  (!%p4323_p6), %s4454_s7, 256, %s4464_s18, %s479_s16, %s4178_s27, %s4178_s27, %s4179_s10  }
  0x94   : > { %s6531_s25 = sshll.u32 %s4468_s4, 4  ;;  %s3653_s14 = smul.u32 24, %s4319_s26  ;;  %s537_s25 = int_to_ptr.vmem [resolvable:$true] %s6531_s25 }
  0x95   : > { %s4032_s24 = scalar_lea.hbm %s4340_s15, 128  ;;  %s4037_s20 = scalar_lea.hbm %s6513_s3, 256 }
  0x96   : > { %p4033_p9 = scmp.ne.s32.totalorder %s4340_s15, %s4032_s24  ;;  %p4038_p7 = scmp.lt.u32.totalorder %s4340_s15, %s6513_s3 }
  0x97   : > { %p4039_p11 = scmp.lt.u32.totalorder %s4037_s20, %s4032_s24  ;;  %p4041_p1 = scmp.lt.u32.totalorder %s4032_s24, %s4340_s15 }
  0x98   : > { %p4035_p13 = pnand %p4033_p9, %p4350_p8 }
  0x99   : > { %p4040_p3 = por %p4039_p11, %p4038_p7 }
  0x9a   : > { %p4036_p5 = pneg %p4035_p13 }
  0x9b   : > { %p4042_p12 = por %p4041_p1, %p4040_p3 }
  0x9d   : > { %p4043_p10 = pnand %p4042_p12, %p4036_p5 }
  0x9f   : > { %4046 = shalt.err (!%p4043_p10)
}
  0xa0   : > { %s4047_s4 = scalar_lea.vmem %s537_s25, 128  ;;  %s4180_s7 = smov [#allocation8]  }
  0xa1   : > { %p4048_p4 = scmp.ne.s32.totalorder %s537_s25, %s4047_s4  ;;  %s4052_s18 = sshll.u32 %s4180_s7, 4  ;;  %s4053_s18 = int_to_ptr.vmem [resolvable:$false] %s4052_s18 }
  0xa2   : > { %s4054_s26 = scalar_lea.vmem %s4053_s18, 256  ;;  %p4055_p9 = scmp.lt.s32.totalorder %s537_s25, %s4053_s18 }
  0xa3   : > { %p4050_p2 = pnand %p4048_p4, %p4350_p8  ;;  %p4056_p13 = scmp.lt.s32.totalorder %s4054_s26, %s4047_s4 }
  0xa5   : > { %p4051_p0 = pneg %p4050_p2  ;;  %p4057_p6 = por %p4056_p13, %p4055_p9 }
  0xa7   : > { %p4058_p7 = pnand %p4057_p6, %p4051_p0 }
  0xa9   : > { %4061 = shalt.err (!%p4058_p7)
}
  0xaa   : > { %p6532_p11 = scmp.ne.s32.totalorder %s6511_s29, 0  ;;  %s3654_s0 = smul.u32 384, %s4170_s21 }
  0xab   : > { %s588_s16 = scalar_lea.vmem [#allocation12], %s3653_s14  ;;  %s6533_s9 = sld [smem:[#allocation120_spill]] }
  0xac   : > { %3685 = dma.hbm_to_vmem [thread:$0]  (!%p6532_p11), %s4340_s15, 128, %s537_s25, %s4344_s12  }
  0xad   : > { %s595_s27 = sshll.u32 %s588_s16, 4  ;;  %s4526_s27 = int_to_ptr.vmem [resolvable:$true] %s595_s27 }
  0xb1   : > { %s4524_s11 = scalar_lea.hbm %s6533_s9, %s3654_s0  ;;  %s4067_s25 = scalar_lea.hbm %s6533_s9, 768 }
  0xb2   : > { %s4062_s23 = scalar_lea.hbm %s4524_s11, 384  ;;  %p4068_p1 = scmp.lt.u32.totalorder %s4524_s11, %s6533_s9 }
  0xb3   : > { %p4063_p6 = scmp.ne.s32.totalorder %s4524_s11, %s4062_s23  ;;  %p4069_p12 = scmp.lt.u32.totalorder %s4067_s25, %s4062_s23 }
  0xb4   : > { %p4071_p4 = scmp.lt.u32.totalorder %s4062_s23, %s4524_s11 }
  0xb5   : > { %p4065_p5 = pnand %p4063_p6, %p4350_p8  ;;  %p4070_p10 = por %p4069_p12, %p4068_p1 }
  0xb7   : > { %p4066_p3 = pneg %p4065_p5  ;;  %p4072_p2 = por %p4071_p4, %p4070_p10 }
  0xb9   : > { %p4073_p0 = pnand %p4072_p2, %p4066_p3 }
  0xbb   : > { %4076 = shalt.err (!%p4073_p0)
}
  0xbc   : > { %s4077_s28 = scalar_lea.vmem %s4526_s27, 384  ;;  %s4181_s4 = smov [#allocation12]  }
  0xbd   : > { %p4078_p9 = scmp.ne.s32.totalorder %s4526_s27, %s4077_s28  ;;  %s4082_s7 = sshll.u32 %s4181_s4, 4  ;;  %s4083_s7 = int_to_ptr.vmem [resolvable:$false] %s4082_s7 }
  0xbe   : > { %s4084_s18 = scalar_lea.vmem %s4083_s7, 768  ;;  %p4085_p6 = scmp.lt.s32.totalorder %s4526_s27, %s4083_s7 }
  0xbf   : > { %p4080_p13 = pnand %p4078_p9, %p4350_p8  ;;  %p4086_p5 = scmp.lt.s32.totalorder %s4084_s18, %s4077_s28 }
  0xc1   : > { %p4081_p7 = pneg %p4080_p13  ;;  %p4087_p1 = por %p4086_p5, %p4085_p6 }
  0xc3   : > { %p4088_p12 = pnand %p4087_p1, %p4081_p7 }
  0xc5   : > { %4091 = shalt.err (!%p4088_p12)
}
  0xc6   : > { %s4182_s26 = smov 192   ;;  %s4183_s0 = smov 12  }
  0xc7   : > { %3691 = dma.hbm_to_vmem [thread:$0]  (!%p6532_p11), %s4524_s11, 384, %s4526_s27, %s4389_s13, %s4182_s26, %s4182_s26, %s4183_s0  }
  0xc8   : > { %p6534_p8 = scmp.ne.s32.totalorder %s6525_s22, 0 }
  0xca   : > { %641 = sbr.rel (%p6534_p8) target bundleno = 2326 (0x916), region = 80 }
  0xd1   : > { %s4553_s17 = sand.u32 1, %s4162_s19   ;;  %p6536_p3 = scmp.ne.s32.totalorder %s6518_s2, 0 }
  0xd2   : > { %6535 = sst [smem:[#allocation27_spill]] %s4553_s17  ;;  %s3432_s16 = sshll.u32 %s4553_s17, 4 }
  0xd3   : > { %s644_s10 = scalar_lea.sflag [#allocation3], %s4553_s17  ;;  %s4557_s24 = scalar_lea.vmem [#allocation2], %s3432_s16 }
  0xd4   : > { %4137 = dma.done.wait (%p6536_p3), %s644_s10, 256  }
  0xd5   : > { %4139 = vsyncadd (%p6536_p3), %s644_s10, 4294967040  ;;  %s652_s13 = sand.u32 1, %s4414_s30   ;;  %s4565_s29 = sshll.u32 %s4553_s17, 3 }
  0xd6   : > { %6537 = sst [smem:[#allocation28_spill]] %s4565_s29  ;;  %s653_s22 = scalar_lea.sflag [#allocation7], %s652_s13 }
  0xd7   : > { %s656_s27 = scalar_lea.vmem [#allocation6], %s4565_s29 }
  0xd8   : > { %4141 = dma.done.wait (%p6536_p3), %s653_s22, 256  }
  0xd9   : > { %4143 = vsyncadd (%p6536_p3), %s653_s22, 4294967040  ;;  %p6538_p11 = scmp.eq.s32.totalorder %s4414_s30, 0 }
  0xdb   : > { %4145 = dma.done.wait (%p6538_p11), [#allocation5], 32   ;;  %p6539_p10 = pmov %p6538_p11 }
  0xdc   : > { %s675_s23 = scalar_lea.sflag [#allocation11], %s652_s13  ;;  %s4577_s12 = scalar_lea.vmem [#allocation10], %s3432_s16 }
  0xdd   : > { %4147 = vsyncadd (%p6539_p10), [#allocation5], 4294967264 }
  0xde   : > { %4149 = dma.done.wait (%p6536_p3), %s675_s23, 640  }
  0xdf   : > { %4151 = vsyncadd (%p6536_p3), %s675_s23, 4294966656  ;;  %s3655_s15 = smul.u32 24, %s4553_s17 }
  0xe1   : > { %s4584_s25 = scalar_lea.vmem [#allocation12], %s3655_s15 }
  0xe2   : > { %692 = sfence }
  0xe3   : > { %p790_p4 = scmp.lt.s32.totalorder %s4414_s30, 1  ;;  %v3894_v0 = vld [vmem:[%s4557_s24] sm:$0xff]   ;;  %vm863_vm0 = vcmask 261120   ;;  %v4184_v1 = vmov 1   ;;  %v4185_v2 = vmov 2   ;;  %v6348_v3 = vmov 0  }
  0xe4   : > { %3576 = vmatprep.mubr.msk.bf16.mxu0 %vm863_vm0, %v3894_v0  ;;  %3755 = vset.pattern.permute.xlu1 %v4184_v1  ;;  %s6542_s5 = sld [smem:[#allocation116_spill]]  ;;  %s6543_s1 = sld [smem:[#allocation112_spill]]  ;;  %v3895_v8 = vld [vmem:[%s4557_s24 + $0x8] sm:$0xff]   ;;  %v4187_v12 = vmov 5   ;;  %v4188_v13 = vmov 4   ;;  %v4189_v14 = vmov 3   ;;  %v924_v20 = vlaneseq }
  0xe5   : > { %s4589_s14 = scalar_select %p790_p4, %s4414_s30, 1  ;;  %3756 = vset.pattern.permute.xlu0 %v4185_v2  ;;  %1809 = vmatprep.mubr.bf16.mxu1 %v6348_v3  ;;  %v3896_v16 = vld [vmem:[%s4577_s12 + $0x4] ss:$8 sps:$4 sm:$0xff]   ;;  %v3898_v17 = vld [vmem:[%s4577_s12] ss:$8 sps:$4 sm:$0xff]  }
  0xe6   : > { %1777 = vmatprep.subr.bf16.mxu1 %v3896_v16  ;;  %v4614_v21 = vshrl.u32 %v924_v20, 7  ;;  %v4619_v23 = vld [vmem:[%s656_s27] sm:$0xff]  ;;  %s4643_s16 = sshll.u32 %s4414_s30, 7  ;;  %s6337_s28 = smov 32  }
  0xe7   : > { %6540 = sst [smem:[#allocation29_spill]] %s4589_s14  ;;  %s3483_s2 = sshll.u32 %s4589_s14, 4  ;;  %1778 = vmatpush1.bf16.msra.mxu1 %v3898_v17  ;;  %vm1112_vm5 = vcmp.gt.f32.partialorder %v4619_v23, 0.5 }
  0xe8   : > { %s4594_s20 = sshll.u32 %s4589_s14, 5  ;;  %v954_v22 = vsub.s32 1, %v4614_v21  ;;  %v978_v24 = vsub.s32 2, %v4614_v21  ;;  %v926_v26 = vsub.s32 0, %v4614_v21  ;;  %s1465_s10 = sadd.s32 5, %s4643_s16 }
  0xe9   : > { %6541 = sst [smem:[#allocation30_spill]] %s4594_s20  ;;  %s1472_s24 = sadd.s32 13, %s4643_s16 }
  0xea   : > { %s799_s7 = scalar_lea.vmem %s6542_s5, %s3483_s2  ;;  %s794_s0 = scalar_lea.vmem %s6543_s1, %s4594_s20  ;;  %v955_v25 = vrot.slane %v4619_v23, %v954_v22  ;;  %v979_v28 = vrot.slane %v4619_v23, %v978_v24  ;;  %v927_v31 = vrot.slane %v4619_v23, %v926_v26 }
  0xeb   : > { %v3892_v4 = vld [vmem:[%s799_s7] sm:$0xff]   ;;  %v3893_v5 = vld [vmem:[%s799_s7 + $0x8] sm:$0xff]   ;;  %v921_v9 = vld [vmem:[%s794_s0 + $0x10] sm:$0xff]  ;;  %s1466_s30 = sld [smem:[#allocation9 + %s1465_s10]]  ;;  %s1483_s22 = sadd.s32 21, %s4643_s16 }
  0xec   : > { %3572 = vmatprep.subr.bf16.mxu0 %v3892_v4  ;;  %v919_v6 = vld [vmem:[%s794_s0] sm:$0xff]  ;;  %v920_v7 = vld [vmem:[%s794_s0 + $0x8] sm:$0xff]  ;;  %v922_v10 = vld [vmem:[%s794_s0 + $0x18] sm:$0xff]  ;;  %vm1110_vm4 = vcmp.gt.f32.partialorder %v921_v9, 0.5  ;;  %s1473_s13 = sld [smem:[#allocation9 + %s1472_s24]]  ;;  %s1494_s23 = sadd.s32 29, %s4643_s16 }
  0xed   : > { %3573 = vmatpush3.bf16.msra.mxu0 %v3892_v4  ;;  %957 = vperm.xlu1 %3755, %v919_v6   ;;  %vm1108_vm1 = vcmp.gt.f32.partialorder %v919_v6, 0.5  ;;  %vm1109_vm2 = vcmp.gt.f32.partialorder %v920_v7, 0.5  ;;  %vm1111_vm3 = vcmp.gt.f32.partialorder %v922_v10, 0.5  ;;  %v1115_v19 = vsel %vm1110_vm4, 1, %v6348_v3  ;;  %s1484_s27 = sld [smem:[#allocation9 + %s1483_s22]]  ;;  %s1505_s15 = sadd.s32 37, %s4643_s16 }
  0xee   : > { %3574 = vmatprep.subr.bf16.mxu0 %v3893_v5  ;;  %981 = vperm.xlu0 %3756, %v919_v6   ;;  %v1113_v11 = vsel %vm1108_vm1, 1, %v6348_v3  ;;  %v1114_v15 = vsel %vm1109_vm2, 1, %v6348_v3  ;;  %v1116_v18 = vsel %vm1111_vm3, 1, %v6348_v3  ;;  %s4673_s12 = sld [smem:[#allocation9 + %s1494_s23]]  ;;  %v1136_v4 = vsub.s32 5, %v4614_v21  ;;  %s1520_s26 = sadd.s32 6, %s4643_s16 }
  0xef   : > { %s1506_s2 = sld [smem:[#allocation9 + %s1505_s15]]  ;;  %s1527_s0 = sadd.s32 14, %s4643_s16 }
  0xf0   : > { %s6565_s6 = sld [smem:[#allocation117_spill]]  ;;  %s1538_s10 = sadd.s32 22, %s4643_s16 }
  0xf1   : > { %3575 = vmatpush3.bf16.msra.mxu0 %v3893_v5  ;;  %961 = vperm.xlu1 %3755, %v920_v7   ;;  %v4667_v63 = vstv %s1466_s30  ;;  %s1245_s24 = sadd.s32 1, %s4643_s16  ;;  %s4788_s30 = sld [smem:[#allocation9 + %s1520_s26]] }
  0xf2   : > { %3757 = vset.pattern.permute.xlu0 %v6348_v3  ;;  %6550 = vst [vmem:[#allocation37_spill] sm:$0xff] %v4667_v63  ;;  %v4669_v0 = vstv %s1473_s13  ;;  %s4790_s13 = sld [smem:[#allocation9 + %s1527_s0]]  ;;  %s1549_s22 = sadd.s32 30, %s4643_s16 }
  0xf3   : > { %930 = vperm.xlu0 %3757, %v919_v6   ;;  %6551 = vst [vmem:[#allocation38_spill] sm:$0xff] %v4669_v0  ;;  %s4794_s23 = sld [smem:[#allocation9 + %s1538_s10]]  ;;  %s1263_s15 = sadd.s32 17, %s4643_s16 }
  0xf4   : > { %3577 = vmatmul.mubr.msk.bf16.vlgmr.msra.gmra.mrb[0].mxu0 %vm863_vm0, %v3895_v8  ;;  %s4802_s4 = sld [smem:[#allocation9 + %s1549_s22]]  ;;  %s1285_s26 = sadd.s32 33, %s4643_s16 }
  0xf5   : > { %3758 = vset.pattern.permute.xlu1 %v4185_v2  ;;  %s4808_s0 = sld [smem:[#allocation9 + %s1263_s15]]  ;;  %s1307_s11 = sadd.s32 10, %s4643_s16 }
  0xf6   : > { %985 = vperm.xlu1 %3758, %v920_v7   ;;  %s802_s18 = scalar_lea.vmem %s6565_s6, %s4589_s14  ;;  %s4816_s1 = sld [smem:[#allocation9 + %s1285_s26]] }
  0xf7   : > { %935 = vperm.xlu0 %3757, %v920_v7   ;;  %s1318_s22 = sadd.s32 18, %s4643_s16  ;;  %s4822_s5 = sld [smem:[#allocation9 + %s1307_s11]] }
  0xf8   : > { %s1575_s15 = sadd.s32 7, %s4643_s16  ;;  %s1582_s6 = sadd.s32 15, %s4643_s16 }
  0xf9   : > { %s2319_s26 = sadd.s32 77, %s4643_s16  ;;  %s4840_s11 = sld [smem:[#allocation9 + %s1582_s6]] }
  0xfa   : > { %3759 = vset.pattern.permute.xlu1 %v6348_v3  ;;  %s2330_s19 = sadd.s32 85, %s4643_s16  ;;  %s2341_s21 = sadd.s32 93, %s4643_s16 }
  0xfb   : > { %940 = vperm.xlu1 %3759, %v921_v9   ;;  %945 = vperm.xlu0 %3757, %v922_v10   ;;  %s2352_s6 = sadd.s32 101, %s4643_s16  ;;  %s2110_s17 = sadd.s32 81, %s4643_s16 }
  0xfc   : > { %s2121_s29 = sadd.s32 89, %s4643_s16  ;;  %s2429_s8 = sadd.s32 79, %s4643_s16 }
  0xfd   : > { %s4978_s20 = sld [smem:[#allocation9 + %s2121_s29]]  ;;  %s2165_s29 = sadd.s32 82, %s4643_s16 }
  0xff   : > { %3760 = vset.pattern.permute.xlu1 %v4184_v1  ;;  %3761 = vset.pattern.permute.xlu0 %v4185_v2  ;;  %v1094_v1 = vsub.s32 4, %v4614_v21 }
 0x100   : > { %965 = vperm.xlu1 %3760, %v921_v9   ;;  %989 = vperm.xlu0 %3761, %v921_v9  }
 0x104   : > { %969 = vperm.xlu1 %3760, %v922_v10   ;;  %3765 = vset.pattern.permute.xlu0 %v4187_v12 }
 0x105   : > { %1118 = vperm.xlu0 %3765, %v1113_v11   ;;  %v4681_v11 = vstv %s1484_s27  ;;  %s1252_s27 = sadd.s32 9, %s4643_s16 }
 0x106   : > { %6552 = vst [vmem:[#allocation39_spill] sm:$0xff] %v4681_v11  ;;  %s4804_s7 = sld [smem:[#allocation9 + %s1252_s27]]  ;;  %s1329_s27 = sadd.s32 26, %s4643_s16 }
 0x107   : > { %s4828_s9 = sld [smem:[#allocation9 + %s1329_s27]] }
 0x108   : > { %3762 = vset.pattern.permute.xlu1 %v4185_v2  ;;  %s4846_s27 = sld [smem:[#allocation9 + %s2319_s26]]  ;;  %s2385_s26 = sadd.s32 86, %s4643_s16 }
 0x109   : > { %993 = vperm.xlu1 %3762, %v922_v10   ;;  %3766 = vset.pattern.permute.xlu0 %v4188_v13 }
 0x10a   : > { %1081 = vperm.xlu0 %3766, %v920_v7  }
 0x10d   : > { %3763 = vset.pattern.permute.xlu1 %v4188_v13 }
 0x10e   : > { %1077 = vperm.xlu1 %3763, %v919_v6   ;;  %1089 = vperm.xlu0 %3766, %v922_v10  }
 0x112   : > { %3764 = vset.pattern.permute.xlu1 %v4189_v14  ;;  %3770 = vset.pattern.permute.xlu0 %v4187_v12 }
 0x113   : > { %1053 = vperm.xlu1 %3764, %v919_v6   ;;  %1124 = vperm.xlu0 %3770, %v1115_v19  }
 0x117   : > { %1057 = vperm.xlu1 %3764, %v920_v7  }
 0x11b   : > { %3767 = vset.pattern.permute.xlu1 %v4187_v12 }
 0x11c   : > { %1121 = vperm.xlu1 %3767, %v1114_v15  }
 0x120   : > { %3768 = vset.pattern.permute.xlu1 %v4188_v13  ;;  %v4686_v13 = vrot.slane %v4619_v23, %v1094_v1 }
 0x121   : > { %1085 = vperm.xlu1 %3768, %v921_v9  }
 0x125   : > { %3769 = vset.pattern.permute.xlu1 %v4189_v14  ;;  %v1070_v14 = vsub.s32 3, %v4614_v21 }
 0x126   : > { %1061 = vperm.xlu1 %3769, %v921_v9  }
 0x12a   : > { %1065 = vperm.xlu1 %3769, %v922_v10   ;;  %v1133_v10 = vsel %vm1112_vm5, 1, %v6348_v3 }
 0x12b   : > { %v4694_v19 = vrot.slane %v1133_v10, %v1136_v4 }
 0x12d   : > { %vm1138_vm10 = vcmp.eq.s32.totalorder %v4694_v19, 1 }
 0x12e   : > { %3771 = vset.pattern.permute.xlu1 %v4187_v12 }
 0x12f   : > { %1127 = vperm.xlu1 %3771, %v1116_v18  }
 0x16c   : > { %v958_v27 = vpop.permute.xlu1 %957 }
 0x16d   : > { %v982_v29 = vpop.permute.xlu0 %981  ;;  %v4625_v30 = vsub.f32 %v955_v25, %v958_v27 }
 0x16e   : > { %v4628_v33 = vsub.f32 %v979_v28, %v982_v29  ;;  %v4701_v29 = vstv %s4673_s12  ;;  %s4796_s12 = sld [smem:[#allocation9 + %s1245_s24]]  ;;  %s1300_s24 = sadd.s32 2, %s4643_s16 }
 0x16f   : > { %6544 = vst [vmem:[#allocation31_spill] sm:$0xff] %v4625_v30  ;;  %v1004_v37 = vmul.f32 %v4625_v30, %v4625_v30  ;;  %v1475_v7 = vmul.f32 %v4669_v0, %v4625_v30  ;;  %6554 = vst [vmem:[#allocation41_spill] sm:$0xff] %v4701_v29  ;;  %s4820_s3 = sld [smem:[#allocation9 + %s1300_s24]] }
 0x170   : > { %v962_v32 = vpop.permute.xlu1 %961  ;;  %6545 = vst [vmem:[#allocation32_spill] sm:$0xff] %v4628_v33  ;;  %v1012_v40 = vmul.f32 %v4628_v33, %v4628_v33  ;;  %v1486_v22 = vmul.f32 %v4681_v11, %v4628_v33  ;;  %s4838_s24 = sld [smem:[#allocation9 + %s1575_s15]] }
 0x171   : > { %v4630_v35 = vsub.f32 %v955_v25, %v962_v32  ;;  %v4705_v32 = vrot.slane %v4619_v23, %v1070_v14  ;;  %s4864_s15 = sld [smem:[#allocation9 + %s2341_s21]] }
 0x172   : > { %v931_v34 = vpop.permute.xlu0 %930 }
 0x173   : > { %6546 = vst [vmem:[#allocation33_spill] sm:$0xff] %v4630_v35  ;;  %v4632_v36 = vsub.f32 %v927_v31, %v931_v34  ;;  %v1005_v45 = vmul.f32 %v4630_v35, %v4630_v35  ;;  %v1476_v18 = vmul.f32 %v4669_v0, %v4630_v35 }
 0x175   : > { %6547 = vst [vmem:[#allocation34_spill] sm:$0xff] %v4632_v36  ;;  %v986_v38 = vpop.permute.xlu1 %985  ;;  %v1000_v39 = vmul.f32 %v4632_v36, %v4632_v36  ;;  %v1468_v6 = vmul.f32 %v4667_v63, %v4632_v36 }
 0x176   : > { %v4640_v41 = vsub.f32 %v979_v28, %v986_v38  ;;  %v936_v42 = vpop.permute.xlu0 %935 }
 0x177   : > { %v4645_v43 = vsub.f32 %v927_v31, %v936_v42  ;;  %v1008_v44 = vadd.f32 %v1004_v37, %v1000_v39  ;;  %v1479_v20 = vadd.f32 %v1475_v7, %v1468_v6 }
 0x178   : > { %6548 = vst [vmem:[#allocation35_spill] sm:$0xff] %v4640_v41  ;;  %v1013_v50 = vmul.f32 %v4640_v41, %v4640_v41  ;;  %v1487_v37 = vmul.f32 %v4681_v11, %v4640_v41 }
 0x179   : > { %6549 = vst [vmem:[#allocation36_spill] sm:$0xff] %v4645_v43  ;;  %v1016_v46 = vadd.f32 %v1012_v40, %v1008_v44  ;;  %v1001_v47 = vmul.f32 %v4645_v43, %v4645_v43  ;;  %v1469_v17 = vmul.f32 %v4667_v63, %v4645_v43  ;;  %v1490_v39 = vadd.f32 %v1486_v22, %v1479_v20 }
 0x17a   : > { %v941_v48 = vpop.permute.xlu1 %940  ;;  %v946_v49 = vpop.permute.xlu0 %945 }
 0x17b   : > { %v4655_v51 = vsub.f32 %v927_v31, %v941_v48  ;;  %v4657_v52 = vsub.f32 %v927_v31, %v946_v49  ;;  %v1020_v53 = vadd.f32 1e-12, %v1016_v46  ;;  %v1009_v54 = vadd.f32 %v1005_v45, %v1001_v47 }
 0x17c   : > { %v1480_v34 = vadd.f32 %v1476_v18, %v1469_v17 }
 0x17d   : > { %3903 = vrsqrt.f32 %v1020_v53  ;;  %v1017_v55 = vadd.f32 %v1013_v50, %v1009_v54  ;;  %vm1026_vm6 = vcmp.eq.f32.partialorder %v1020_v53, inf  ;;  %v1029_v15 = vand.u32 2147483648, %v1020_v53 }
 0x17e   : > { %vm1028_vm7 = vcmp.eq.f32.partialorder %v1020_v53, 0.0  ;;  %v1491_v46 = vadd.f32 %v1487_v37, %v1480_v34  ;;  %v4720_v50 = vstv %s1506_s2  ;;  %s1274_s2 = sadd.s32 25, %s4643_s16 }
 0x17f   : > { %v966_v56 = vpop.permute.xlu1 %965  ;;  %v990_v57 = vpop.permute.xlu0 %989  ;;  %v1021_v60 = vadd.f32 1e-12, %v1017_v55  ;;  %6556 = vst [vmem:[#allocation43_spill] sm:$0xff] %v4720_v50  ;;  %s4810_s10 = sld [smem:[#allocation9 + %s1274_s2]] }
 0x180   : > { %v4660_v58 = vsub.f32 %v955_v25, %v966_v56  ;;  %v4662_v59 = vsub.f32 %v979_v28, %v990_v57  ;;  %v6350_v56 = vmov 0.0   ;;  %s4826_s2 = sld [smem:[#allocation9 + %s1318_s22]] }
 0x181   : > { %3905 = vrsqrt.f32 %v1021_v60  ;;  %vm1033_vm8 = vcmp.eq.f32.partialorder %v1021_v60, inf  ;;  %v1036_v21 = vand.u32 2147483648, %v1021_v60  ;;  %vm1035_vm9 = vcmp.eq.f32.partialorder %v1021_v60, 0.0 }
 0x183   : > { %v970_v61 = vpop.permute.xlu1 %969 }
 0x184   : > { %v4665_v62 = vsub.f32 %v955_v25, %v970_v61  ;;  %v1119_v5 = vpop.permute.xlu0 %1118 }
 0x185   : > { %vm1129_vm11 = vcmp.eq.s32.totalorder %v1119_v5, 1 }
 0x186   : > { %vm1139_vm14 = vmand %vm1129_vm11, %vm1138_vm10 }
 0x187   : > { %v3904_v2 = vpop.eup %3903 }
 0x188   : > { %v994_v8 = vpop.permute.xlu1 %993  ;;  %v1025_v9 = vmul.f32 %v3904_v2, %v1020_v53 }
 0x189   : > { %v4683_v12 = vsub.f32 %v979_v28, %v994_v8  ;;  %v1082_v27 = vpop.permute.xlu0 %1081 }
 0x18a   : > { %v1027_v16 = vsel %vm1026_vm6, %v1020_v53, %v1025_v9  ;;  %v1097_v42 = vsub.f32 %v1082_v27, %v4686_v13 }
 0x18b   : > { %v3906_v24 = vpop.eup %3905  ;;  %v4698_v26 = vsel %vm1028_vm7, %v1029_v15, %v1027_v16 }
 0x18c   : > { %6553 = vst [vmem:[#allocation40_spill] sm:$0xff] %v4698_v26  ;;  %v1032_v28 = vmul.f32 %v3906_v24, %v1021_v60  ;;  %v1497_v45 = vmul.f32 %v4701_v29, %v4698_v26  ;;  %v1101_v48 = vand.u32 2147483647, %v1097_v42  ;;  %vm1158_vm1 = vcmp.lt.f32.partialorder %v4698_v26, 8.0 }
 0x18d   : > { %v1078_v25 = vpop.permute.xlu1 %1077  ;;  %v1162_v57 = vsel %vm1158_vm1, 1.0, %v6350_v56  ;;  %v1090_v6 = vpop.permute.xlu0 %1089 }
 0x18e   : > { %v1096_v31 = vsub.f32 %v1078_v25, %v4686_v13  ;;  %v1034_v38 = vsel %vm1033_vm8, %v1021_v60, %v1032_v28  ;;  %v1501_v49 = vadd.f32 %v1497_v45, %v1490_v39  ;;  %vm1105_vm4 = vcmp.le.f32.partialorder %v1101_v48, 2.0 }
 0x18f   : > { %v4711_v44 = vsel %vm1035_vm9, %v1036_v21, %v1034_v38  ;;  %v1099_v15 = vsub.f32 %v1090_v6, %v4686_v13  ;;  %v1002_v48 = vmul.f32 %v4655_v51, %v4655_v51 }
 0x190   : > { %v1100_v40 = vand.u32 2147483647, %v1096_v31  ;;  %6555 = vst [vmem:[#allocation42_spill] sm:$0xff] %v4711_v44  ;;  %v1498_v47 = vmul.f32 %v4701_v29, %v4711_v44  ;;  %v1508_v55 = vadd.f32 %v4720_v50, %v1501_v49  ;;  %vm1159_vm5 = vcmp.lt.f32.partialorder %v4711_v44, 8.0  ;;  %v3446_v31 = vld [vmem:[%s802_s18] ss:$0 sm:$0xff] }
 0x191   : > { %v1163_v5 = vsel %vm1159_vm5, 1.0, %v6350_v56  ;;  %v1103_v24 = vand.u32 2147483647, %v1099_v15  ;;  %v1006_v49 = vmul.f32 %v4660_v58, %v4660_v58  ;;  %s1560_s18 = sadd.s32 38, %s4643_s16 }
 0x192   : > { %vm1104_vm12 = vcmp.le.f32.partialorder %v1100_v40, 2.0  ;;  %v1054_v23 = vpop.permute.xlu1 %1053  ;;  %v1502_v54 = vadd.f32 %v1498_v47, %v1491_v46  ;;  %v1512_v4 = vmax.f32 %v1508_v55, 0.0  ;;  %v1003_v46 = vmul.f32 %v4657_v52, %v4657_v52 }
 0x193   : > { %vm1072_vm13 = vcmp.eq.f32.partialorder %v1054_v23, %v4705_v32  ;;  %v1007_v47 = vmul.f32 %v4665_v62, %v4665_v62  ;;  %v1010_v55 = vadd.f32 %v1006_v49, %v1002_v48 }
 0x194   : > { %vm1143_vm15 = vmand %vm1072_vm13, %vm1104_vm12  ;;  %v1509_v61 = vadd.f32 %v4720_v50, %v1502_v54  ;;  %v1015_v54 = vmul.f32 %v4683_v12, %v4683_v12 }
 0x195   : > { %vm1147_vm2 = vmand %vm1143_vm15, %vm1139_vm14  ;;  %vm1107_vm14 = vcmp.le.f32.partialorder %v1103_v24, 2.0 }
 0x196   : > { %v1058_v53 = vpop.permute.xlu1 %1057  ;;  %v4727_v60 = vsel %vm1147_vm2, 1.0, %v6350_v56  ;;  %v1513_v7 = vmax.f32 %v1509_v61, 0.0  ;;  %vm1770_vm2 = vcmask 130048  }
 0x197   : > { %vm1073_vm3 = vcmp.eq.f32.partialorder %v1058_v53, %v4705_v32  ;;  %6557 = vst [vmem:[#allocation44_spill] sm:$0xff] %v4727_v60  ;;  %v4732_v2 = vmul.f32 %v1162_v57, %v4727_v60  ;;  %v1011_v53 = vadd.f32 %v1007_v47, %v1003_v46  ;;  %v1014_v57 = vmul.f32 %v4662_v59, %v4662_v59 }
 0x198   : > { %vm1144_vm6 = vmand %vm1073_vm3, %vm1105_vm4 }
 0x199   : > { %6558 = vst [vmem:[#allocation45_spill] sm:$0xff] %v4732_v2  ;;  %v1516_v10 = vmul.f32 %v1512_v4, %v4732_v2  ;;  %v1019_v61 = vadd.f32 %v1015_v54, %v1011_v53 }
 0x19b   : > { %v1122_v1 = vpop.permute.xlu1 %1121  ;;  %v4782_v4 = vadd.f32 1e-12, %v1019_v61  ;;  %v4937_v61 = vstv %s4808_s0 }
 0x19c   : > { %vm1130_vm7 = vcmp.eq.s32.totalorder %v1122_v1, 1  ;;  %v1018_v1 = vadd.f32 %v1014_v57, %v1010_v55  ;;  %6575 = vst [vmem:[#allocation53_spill] sm:$0xff] %v4937_v61  ;;  %v5044_v57 = vstv %s4826_s2  ;;  %s2451_s2 = sadd.s32 95, %s4643_s16 }
 0x19d   : > { %vm1140_vm8 = vmand %vm1130_vm7, %vm1138_vm10  ;;  %3907 = vrsqrt.f32 %v4782_v4  ;;  %vm1047_vm3 = vcmp.eq.f32.partialorder %v4782_v4, inf  ;;  %vm1049_vm5 = vcmp.eq.f32.partialorder %v4782_v4, 0.0  ;;  %6585 = vst [vmem:[#allocation63_spill] sm:$0xff] %v5044_v57 }
 0x19e   : > { %vm1148_vm9 = vmand %vm1144_vm6, %vm1140_vm8 }
 0x19f   : > { %v4738_v8 = vsel %vm1148_vm9, 1.0, %v6350_v56 }
 0x1a0   : > { %6559 = vst [vmem:[#allocation46_spill] sm:$0xff] %v4738_v8  ;;  %v4741_v9 = vmul.f32 %v1163_v5, %v4738_v8  ;;  %v1086_v14 = vpop.permute.xlu1 %1085  ;;  %v4786_v5 = vadd.f32 1e-12, %v1018_v1 }
 0x1a1   : > { %v1098_v16 = vsub.f32 %v1086_v14, %v4686_v13  ;;  %v4836_v14 = vstv %s4790_s13  ;;  %s4862_s13 = sld [smem:[#allocation9 + %s2330_s19]] }
 0x1a2   : > { %6560 = vst [vmem:[#allocation47_spill] sm:$0xff] %v4741_v9  ;;  %v1517_v17 = vmul.f32 %v1513_v7, %v4741_v9  ;;  %v1754_v18 = vpack.c.bf16 %v4741_v9, %v4732_v2  ;;  %3909 = vrsqrt.f32 %v4786_v5  ;;  %6567 = vst [vmem:[#allocation49_spill] sm:$0xff] %v4836_v14  ;;  %vm1040_vm4 = vcmp.eq.f32.partialorder %v4786_v5, inf  ;;  %s4881_s19 = sld [smem:[#allocation9 + %s2352_s6]] }
 0x1a3   : > { %v1102_v20 = vand.u32 2147483647, %v1098_v16  ;;  %v1531_v24 = vmul.f32 %v4836_v14, %v4630_v35  ;;  %vm1042_vm6 = vcmp.eq.f32.partialorder %v4786_v5, 0.0  ;;  %s4902_s6 = sld [smem:[#allocation9 + %s2385_s26]] }
 0x1a4   : > { %v3772_v22 = vpack.i.bf16 %v1517_v17, %v1516_v10  ;;  %3584 = vmatprep.mubr.msk.bf16.mxu0 %vm863_vm0, %v1754_v18  ;;  %v4833_v10 = vstv %s4788_s30  ;;  %v1530_v18 = vmul.f32 %v4836_v14, %v4625_v30  ;;  %s2367_s30 = sadd.s32 70, %s4643_s16 }
 0x1a5   : > { %vm1106_vm11 = vcmp.le.f32.partialorder %v1102_v20, 2.0  ;;  %v1062_v21 = vpop.permute.xlu1 %1061  ;;  %6566 = vst [vmem:[#allocation48_spill] sm:$0xff] %v4833_v10  ;;  %v1523_v17 = vmul.f32 %v4833_v10, %v4632_v36  ;;  %v1125_v20 = vpop.permute.xlu0 %1124  ;;  %s4883_s21 = sld [smem:[#allocation9 + %s2367_s30]]  ;;  %s2099_s30 = sadd.s32 73, %s4643_s16 }
 0x1a6   : > { %3773 = vrot.lane.b32.xlu1 %v3772_v22, %s6337_s28  ;;  %vm1074_vm12 = vcmp.eq.f32.partialorder %v1062_v21, %v4705_v32  ;;  %s4814_s28 = sld [smem:[#allocation9 + %s1560_s18]]  ;;  %s2312_s18 = sadd.s32 69, %s4643_s16  ;;  %v1524_v22 = vmul.f32 %v4833_v10, %v4645_v43  ;;  %vm1131_vm8 = vcmp.eq.s32.totalorder %v1125_v20, 1 }
 0x1a7   : > { %vm4752_vm13 = vmand %vm1074_vm12, %vm1106_vm11  ;;  %v3908_v6 = vpop.eup %3907  ;;  %s4844_s22 = sld [smem:[#allocation9 + %s2312_s18]]  ;;  %s2374_s18 = sadd.s32 78, %s4643_s16 }
 0x1a8   : > { %v1046_v15 = vmul.f32 %v3908_v6, %v4782_v4  ;;  %vm4932_vm11 = vmand %vm1131_vm8, %vm1138_vm10 }
 0x1a9   : > { %v1066_v25 = vpop.permute.xlu1 %1065  ;;  %v5136_v60 = vstv %s4902_s6  ;;  %s1604_s6 = sadd.s32 31, %s4643_s16 }
 0x1aa   : > { %vm1075_vm15 = vcmp.eq.f32.partialorder %v1066_v25, %v4705_v32  ;;  %v1050_v25 = vand.u32 2147483648, %v4782_v4  ;;  %6600 = vst [vmem:[#allocation78_spill] sm:$0xff] %v5136_v60 }
 0x1ab   : > { %vm4757_vm1 = vmand %vm1075_vm15, %vm1107_vm14 }
 0x1ac   : > { %v3910_v7 = vpop.eup %3909  ;;  %vm1149_vm15 = vmand %vm4752_vm13, %vm4932_vm11 }
 0x1ad   : > { %v1039_v16 = vmul.f32 %v3910_v7, %v4786_v5  ;;  %v5005_v27 = vsel %vm1149_vm15, 1.0, %v6350_v56 }
 0x1ae   : > { %v1128_v21 = vpop.permute.xlu1 %1127  ;;  %6580 = vst [vmem:[#allocation58_spill] sm:$0xff] %v5005_v27 }
 0x1af   : > { %vm1132_vm7 = vcmp.eq.s32.totalorder %v1128_v21, 1  ;;  %v4995_v21 = vstv %s4822_s5  ;;  %s2176_s5 = sadd.s32 90, %s4643_s16 }
 0x1b0   : > { %vm4907_vm9 = vmand %vm1132_vm7, %vm1138_vm10  ;;  %6579 = vst [vmem:[#allocation57_spill] sm:$0xff] %v4995_v21  ;;  %v1310_v46 = vmul.f32 %v4995_v21, %v4625_v30 }
 0x1b1   : > { %vm1150_vm10 = vmand %vm4757_vm1, %vm4907_vm9 }
 0x1b2   : > { %v4986_v20 = vsel %vm1150_vm10, 1.0, %v6350_v56 }
 0x1b3   : > { %6577 = vst [vmem:[#allocation55_spill] sm:$0xff] %v4986_v20 }
 0x1c7   : > { %v3578_v28 = vpop.f32.mrb[0].mxu0 }
 0x1c8   : > { %v904_v34 = vpop.f32.mrb[1].mxu0  ;;  %v913_v38 = vadd.f32 %v3578_v28, %v3446_v31  ;;  %v4870_v28 = vstv %s4794_s23  ;;  %s2396_s23 = sadd.s32 94, %s4643_s16 }
 0x1c9   : > { %v3579_v37 = vpop.f32.mrb[2].mxu0  ;;  %v905_v42 = vadd.f32 %v3446_v31, %v904_v34  ;;  %6568 = vst [vmem:[#allocation50_spill] sm:$0xff] %v4870_v28  ;;  %v4876_v34 = vstv %s4796_s12  ;;  %s2407_s12 = sadd.s32 102, %s4643_s16 }
 0x1ca   : > { %v916_v39 = vadd.f32 %v3579_v37, %v3446_v31  ;;  %v907_v40 = vpop.f32.mrb[3].mxu0  ;;  %v4879_v37 = vstv %s4804_s7  ;;  %s4900_s7 = sld [smem:[#allocation9 + %s2374_s18]]  ;;  %v1248_v47 = vmul.f32 %v4876_v34, %v4632_v36  ;;  %v1249_v48 = vmul.f32 %v4876_v34, %v4645_v43 }
 0x1cb   : > { %v908_v45 = vadd.f32 %v3446_v31, %v907_v40  ;;  %v1043_v31 = vand.u32 2147483648, %v4786_v5  ;;  %6569 = vst [vmem:[#allocation51_spill] sm:$0xff] %v4879_v37  ;;  %v1534_v40 = vadd.f32 %v1530_v18, %v1523_v17  ;;  %v1255_v49 = vmul.f32 %v4879_v37, %v4625_v30  ;;  %s4939_s18 = sld [smem:[#allocation9 + %s2396_s23]] }
 0x1cc   : > { %v1759_v23 = vpack.c.bf16 %v916_v39, %v913_v38  ;;  %v1048_v38 = vsel %vm1047_vm3, %v4782_v4, %v1046_v15  ;;  %v1041_v39 = vsel %vm1040_vm4, %v4786_v5, %v1039_v16  ;;  %v1256_v53 = vmul.f32 %v4879_v37, %v4630_v35  ;;  %s4941_s26 = sld [smem:[#allocation9 + %s2407_s12]]  ;;  %s2132_s12 = sadd.s32 97, %s4643_s16 }
 0x1cd   : > { %v1758_v32 = vpack.c.bf16 %v908_v45, %v905_v42  ;;  %v1535_v42 = vadd.f32 %v1531_v24, %v1524_v22  ;;  %v1541_v45 = vmul.f32 %v4870_v28, %v4628_v33  ;;  %v4923_v54 = vsel %vm1049_vm5, %v1050_v25, %v1048_v38  ;;  %s4957_s23 = sld [smem:[#allocation9 + %s2099_s30]] }
 0x1ce   : > { %v4927_v55 = vsel %vm1042_vm6, %v1043_v31, %v1041_v39  ;;  %vm2008_vm12 = vcmp.lt.f32.partialorder %v4923_v54, 12.0  ;;  %v1259_v6 = vadd.f32 %v1255_v49, %v1248_v47  ;;  %v1260_v7 = vadd.f32 %v1256_v53, %v1249_v48  ;;  %s4976_s30 = sld [smem:[#allocation9 + %s2110_s17]]  ;;  %s2154_s17 = sadd.s32 74, %s4643_s16 }
 0x1cf   : > { %3456 = vmatmul.mubr.msk.bf16.vlgmr.msra.gmra.mrb[0].mxu1 %vm1770_vm2, %v1758_v32  ;;  %v4898_v32 = vstv %s4802_s4  ;;  %s2092_s4 = sadd.s32 65, %s4643_s16  ;;  %vm2007_vm14 = vcmp.lt.f32.partialorder %v4927_v55, 12.0  ;;  %v1545_v19 = vadd.f32 %v1541_v45, %v1534_v40  ;;  %v1266_v15 = vmul.f32 %v4937_v61, %v4628_v33 }
 0x1d0   : > { %1819 = vmatprep.mubr.bf16.mxu1 %v6348_v3  ;;  %6570 = vst [vmem:[#allocation52_spill] sm:$0xff] %v4898_v32  ;;  %v1552_v4 = vmul.f32 %v4898_v32, %v4698_v26  ;;  %v1553_v5 = vmul.f32 %v4898_v32, %v4711_v44  ;;  %s4955_s0 = sld [smem:[#allocation9 + %s2092_s4]]  ;;  %v1267_v16 = vmul.f32 %v4937_v61, %v4640_v41  ;;  %s2147_s4 = sadd.s32 66, %s4643_s16  ;;  %vm1161_vm3 = vcmp.lt.f32.partialorder %v4923_v54, 8.0 }
 0x1d1   : > { %v2012_v17 = vsel %vm2008_vm12, 1.0, %v6350_v56  ;;  %v4974_v18 = vstv %s4810_s10  ;;  %v2011_v22 = vsel %vm2007_vm14, 1.0, %v6350_v56  ;;  %v4992_v24 = vstv %s4820_s3  ;;  %s5010_s10 = sld [smem:[#allocation9 + %s2132_s12]] }
 0x1d2   : > { %6576 = vst [vmem:[#allocation54_spill] sm:$0xff] %v4974_v18  ;;  %6578 = vst [vmem:[#allocation56_spill] sm:$0xff] %v4992_v24  ;;  %v1556_v25 = vadd.f32 %v1552_v4, %v1545_v19  ;;  %v5008_v38 = vstv %s4814_s28  ;;  %s5012_s3 = sld [smem:[#allocation9 + %s2147_s4]]  ;;  %v1270_v39 = vadd.f32 %v1266_v15, %v1259_v6  ;;  %v1271_v40 = vadd.f32 %v1267_v16, %v1260_v7  ;;  %s2187_s28 = sadd.s32 98, %s4643_s16 }
 0x1d3   : > { %6581 = vst [vmem:[#allocation59_spill] sm:$0xff] %v5008_v38  ;;  %v1277_v13 = vmul.f32 %v4974_v18, %v4698_v26  ;;  %v1303_v45 = vmul.f32 %v4992_v24, %v4632_v36  ;;  %v1311_v47 = vmul.f32 %v4995_v21, %v4630_v35  ;;  %s5028_s12 = sld [smem:[#allocation9 + %s2154_s17]]  ;;  %v5035_v48 = vsel %vm1161_vm3, 1.0, %v6350_v56  ;;  %s2422_s17 = sadd.s32 71, %s4643_s16 }
 0x1d4   : > { %s5030_s4 = sld [smem:[#allocation9 + %s2165_s29]]  ;;  %6582 = vst [vmem:[#allocation60_spill] sm:$0xff] %v5035_v48  ;;  %v5038_v49 = vmul.f32 %v2012_v17, %v4986_v20  ;;  %v5041_v53 = vmul.f32 %v2011_v22, %v5005_v27  ;;  %v5049_v19 = vadd.f32 %v5008_v38, %v1556_v25  ;;  %v5055_v4 = vstv %s4838_s24 }
 0x1d5   : > { %6587 = vst [vmem:[#allocation65_spill] sm:$0xff] %v5055_v4  ;;  %s5060_s29 = sld [smem:[#allocation9 + %s2176_s5]]  ;;  %v5067_v7 = vadd.f32 %v1277_v13, %v1270_v39  ;;  %v5072_v16 = vstv %s4816_s1  ;;  %v5076_v17 = vadd.f32 %v1310_v46, %v1303_v45  ;;  %v5082_v25 = vmul.f32 %v5044_v57, %v4628_v33 }
 0x1d6   : > { %6583 = vst [vmem:[#allocation61_spill] sm:$0xff] %v5038_v49  ;;  %6584 = vst [vmem:[#allocation62_spill] sm:$0xff] %v5041_v53  ;;  %s5062_s14 = sld [smem:[#allocation9 + %s2187_s28]]  ;;  %v5102_v13 = vmul.f32 %v5055_v4, %v4645_v43  ;;  %v5111_v45 = vstv %s4844_s22  ;;  %v5117_v46 = vstv %s4862_s13  ;;  %v5127_v3 = vstv %s4881_s19  ;;  %s2209_s22 = sadd.s32 75, %s4643_s16 }
 0x1d7   : > { %3457 = vmatmul.mubr.msk.bf16.gmra.mrb[4].mxu1 %vm1770_vm2, %v1759_v23  ;;  %v1542_v23 = vmul.f32 %v4870_v28, %v4640_v41  ;;  %6586 = vst [vmem:[#allocation64_spill] sm:$0xff] %v5049_v19  ;;  %6589 = vst [vmem:[#allocation67_spill] sm:$0xff] %v5067_v7  ;;  %s5088_s1 = sld [smem:[#allocation9 + %s2422_s17]]  ;;  %v5130_v56 = vstv %s4883_s21  ;;  %v5133_v8 = vstv %s4900_s7  ;;  %v5147_v50 = vstv %s4955_s0  ;;  %s2231_s19 = sadd.s32 91, %s4643_s16 }
 0x1d8   : > { %6591 = vst [vmem:[#allocation69_spill] sm:$0xff] %v5072_v16  ;;  %s5090_s24 = sld [smem:[#allocation9 + %s2429_s8]]  ;;  %s2462_s8 = sadd.s32 103, %s4643_s16  ;;  %6593 = vst [vmem:[#allocation71_spill] sm:$0xff] %v5111_v45  ;;  %v5150_v32 = vstv %s4957_s23  ;;  %v5157_v21 = vstv %s4976_s30  ;;  %v5169_v29 = vstv %s5012_s3  ;;  %v2317_v10 = vmul.f32 %v5111_v45, %v4655_v51 }
 0x1d9   : > { %v1546_v1 = vadd.f32 %v1542_v23, %v1535_v42  ;;  %v1278_v42 = vmul.f32 %v4974_v18, %v4711_v44  ;;  %v1304_v23 = vmul.f32 %v4992_v24, %v4645_v43  ;;  %6595 = vst [vmem:[#allocation73_spill] sm:$0xff] %v5117_v46  ;;  %s5124_s28 = sld [smem:[#allocation9 + %s2451_s2]]  ;;  %6597 = vst [vmem:[#allocation75_spill] sm:$0xff] %v5127_v3  ;;  %v5160_v24 = vstv %s4978_s20  ;;  %s1340_s30 = sadd.s32 34, %s4643_s16 }
 0x1da   : > { %6598 = vst [vmem:[#allocation76_spill] sm:$0xff] %v5130_v56  ;;  %6599 = vst [vmem:[#allocation77_spill] sm:$0xff] %v5133_v8  ;;  %s5152_s13 = sld [smem:[#allocation9 + %s2462_s8]]  ;;  %v5172_v14 = vstv %s5028_s12  ;;  %v2318_v11 = vmul.f32 %v5111_v45, %v4657_v52  ;;  %v5183_v27 = vstv %s5030_s4  ;;  %v2335_v45 = vmul.f32 %v5117_v46, %v4662_v59  ;;  %s1355_s3 = sadd.s32 3, %s4643_s16 }
 0x1db   : > { %v1557_v31 = vadd.f32 %v1553_v5, %v1546_v1  ;;  %v5052_v1 = vstv %s4828_s9  ;;  %v5058_v5 = vstv %s4840_s11  ;;  %v5069_v15 = vadd.f32 %v1278_v42, %v1271_v40  ;;  %s2440_s9 = sadd.s32 87, %s4643_s16  ;;  %s2202_s11 = sadd.s32 67, %s4643_s16  ;;  %6603 = vst [vmem:[#allocation81_spill] sm:$0xff] %v5147_v50  ;;  %6604 = vst [vmem:[#allocation82_spill] sm:$0xff] %v5150_v32 }
 0x1dc   : > { %v5078_v22 = vadd.f32 %v1311_v47, %v1304_v23  ;;  %v5094_v39 = vmul.f32 %v5052_v1, %v4698_v26  ;;  %v5098_v40 = vmul.f32 %v5055_v4, %v4632_v36  ;;  %v5106_v42 = vmul.f32 %v5058_v5, %v4625_v30  ;;  %s5122_s5 = sld [smem:[#allocation9 + %s2440_s9]]  ;;  %6605 = vst [vmem:[#allocation83_spill] sm:$0xff] %v5157_v21  ;;  %s1362_s12 = sadd.s32 11, %s4643_s16 }
 0x1dd   : > { %v5065_v6 = vadd.f32 %v5008_v38, %v1557_v31  ;;  %6590 = vst [vmem:[#allocation68_spill] sm:$0xff] %v5069_v15  ;;  %v5086_v31 = vmul.f32 %v5044_v57, %v4640_v41  ;;  %v5114_v23 = vstv %s4846_s27  ;;  %v5120_v47 = vstv %s4864_s15  ;;  %s2220_s27 = sadd.s32 83, %s4643_s16  ;;  %s5154_s15 = sld [smem:[#allocation9 + %s2202_s11]]  ;;  %6606 = vst [vmem:[#allocation84_spill] sm:$0xff] %v5160_v24 }
 0x1de   : > { %6592 = vst [vmem:[#allocation70_spill] sm:$0xff] %v5094_v39  ;;  %6594 = vst [vmem:[#allocation72_spill] sm:$0xff] %v5114_v23  ;;  %v5141_v38 = vstv %s4939_s18  ;;  %v5144_v57 = vstv %s4941_s26  ;;  %v5163_v4 = vstv %s5010_s10  ;;  %s5174_s21 = sld [smem:[#allocation9 + %s2209_s22]]  ;;  %v5186_v28 = vstv %s5060_s29  ;;  %s2242_s18 = sadd.s32 99, %s4643_s16 }
 0x1df   : > { %6588 = vst [vmem:[#allocation66_spill] sm:$0xff] %v5065_v6  ;;  %6596 = vst [vmem:[#allocation74_spill] sm:$0xff] %v5120_v47  ;;  %s5176_s7 = sld [smem:[#allocation9 + %s2220_s27]]  ;;  %v2324_v0 = vmul.f32 %v5114_v23, %v4660_v58  ;;  %v2325_v63 = vmul.f32 %v5114_v23, %v4665_v62  ;;  %v5193_v9 = vstv %s5062_s14  ;;  %v5196_v2 = vstv %s5088_s1  ;;  %s1593_s14 = sadd.s32 23, %s4643_s16 }
 0x1e0   : > { %6601 = vst [vmem:[#allocation79_spill] sm:$0xff] %v5141_v38  ;;  %6602 = vst [vmem:[#allocation80_spill] sm:$0xff] %v5144_v57  ;;  %s5198_s20 = sld [smem:[#allocation9 + %s2231_s19]]  ;;  %v2336_v48 = vmul.f32 %v5117_v46, %v4683_v12  ;;  %v5205_v20 = vstv %s5090_s24  ;;  %v2346_v23 = vmul.f32 %v5120_v47, %v4927_v55  ;;  %v5213_v18 = vstv %s5124_s28  ;;  %s1615_s4 = sadd.s32 39, %s4643_s16 }
 0x1e1   : > { %6607 = vst [vmem:[#allocation85_spill] sm:$0xff] %v5163_v4  ;;  %6608 = vst [vmem:[#allocation86_spill] sm:$0xff] %v5169_v29  ;;  %v2328_v30 = vadd.f32 %v2324_v0, %v2317_v10  ;;  %v2329_v43 = vadd.f32 %v2325_v63, %v2318_v11  ;;  %v2347_v6 = vmul.f32 %v5120_v47, %v4923_v54  ;;  %v5224_v11 = vstv %s5152_s13  ;;  %s5320_s26 = sld [smem:[#allocation9 + %s1593_s14]]  ;;  %s1373_s9 = sadd.s32 19, %s4643_s16 }
 0x1e2   : > { %6609 = vst [vmem:[#allocation87_spill] sm:$0xff] %v5172_v14  ;;  %6610 = vst [vmem:[#allocation88_spill] sm:$0xff] %v5183_v27  ;;  %v5210_v36 = vstv %s5122_s5  ;;  %v2097_v19 = vmul.f32 %v5147_v50, %v4655_v51  ;;  %v2098_v63 = vmul.f32 %v5147_v50, %v4657_v52  ;;  %v2104_v0 = vmul.f32 %v5150_v32, %v4660_v58  ;;  %s5333_s0 = sld [smem:[#allocation9 + %s1604_s6]]  ;;  %s1384_s24 = sadd.s32 27, %s4643_s16 }
 0x1e3   : > { %6611 = vst [vmem:[#allocation89_spill] sm:$0xff] %v5186_v28  ;;  %6612 = vst [vmem:[#allocation90_spill] sm:$0xff] %v5193_v9  ;;  %v2339_v46 = vadd.f32 %v2335_v45, %v2328_v30  ;;  %v2340_v15 = vadd.f32 %v2336_v48, %v2329_v43  ;;  %v5227_v10 = vstv %s5154_s15  ;;  %v2105_v61 = vmul.f32 %v5150_v32, %v4665_v62  ;;  %s5335_s23 = sld [smem:[#allocation9 + %s2242_s18]]  ;;  %s1395_s11 = sadd.s32 35, %s4643_s16 }
 0x1e4   : > { %6613 = vst [vmem:[#allocation91_spill] sm:$0xff] %v5196_v2  ;;  %6614 = vst [vmem:[#allocation92_spill] sm:$0xff] %v5205_v20  ;;  %v2115_v47 = vmul.f32 %v5157_v21, %v4662_v59  ;;  %v2108_v43 = vadd.f32 %v2104_v0, %v2097_v19  ;;  %v2116_v48 = vmul.f32 %v5157_v21, %v4683_v12  ;;  %v5236_v45 = vstv %s5174_s21  ;;  %s5357_s10 = sld [smem:[#allocation9 + %s1340_s30]]  ;;  %s4192_s28 = smov 112  }
 0x1e5   : > { %6615 = vst [vmem:[#allocation93_spill] sm:$0xff] %v5210_v36  ;;  %6616 = vst [vmem:[#allocation94_spill] sm:$0xff] %v5213_v18  ;;  %v2350_v26 = vadd.f32 %v2346_v23, %v2339_v46  ;;  %v2351_v30 = vadd.f32 %v2347_v6, %v2340_v15  ;;  %v5239_v50 = vstv %s5176_s7  ;;  %v2109_v39 = vadd.f32 %v2105_v61, %v2098_v63  ;;  %s5398_s17 = sld [smem:[#allocation9 + %s1355_s3]]  ;;  %s4193_s22 = smov 64  }
 0x1e6   : > { %6617 = vst [vmem:[#allocation95_spill] sm:$0xff] %v5224_v11  ;;  %6618 = vst [vmem:[#allocation96_spill] sm:$0xff] %v5227_v10  ;;  %v2126_v16 = vmul.f32 %v5160_v24, %v4927_v55  ;;  %v2119_v37 = vadd.f32 %v2115_v47, %v2108_v43  ;;  %v2127_v6 = vmul.f32 %v5160_v24, %v4923_v54  ;;  %v5248_v19 = vstv %s5198_s20  ;;  %s5400_s29 = sld [smem:[#allocation9 + %s1362_s12]]  ;;  %s4194_s27 = smov 96  }
 0x1e7   : > { %6619 = vst [vmem:[#allocation97_spill] sm:$0xff] %v5236_v45  ;;  %6620 = vst [vmem:[#allocation98_spill] sm:$0xff] %v5239_v50  ;;  %v2357_v7 = vadd.f32 %v5127_v3, %v2350_v26  ;;  %v2358_v32 = vadd.f32 %v5127_v3, %v2351_v30  ;;  %v2120_v15 = vadd.f32 %v2116_v48, %v2109_v39  ;;  %vm1160_vm13 = vcmp.lt.f32.partialorder %v4927_v55, 8.0  ;;  %s5413_s2 = sld [smem:[#allocation9 + %s1615_s4]]  ;;  %s4195_s13 = smov 48  }
 0x1e8   : > { %6621 = vst [vmem:[#allocation99_spill] sm:$0xff] %v5248_v19  ;;  %v2372_v23 = vmul.f32 %v5130_v56, %v4655_v51  ;;  %v2373_v61 = vmul.f32 %v5130_v56, %v4657_v52  ;;  %v2130_v0 = vadd.f32 %v2126_v16, %v2119_v37  ;;  %v2379_v26 = vmul.f32 %v5133_v8, %v4660_v58  ;;  %s5429_s1 = sld [smem:[#allocation9 + %s1373_s9]]  ;;  %s4196_s15 = smov 80   ;;  %v6663_v56 = vld [vmem:[#allocation65_spill] sm:$0xff] }
 0x1e9   : > { %v2361_v46 = vmax.f32 %v2357_v7, 0.0  ;;  %v2362_v63 = vmax.f32 %v2358_v32, 0.0  ;;  %v2131_v30 = vadd.f32 %v2127_v6, %v2120_v15  ;;  %v2380_v47 = vmul.f32 %v5133_v8, %v4665_v62  ;;  %s5461_s8 = sld [smem:[#allocation9 + %s1384_s24]]  ;;  %v6658_v8 = vld [vmem:[#allocation48_spill] sm:$0xff]  ;;  %s6660_s19 = smov 32  }
 0x1ea   : > { %v2390_v43 = vmul.f32 %v5136_v60, %v4662_v59  ;;  %v2391_v39 = vmul.f32 %v5136_v60, %v4683_v12  ;;  %v2137_v37 = vadd.f32 %v5163_v4, %v2130_v0  ;;  %v2383_v32 = vadd.f32 %v2379_v26, %v2372_v23  ;;  %s5500_s5 = sld [smem:[#allocation9 + %s1395_s11]]  ;;  %s4197_s21 = smov 16  }
 0x1eb   : > { %v5263_v48 = vmul.f32 %v2361_v46, %v5041_v53  ;;  %v5266_v7 = vmul.f32 %v2362_v63, %v5038_v49  ;;  %v2138_v16 = vadd.f32 %v5163_v4, %v2131_v30  ;;  %v2384_v6 = vadd.f32 %v2380_v47, %v2373_v61  ;;  %s1410_s7 = sadd.s32 4, %s4643_s16  ;;  %s1417_s20 = sadd.s32 12, %s4643_s16 }
 0x1ec   : > { %v2401_v15 = vmul.f32 %v5141_v38, %v4927_v55  ;;  %v2402_v3 = vmul.f32 %v5141_v38, %v4923_v54  ;;  %v2141_v46 = vmax.f32 %v2137_v37, 0.0  ;;  %v2394_v21 = vadd.f32 %v2390_v43, %v2383_v32  ;;  %s1411_s14 = sld [smem:[#allocation9 + %s1410_s7]]  ;;  %s1428_s18 = sadd.s32 20, %s4643_s16 }
 0x1ed   : > { %6622 = vst [vmem:[#allocation100_spill] sm:$0xff] %v5263_v48  ;;  %6623 = vst [vmem:[#allocation101_spill] sm:$0xff] %v5266_v7  ;;  %v2152_v63 = vmul.f32 %v5169_v29, %v4655_v51  ;;  %v2142_v60 = vmax.f32 %v2138_v16, 0.0  ;;  %v2395_v0 = vadd.f32 %v2391_v39, %v2384_v6  ;;  %v2153_v23 = vmul.f32 %v5169_v29, %v4657_v52  ;;  %s1418_s6 = sld [smem:[#allocation9 + %s1417_s20]]  ;;  %s1450_s30 = sadd.s32 36, %s4643_s16 }
 0x1ee   : > { %v2159_v61 = vmul.f32 %v5172_v14, %v4660_v58  ;;  %v5283_v26 = vmul.f32 %v2141_v46, %v5041_v53  ;;  %v2405_v30 = vadd.f32 %v2401_v15, %v2394_v21  ;;  %v2160_v47 = vmul.f32 %v5172_v14, %v4665_v62  ;;  %s1197_s3 = sadd.s32 8, %s4643_s16  ;;  %s1191_s12 = sld [smem:[#allocation9 + %s4643_s16]] }
 0x1ef   : > { %v2170_v43 = vmul.f32 %v5183_v27, %v4662_v59  ;;  %v5290_v37 = vmul.f32 %v2142_v60, %v5038_v49  ;;  %v2406_v39 = vadd.f32 %v2402_v3, %v2395_v0  ;;  %v2171_v16 = vmul.f32 %v5183_v27, %v4683_v12  ;;  %v6652_v27 = vld [vmem:[#allocation47_spill] sm:$0xff]  ;;  %s1198_s4 = sld [smem:[#allocation9 + %s1197_s3]]  ;;  %s1219_s9 = sadd.s32 24, %s4643_s16 }
 0x1f0   : > { %6624 = vst [vmem:[#allocation102_spill] sm:$0xff] %v5283_v26  ;;  %v2163_v32 = vadd.f32 %v2159_v61, %v2152_v63  ;;  %v2412_v6 = vadd.f32 %v5144_v57, %v2405_v30  ;;  %v2164_v46 = vadd.f32 %v2160_v47, %v2153_v23  ;;  %v2181_v21 = vmul.f32 %v5186_v28, %v4927_v55  ;;  %s2044_s20 = sadd.s32 72, %s4643_s16  ;;  %s2297_s3 = sadd.s32 100, %s4643_s16 }
 0x1f1   : > { %6625 = vst [vmem:[#allocation103_spill] sm:$0xff] %v5290_v37  ;;  %v2182_v15 = vmul.f32 %v5186_v28, %v4923_v54  ;;  %v2413_v3 = vadd.f32 %v5144_v57, %v2406_v39  ;;  %v2427_v0 = vmul.f32 %v5196_v2, %v4655_v51  ;;  %v2428_v30 = vmul.f32 %v5196_v2, %v4657_v52  ;;  %s6739_s11 = sld [smem:[#allocation28_spill]] }
 0x1f2   : > { %v2174_v63 = vadd.f32 %v2170_v43, %v2163_v32  ;;  %v2416_v61 = vmax.f32 %v2412_v6, 0.0  ;;  %v2175_v23 = vadd.f32 %v2171_v16, %v2164_v46  ;;  %v2434_v47 = vmul.f32 %v5205_v20, %v4660_v58 }
 0x1f3   : > { %v2417_v24 = vmax.f32 %v2413_v3, 0.0  ;;  %v2435_v60 = vmul.f32 %v5205_v20, %v4665_v62  ;;  %v2445_v43 = vmul.f32 %v5210_v36, %v4662_v59  ;;  %v2446_v6 = vmul.f32 %v5210_v36, %v4683_v12 }
 0x1f4   : > { %v2185_v48 = vadd.f32 %v2181_v21, %v2174_v63  ;;  %v5316_v39 = vmul.f32 %v2416_v61, %v5041_v53  ;;  %v2186_v32 = vadd.f32 %v2182_v15, %v2175_v23  ;;  %v2438_v16 = vadd.f32 %v2434_v47, %v2427_v0 }
 0x1f5   : > { %v5323_v46 = vmul.f32 %v2417_v24, %v5038_v49  ;;  %v2439_v3 = vadd.f32 %v2435_v60, %v2428_v30  ;;  %v2456_v63 = vmul.f32 %v5213_v18, %v4927_v55  ;;  %v2457_v15 = vmul.f32 %v5213_v18, %v4923_v54 }
 0x1f6   : > { %6626 = vst [vmem:[#allocation104_spill] sm:$0xff] %v5316_v39  ;;  %v2192_v21 = vadd.f32 %v5193_v9, %v2185_v48  ;;  %v2193_v61 = vadd.f32 %v5193_v9, %v2186_v32  ;;  %v2449_v26 = vadd.f32 %v2445_v43, %v2438_v16  ;;  %v2207_v0 = vmul.f32 %v5227_v10, %v4655_v51  ;;  %v6647_v9 = vld [vmem:[#allocation36_spill] sm:$0xff] }
 0x1f7   : > { %6627 = vst [vmem:[#allocation105_spill] sm:$0xff] %v5323_v46  ;;  %v2450_v60 = vadd.f32 %v2446_v6, %v2439_v3  ;;  %v2208_v23 = vmul.f32 %v5227_v10, %v4657_v52  ;;  %v2214_v43 = vmul.f32 %v5236_v45, %v4660_v58  ;;  %v2215_v32 = vmul.f32 %v5236_v45, %v4665_v62  ;;  %v6651_v10 = vld [vmem:[#allocation45_spill] sm:$0xff] }
 0x1f8   : > { %v2196_v48 = vmax.f32 %v2192_v21, 0.0  ;;  %v2197_v30 = vmax.f32 %v2193_v61, 0.0  ;;  %v2460_v47 = vadd.f32 %v2456_v63, %v2449_v26  ;;  %v2225_v21 = vmul.f32 %v5239_v50, %v4662_v59 }
 0x1f9   : > { %v2461_v37 = vadd.f32 %v2457_v15, %v2450_v60  ;;  %v2226_v6 = vmul.f32 %v5239_v50, %v4683_v12  ;;  %v2218_v63 = vadd.f32 %v2214_v43, %v2207_v0  ;;  %v2219_v61 = vadd.f32 %v2215_v32, %v2208_v23 }
 0x1fa   : > { %v5347_v16 = vmul.f32 %v2196_v48, %v5041_v53  ;;  %v5354_v3 = vmul.f32 %v2197_v30, %v5038_v49  ;;  %v2467_v26 = vadd.f32 %v5224_v11, %v2460_v47  ;;  %v1586_v15 = vmul.f32 %v5058_v5, %v4630_v35 }
 0x1fb   : > { %v2468_v48 = vadd.f32 %v5224_v11, %v2461_v37  ;;  %v2236_v60 = vmul.f32 %v5248_v19, %v4927_v55  ;;  %v2237_v30 = vmul.f32 %v5248_v19, %v4923_v54  ;;  %v2229_v47 = vadd.f32 %v2225_v21, %v2218_v63  ;;  %v6646_v11 = vld [vmem:[#allocation34_spill] sm:$0xff] }
 0x1fc   : > { %6628 = vst [vmem:[#allocation106_spill] sm:$0xff] %v5347_v16  ;;  %6629 = vst [vmem:[#allocation107_spill] sm:$0xff] %v5354_v3  ;;  %v2471_v23 = vmax.f32 %v2467_v26, 0.0  ;;  %v2230_v43 = vadd.f32 %v2226_v6, %v2219_v61  ;;  %v1325_v37 = vadd.f32 %v5082_v25, %v5076_v17  ;;  %v1333_v32 = vmul.f32 %v5052_v1, %v4711_v44  ;;  %v6636_v16 = vld [vmem:[#allocation70_spill] sm:$0xff] }
 0x1fd   : > { %v5374_v24 = vstv %s5320_s26  ;;  %v2472_v39 = vmax.f32 %v2468_v48, 0.0  ;;  %v1326_v46 = vadd.f32 %v5086_v31, %v5078_v22  ;;  %v2240_v26 = vadd.f32 %v2236_v60, %v2229_v47  ;;  %v6637_v48 = vld [vmem:[#allocation40_spill] sm:$0xff]  ;;  %s1429_s26 = sld [smem:[#allocation9 + %s1428_s18]]  ;;  %s2286_s18 = sadd.s32 92, %s4643_s16 }
 0x1fe   : > { %v5381_v0 = vmul.f32 %v2471_v23, %v5041_v53  ;;  %v2241_v21 = vadd.f32 %v2237_v30, %v2230_v43  ;;  %v1589_v17 = vadd.f32 %v5106_v42, %v5098_v40  ;;  %v5386_v25 = vstv %s5333_s0  ;;  %v6634_v43 = vld [vmem:[#allocation67_spill] sm:$0xff]  ;;  %s1439_s0 = sadd.s32 28, %s4643_s16 }
 0x1ff   : > { %v5390_v6 = vstv %s5335_s23  ;;  %v5393_v63 = vmul.f32 %v2472_v39, %v5038_v49  ;;  %v1590_v61 = vadd.f32 %v1586_v15, %v5102_v13  ;;  %v1596_v22 = vmul.f32 %v5374_v24, %v4628_v33  ;;  %v6633_v13 = vld [vmem:[#allocation51_spill] sm:$0xff]  ;;  %s1440_s23 = sld [smem:[#allocation9 + %s1439_s0]]  ;;  %s2066_s0 = sadd.s32 88, %s4643_s16 }
 0x200   : > { %6630 = vst [vmem:[#allocation108_spill] sm:$0xff] %v5381_v0  ;;  %6631 = vst [vmem:[#allocation109_spill] sm:$0xff] %v5390_v6  ;;  %v2247_v31 = vadd.f32 %v5390_v6, %v2240_v26  ;;  %v2248_v40 = vadd.f32 %v5390_v6, %v2241_v21  ;;  %v1597_v42 = vmul.f32 %v5374_v24, %v4640_v41  ;;  %v6635_v26 = vld [vmem:[#allocation69_spill] sm:$0xff]  ;;  %v5423_v6 = vstv %s5357_s10  ;;  %s1451_s10 = sld [smem:[#allocation9 + %s1450_s30]] }
 0x201   : > { %6632 = vst [vmem:[#allocation110_spill] sm:$0xff] %v5393_v63  ;;  %v1250_v39 = vmul.f32 %v4876_v34, %v4655_v51  ;;  %v1257_v15 = vmul.f32 %v6633_v13, %v4660_v58  ;;  %v1251_v60 = vmul.f32 %v4876_v34, %v4657_v52  ;;  %v1258_v30 = vmul.f32 %v6633_v13, %v4665_v62 }
 0x202   : > { %v2251_v23 = vmax.f32 %v2247_v31, 0.0  ;;  %v2252_v47 = vmax.f32 %v2248_v40, 0.0  ;;  %v1288_v21 = vadd.f32 %v6635_v26, %v6634_v43  ;;  %v1336_v3 = vadd.f32 %v6636_v16, %v1325_v37  ;;  %v6640_v37 = vld [vmem:[#allocation53_spill] sm:$0xff]  ;;  %v6641_v43 = vld [vmem:[#allocation68_spill] sm:$0xff] }
 0x203   : > { %v1337_v7 = vadd.f32 %v1333_v32, %v1326_v46  ;;  %v1607_v0 = vmul.f32 %v5386_v25, %v6637_v48  ;;  %v1608_v34 = vmul.f32 %v5386_v25, %v4711_v44  ;;  %v1600_v40 = vadd.f32 %v1596_v22, %v1589_v17 }
 0x204   : > { %v5432_v13 = vmul.f32 %v2251_v23, %v5041_v53  ;;  %v5435_v31 = vmul.f32 %v2252_v47, %v5038_v49  ;;  %v1601_v46 = vadd.f32 %v1597_v42, %v1590_v61  ;;  %v1261_v16 = vadd.f32 %v1257_v15, %v1250_v39  ;;  %v6643_v61 = vld [vmem:[#allocation64_spill] sm:$0xff]  ;;  %v6644_v42 = vld [vmem:[#allocation66_spill] sm:$0xff] }
 0x205   : > { %v1268_v32 = vmul.f32 %v6640_v37, %v4662_v59  ;;  %v1289_v63 = vadd.f32 %v6635_v26, %v6641_v43  ;;  %v1262_v19 = vadd.f32 %v1258_v30, %v1251_v60  ;;  %v1269_v23 = vmul.f32 %v6640_v37, %v4683_v12 }
 0x206   : > { %6638 = vst [vmem:[#allocation51_spill] sm:$0xff] %v5432_v13  ;;  %6639 = vst [vmem:[#allocation67_spill] sm:$0xff] %v5435_v31  ;;  %v6642_v53 = vmov 0.0   ;;  %v1567_v22 = vmax.f32 %v6643_v61, 0.0  ;;  %v1568_v39 = vmax.f32 %v6644_v42, 0.0  ;;  %v1292_v15 = vmax.f32 %v1288_v21, 0.0 }
 0x207   : > { %v5449_v17 = vsel %vm1160_vm13, 1.0, %v6642_v53  ;;  %v1343_v43 = vadd.f32 %v5423_v6, %v1336_v3  ;;  %v1344_v60 = vadd.f32 %v5423_v6, %v1337_v7  ;;  %v5456_v30 = vstv %s5398_s17  ;;  %v6645_v61 = vld [vmem:[#allocation54_spill] sm:$0xff]  ;;  %s1208_s17 = sadd.s32 16, %s4643_s16 }
 0x208   : > { %v5459_v37 = vstv %s5400_s29  ;;  %v1611_v47 = vadd.f32 %v1607_v0, %v1600_v40  ;;  %v1612_v13 = vadd.f32 %v1608_v34, %v1601_v46  ;;  %v1272_v31 = vadd.f32 %v1268_v32, %v1261_v16  ;;  %v6648_v0 = vld [vmem:[#allocation31_spill] sm:$0xff]  ;;  %v6650_v46 = vld [vmem:[#allocation60_spill] sm:$0xff]  ;;  %s1209_s29 = sld [smem:[#allocation9 + %s1208_s17]] }
 0x209   : > { %v1279_v49 = vmul.f32 %v6645_v61, %v4927_v55  ;;  %v1293_v42 = vmax.f32 %v1289_v63, 0.0  ;;  %v5466_v21 = vstv %s5413_s2  ;;  %v1273_v3 = vadd.f32 %v1269_v23, %v1262_v19  ;;  %v6649_v63 = vld [vmem:[#allocation55_spill] sm:$0xff]  ;;  %s1220_s2 = sld [smem:[#allocation9 + %s1219_s9]] }
 0x20a   : > { %v1280_v7 = vmul.f32 %v6645_v61, %v4923_v54  ;;  %v1358_v50 = vmul.f32 %v5456_v30, %v6646_v11  ;;  %v1359_v45 = vmul.f32 %v5456_v30, %v6647_v9  ;;  %v1365_v34 = vmul.f32 %v5459_v37, %v6648_v0 }
 0x20b   : > { %v1366_v40 = vmul.f32 %v5459_v37, %v4630_v35  ;;  %v5481_v16 = vmul.f32 %v6650_v46, %v6649_v63  ;;  %v1347_v19 = vmax.f32 %v1343_v43, 0.0  ;;  %v1348_v32 = vmax.f32 %v1344_v60, 0.0 }
 0x20c   : > { %v5484_v23 = vstv %s5429_s1  ;;  %v5487_v18 = vmul.f32 %v1567_v22, %v6651_v10  ;;  %v1618_v36 = vadd.f32 %v5466_v21, %v1611_v47  ;;  %v1619_v28 = vadd.f32 %v5466_v21, %v1612_v13  ;;  %s1230_s1 = sadd.s32 32, %s4643_s16 }
 0x20d   : > { %v1283_v20 = vadd.f32 %v1279_v49, %v1272_v31  ;;  %v5492_v14 = vmul.f32 %v1568_v39, %v6652_v27  ;;  %v5495_v63 = vmul.f32 %v1292_v15, %v6651_v10  ;;  %v5498_v43 = vmul.f32 %v1293_v42, %v6652_v27  ;;  %s1231_s24 = sld [smem:[#allocation9 + %s1230_s1]] }
 0x20e   : > { %v1284_v60 = vadd.f32 %v1280_v7, %v1273_v3  ;;  %v1369_v46 = vadd.f32 %v1365_v34, %v1358_v50  ;;  %v1370_v47 = vadd.f32 %v1366_v40, %v1359_v45  ;;  %v1376_v49 = vmul.f32 %v5484_v23, %v4628_v33 }
 0x20f   : > { %v1377_v13 = vmul.f32 %v5484_v23, %v4640_v41  ;;  %v5509_v15 = vmul.f32 %v1347_v19, %v6651_v10  ;;  %v5512_v42 = vmul.f32 %v1348_v32, %v6652_v27  ;;  %v5515_v3 = vstv %s5461_s8  ;;  %v6654_v19 = vld [vmem:[#allocation37_spill] sm:$0xff]  ;;  %s6699_s8 = sld [smem:[#allocation29_spill]] }
 0x210   : > { %v1622_v50 = vmax.f32 %v1618_v36, 0.0  ;;  %v1623_v45 = vmax.f32 %v1619_v28, 0.0  ;;  %v1290_v34 = vadd.f32 %v6635_v26, %v1283_v20  ;;  %v1291_v40 = vadd.f32 %v6635_v26, %v1284_v60 }
 0x211   : > { %v1470_v32 = vmul.f32 %v6654_v19, %v4655_v51  ;;  %v1380_v36 = vadd.f32 %v1376_v49, %v1369_v46  ;;  %v1381_v28 = vadd.f32 %v1377_v13, %v1370_v47  ;;  %v1387_v20 = vmul.f32 %v5515_v3, %v6637_v48  ;;  %v6657_v13 = vld [vmem:[#allocation39_spill] sm:$0xff] }
 0x212   : > { %v1471_v60 = vmul.f32 %v6654_v19, %v4657_v52  ;;  %v1294_v19 = vmax.f32 %v1290_v34, 0.0  ;;  %v1488_v26 = vmul.f32 %v6657_v13, %v4662_v59  ;;  %v1489_v53 = vmul.f32 %v6657_v13, %v4683_v12 }
 0x213   : > { %v1391_v4 = vadd.f32 %v1387_v20, %v1380_v36  ;;  %v1525_v34 = vmul.f32 %v6658_v8, %v4655_v51  ;;  %v1598_v35 = vmul.f32 %v5374_v24, %v4662_v59  ;;  %vm1730_vm5 = vcmask 523264  }
 0x214   : > { %vm1735_vm6 = vcmask 785408  }
 0x2a2   : > { %v1811_v61 = vpop.f32.mrb[0].mxu1 }
 0x2a3   : > { %v1813_v2 = vpop.f32.mrb[1].mxu1 }
 0x2a4   : > { %v1815_v22 = vpop.f32.mrb[2].mxu1 }
 0x2a5   : > { %v5506_v31 = vpack.c.bf16 %v1815_v22, %v1811_v61  ;;  %v1817_v39 = vpop.f32.mrb[3].mxu1  ;;  %v6655_v61 = vld [vmem:[#allocation38_spill] sm:$0xff]  ;;  %v1388_v22 = vmul.f32 %v5515_v3, %v4711_v44 }
 0x2a6   : > { %v1831_v7 = vpack.c.bf16 %v1817_v39, %v1813_v2  ;;  %v1477_v2 = vmul.f32 %v6655_v61, %v4660_v58  ;;  %v6656_v39 = vld [vmem:[#allocation58_spill] sm:$0xff]  ;;  %v1478_v46 = vmul.f32 %v6655_v61, %v4665_v62  ;;  %v1295_v61 = vmax.f32 %v1291_v40, 0.0  ;;  %v6659_v40 = vld [vmem:[#allocation49_spill] sm:$0xff] }
 0x2a7   : > { %6653 = vst [vmem:[#allocation69_spill] sm:$0xff] %v5506_v31  ;;  %1836 = vrot.lane.b32.xlu0 %v5506_v31, %s4192_s28  ;;  %1854 = vrot.lane.b32.xlu1 %v5506_v31, %s4193_s22  ;;  %v5533_v29 = vmul.f32 %v5449_v17, %v6656_v39  ;;  %v5546_v17 = vmul.f32 %v1622_v50, %v6651_v10 }
 0x2a8   : > { %3580 = vmatprep.subr.bf16.mxu0 %v1831_v7  ;;  %v1481_v49 = vadd.f32 %v1477_v2, %v1470_v32  ;;  %v1392_v57 = vadd.f32 %v1388_v22, %v1381_v28  ;;  %v1482_v48 = vadd.f32 %v1478_v46, %v1471_v60  ;;  %v1532_v32 = vmul.f32 %v6659_v40, %v4660_v58  ;;  %v6661_v60 = vld [vmem:[#allocation41_spill] sm:$0xff] }
 0x2a9   : > { %3581 = vmatpush3.bf16.msra.mxu0 %v1831_v7  ;;  %v5549_v7 = vmul.f32 %v1623_v45, %v6652_v27  ;;  %v5558_v45 = vstv %s5500_s5  ;;  %v1757_v36 = vpack.c.bf16 %v5481_v16, %v5533_v29  ;;  %v1526_v28 = vmul.f32 %v6658_v8, %v4657_v52 }
 0x2aa   : > { %v1821_v47 = vpop.f32.mrb[4].mxu1  ;;  %v1533_v20 = vmul.f32 %v6659_v40, %v4665_v62  ;;  %v1499_v46 = vmul.f32 %v6661_v60, %v4927_v55  ;;  %v5583_v8 = vmul.f32 %v1294_v19, %v5533_v29  ;;  %v5589_v13 = vadd.f32 %v5558_v45, %v1391_v4  ;;  %v6662_v40 = vld [vmem:[#allocation50_spill] sm:$0xff] }
 0x2ab   : > { %v1823_v39 = vpop.f32.mrb[5].mxu1  ;;  %1842 = vrot.lane.b32.xlu0 %v5506_v31, %s4194_s27  ;;  %1860 = vrot.lane.b32.xlu1 %v5506_v31, %s4195_s13  ;;  %v1543_v22 = vmul.f32 %v6662_v40, %v4662_v59  ;;  %v1580_v4 = vmul.f32 %v6663_v56, %v4655_v51 }
 0x2ac   : > { %v1825_v50 = vpop.f32.mrb[6].mxu1  ;;  %v1537_v19 = vadd.f32 %v1533_v20, %v1526_v28  ;;  %v6665_v20 = vld [vmem:[#allocation57_spill] sm:$0xff] }
 0x2ad   : > { %v5562_v38 = vpack.c.bf16 %v1825_v50, %v1821_v47  ;;  %v1827_v44 = vpop.f32.mrb[7].mxu1  ;;  %v5586_v47 = vmul.f32 %v1295_v61, %v5481_v16  ;;  %v1493_v50 = vadd.f32 %v1489_v53, %v1482_v48  ;;  %v1544_v61 = vmul.f32 %v6662_v40, %v4683_v12 }
 0x2ae   : > { %v1833_v2 = vpack.c.bf16 %v1827_v44, %v1823_v39  ;;  %v1492_v44 = vadd.f32 %v1488_v26, %v1481_v49  ;;  %v5592_v39 = vadd.f32 %v5558_v45, %v1392_v57  ;;  %v1500_v26 = vmul.f32 %v6661_v60, %v4923_v54 }
 0x2af   : > { %1848 = vrot.lane.b32.xlu0 %v5506_v31, %s4196_s15  ;;  %1866 = vrot.lane.b32.xlu1 %v5506_v31, %s6660_s19  ;;  %v1536_v49 = vadd.f32 %v1532_v32, %v1525_v34  ;;  %v1587_v57 = vmul.f32 %v5058_v5, %v4660_v58  ;;  %v1581_v48 = vmul.f32 %v6663_v56, %v4657_v52  ;;  %v6664_v32 = vld [vmem:[#allocation56_spill] sm:$0xff] }
 0x2b0   : > { %3582 = vmatprep.subr.bf16.mxu0 %v1833_v2  ;;  %v1503_v53 = vadd.f32 %v1499_v46, %v1492_v44  ;;  %v1588_v34 = vmul.f32 %v5058_v5, %v4665_v62  ;;  %v1306_v28 = vmul.f32 %v6664_v32, %v4657_v52  ;;  %v1312_v60 = vmul.f32 %v6665_v20, %v4660_v58  ;;  %v6666_v5 = vld [vmem:[#allocation52_spill] sm:$0xff] }
 0x2b1   : > { %3583 = vmatpush3.bf16.msra.mxu0 %v1833_v2  ;;  %v1305_v2 = vmul.f32 %v6664_v32, %v4655_v51  ;;  %v1313_v44 = vmul.f32 %v6665_v20, %v4665_v62  ;;  %v1402_v46 = vmax.f32 %v5589_v13, 0.0  ;;  %v1504_v56 = vadd.f32 %v1500_v26, %v1493_v50  ;;  %v6670_v50 = vld [vmem:[#allocation43_spill] sm:$0xff] }
 0x2b2   : > { %v1547_v40 = vadd.f32 %v1543_v22, %v1536_v49  ;;  %v1548_v41 = vadd.f32 %v1544_v61, %v1537_v19  ;;  %v1555_v33 = vmul.f32 %v6666_v5, %v4923_v54  ;;  %v1591_v32 = vadd.f32 %v1587_v57, %v1580_v4  ;;  %v6671_v57 = vld [vmem:[#allocation63_spill] sm:$0xff] }
 0x2b3   : > { %1856 = vrot.lane.b32.xlu0 %v5562_v38, %s4193_s22  ;;  %1872 = vrot.lane.b32.xlu1 %v5506_v31, %s4197_s21  ;;  %v1554_v31 = vmul.f32 %v6666_v5, %v4927_v55  ;;  %v6668_v20 = vpack.i.bf16 %v5492_v14, %v5487_v18  ;;  %v6669_v22 = vpack.i.bf16 %v5498_v43, %v5495_v63  ;;  %v1403_v13 = vmax.f32 %v5592_v39, 0.0 }
 0x2b4   : > { %3585 = vmatmul.mubr.msk.bf16.vlgmr.msra.gmra.mrb[4].mxu0 %vm863_vm0, %v1757_v36  ;;  %v6667_v36 = vmov 0   ;;  %v1510_v26 = vadd.f32 %v6670_v50, %v1503_v53  ;;  %v1592_v49 = vadd.f32 %v1588_v34, %v1581_v48  ;;  %v1599_v19 = vmul.f32 %v5374_v24, %v4683_v12 }
 0x2b5   : > { %2659 = vmatprep.mubr.bf16.mxu0 %v6667_v36  ;;  %v1316_v61 = vadd.f32 %v1312_v60, %v1305_v2  ;;  %v1317_v4 = vadd.f32 %v1313_v44, %v1306_v28  ;;  %v1323_v5 = vmul.f32 %v6671_v57, %v4662_v59  ;;  %v1324_v14 = vmul.f32 %v6671_v57, %v4683_v12 }
 0x2b6   : > { %v1360_v18 = vmul.f32 %v5456_v30, %v4655_v51  ;;  %v1361_v63 = vmul.f32 %v5456_v30, %v4657_v52  ;;  %v1367_v43 = vmul.f32 %v5459_v37, %v4660_v58  ;;  %v1368_v24 = vmul.f32 %v5459_v37, %v4665_v62 }
 0x2b7   : > { %3783 = vrot.lane.b32.xlu1 %v6668_v20, %s4193_s22  ;;  %3778 = vrot.lane.b32.xlu0 %v6669_v22, %s6660_s19  ;;  %v1511_v39 = vadd.f32 %v6670_v50, %v1504_v56  ;;  %v1558_v53 = vadd.f32 %v1554_v31, %v1547_v40  ;;  %v1559_v48 = vadd.f32 %v1555_v33, %v1548_v41  ;;  %v6674_v22 = vld [vmem:[#allocation59_spill] sm:$0xff] }
 0x2b8   : > { %v1602_v34 = vadd.f32 %v1598_v35, %v1591_v32  ;;  %v6672_v2 = vpack.i.bf16 %v5512_v42, %v5509_v15  ;;  %v1603_v30 = vadd.f32 %v1599_v19, %v1592_v49  ;;  %v1609_v28 = vmul.f32 %v5386_v25, %v4927_v55 }
 0x2b9   : > { %v1610_v37 = vmul.f32 %v5386_v25, %v4923_v54  ;;  %v1327_v60 = vadd.f32 %v1323_v5, %v1316_v61  ;;  %v1328_v44 = vadd.f32 %v1324_v14, %v1317_v4  ;;  %v1334_v33 = vmul.f32 %v5052_v1, %v4927_v55 }
 0x2ba   : > { %v1335_v35 = vmul.f32 %v5052_v1, %v4923_v54  ;;  %v1371_v41 = vadd.f32 %v1367_v43, %v1360_v18  ;;  %v1372_v31 = vadd.f32 %v1368_v24, %v1361_v63  ;;  %v1378_v15 = vmul.f32 %v5484_v23, %v4662_v59 }
 0x2bb   : > { %1862 = vrot.lane.b32.xlu1 %v5562_v38, %s4195_s13  ;;  %3788 = vrot.lane.b32.xlu0 %v6672_v2, %s4193_s22  ;;  %v1379_v42 = vmul.f32 %v5484_v23, %v4683_v12  ;;  %v3807_v56 = vpack.i.bf16 %v5586_v47, %v5583_v8  ;;  %v1406_v25 = vmul.f32 %v1402_v46, %v6651_v10  ;;  %v1514_v1 = vmax.f32 %v1510_v26, 0.0 }
 0x2bc   : > { %v1407_v40 = vmul.f32 %v1403_v13, %v6652_v27  ;;  %v6673_v32 = vpack.i.bf16 %v5549_v7, %v5546_v17  ;;  %v1515_v20 = vmax.f32 %v1511_v39, 0.0  ;;  %v1565_v50 = vadd.f32 %v6674_v22, %v1558_v53 }
 0x2bd   : > { %v1566_v23 = vadd.f32 %v6674_v22, %v1559_v48  ;;  %v1613_v49 = vadd.f32 %v1609_v28, %v1602_v34  ;;  %v1614_v8 = vadd.f32 %v1610_v37, %v1603_v30  ;;  %v1338_v47 = vadd.f32 %v1334_v33, %v1327_v60 }
 0x2be   : > { %v1339_v46 = vadd.f32 %v1335_v35, %v1328_v44  ;;  %v1382_v19 = vadd.f32 %v1378_v15, %v1371_v41  ;;  %v1383_v13 = vadd.f32 %v1379_v42, %v1372_v31  ;;  %v1389_v61 = vmul.f32 %v5515_v3, %v4927_v55 }
 0x2bf   : > { %3793 = vrot.lane.b32.xlu1 %v6673_v32, %s4194_s27  ;;  %1838 = vrot.lane.b32.xlu0 %v5562_v38, %s4192_s28  ;;  %v1390_v17 = vmul.f32 %v5515_v3, %v4923_v54  ;;  %v3797_v7 = vpack.i.bf16 %v1407_v40, %v1406_v25  ;;  %v1518_v26 = vmul.f32 %v1514_v1, %v5533_v29  ;;  %v1569_v57 = vmax.f32 %v1565_v50, 0.0  ;;  %v6675_v40 = vld [vmem:[#allocation71_spill] sm:$0xff]  ;;  %v6677_v50 = vld [vmem:[#allocation33_spill] sm:$0xff]  ;;  %s6700_s28 = sld [smem:[#allocation119_spill]] }
 0x2c0   : > { %v1519_v4 = vmul.f32 %v1515_v20, %v5481_v16  ;;  %v1570_v5 = vmax.f32 %v1566_v23, 0.0  ;;  %v1620_v14 = vadd.f32 %v5466_v21, %v1613_v49  ;;  %v1621_v18 = vadd.f32 %v5466_v21, %v1614_v8  ;;  %v6676_v20 = vld [vmem:[#allocation72_spill] sm:$0xff] }
 0x2c1   : > { %v1345_v63 = vadd.f32 %v5423_v6, %v1338_v47  ;;  %v1346_v3 = vadd.f32 %v5423_v6, %v1339_v46  ;;  %v1393_v43 = vadd.f32 %v1389_v61, %v1382_v19  ;;  %v1394_v24 = vadd.f32 %v1390_v17, %v1383_v13  ;;  %v6678_v47 = vld [vmem:[#allocation32_spill] sm:$0xff]  ;;  %v6679_v46 = vld [vmem:[#allocation73_spill] sm:$0xff]  ;;  %v6680_v13 = vld [vmem:[#allocation35_spill] sm:$0xff] }
 0x2c2   : > { %v3802_v39 = vpack.i.bf16 %v1519_v4, %v1518_v26  ;;  %v1573_v53 = vmul.f32 %v1569_v57, %v5533_v29  ;;  %v1574_v48 = vmul.f32 %v1570_v5, %v5481_v16  ;;  %v1624_v34 = vmax.f32 %v1620_v14, 0.0  ;;  %v6681_v17 = vld [vmem:[#allocation76_spill] sm:$0xff]  ;;  %v6682_v4 = vld [vmem:[#allocation77_spill] sm:$0xff] }
 0x2c3   : > { %1868 = vrot.lane.b32.xlu1 %v5562_v38, %s6660_s19  ;;  %3808 = vrot.lane.b32.xlu0 %v3807_v56, %s6660_s19  ;;  %v1625_v2 = vmax.f32 %v1621_v18, 0.0  ;;  %v1349_v30 = vmax.f32 %v1345_v63, 0.0  ;;  %v1350_v21 = vmax.f32 %v1346_v3, 0.0  ;;  %v1400_v28 = vadd.f32 %v5558_v45, %v1393_v43  ;;  %v6683_v14 = vld [vmem:[#allocation81_spill] sm:$0xff]  ;;  %v6684_v3 = vld [vmem:[#allocation82_spill] sm:$0xff] }
 0x2c4   : > { %v1401_v6 = vadd.f32 %v5558_v45, %v1394_v24  ;;  %v3812_v37 = vpack.i.bf16 %v1574_v48, %v1573_v53  ;;  %v1628_v60 = vmul.f32 %v1624_v34, %v5533_v29  ;;  %v2315_v32 = vmul.f32 %v6675_v40, %v6646_v11 }
 0x2c5   : > { %v1629_v44 = vmul.f32 %v1625_v2, %v5481_v16  ;;  %v1353_v33 = vmul.f32 %v1349_v30, %v5533_v29  ;;  %v1354_v35 = vmul.f32 %v1350_v21, %v5481_v16  ;;  %v1404_v41 = vmax.f32 %v1400_v28, 0.0  ;;  %v6685_v2 = vld [vmem:[#allocation40_spill] sm:$0xff]  ;;  %v6686_v30 = vld [vmem:[#allocation74_spill] sm:$0xff]  ;;  %s805_s13 = scalar_lea.vmem %s6700_s28, %s6699_s8 }
 0x2c6   : > { %v1405_v31 = vmax.f32 %v1401_v6, 0.0  ;;  %v2316_v1 = vmul.f32 %v6675_v40, %v6647_v9  ;;  %v2322_v22 = vmul.f32 %v6676_v20, %v6648_v0  ;;  %v2323_v23 = vmul.f32 %v6676_v20, %v6677_v50  ;;  %v6687_v28 = vld [vmem:[#allocation42_spill] sm:$0xff] }
 0x2c7   : > { %3798 = vrot.lane.b32.xlu1 %v3797_v7, %s4194_s27  ;;  %1844 = vrot.lane.b32.xlu0 %v5562_v38, %s4194_s27  ;;  %v3822_v45 = vpack.i.bf16 %v1629_v44, %v1628_v60  ;;  %v3817_v15 = vpack.i.bf16 %v1354_v35, %v1353_v33  ;;  %v1408_v42 = vmul.f32 %v1404_v41, %v5533_v29  ;;  %v1170_v53 = vsel %vm863_vm0, %v6651_v10, 0.0  ;;  %v6688_v44 = vld [vmem:[#allocation78_spill] sm:$0xff] }
 0x2c8   : > { %v1409_v56 = vmul.f32 %v1405_v31, %v5481_v16  ;;  %v2326_v49 = vadd.f32 %v2322_v22, %v2315_v32  ;;  %v2327_v8 = vadd.f32 %v2323_v23, %v2316_v1  ;;  %v2333_v19 = vmul.f32 %v6679_v46, %v6678_v47  ;;  %v6690_v22 = vld [vmem:[#allocation79_spill] sm:$0xff] }
 0x2c9   : > { %v2334_v61 = vmul.f32 %v6679_v46, %v6680_v13  ;;  %v2370_v7 = vmul.f32 %v6681_v17, %v6646_v11  ;;  %v2371_v26 = vmul.f32 %v6681_v17, %v6647_v9  ;;  %v2377_v57 = vmul.f32 %v6682_v4, %v6648_v0 }
 0x2ca   : > { %v3827_v25 = vpack.i.bf16 %v1409_v56, %v1408_v42  ;;  %v2378_v5 = vmul.f32 %v6682_v4, %v6677_v50  ;;  %v2095_v18 = vmul.f32 %v6683_v14, %v6646_v11  ;;  %v2096_v63 = vmul.f32 %v6683_v14, %v6647_v9 }
 0x2cb   : > { %3803 = vrot.lane.b32.xlu1 %v3802_v39, %s6660_s19  ;;  %1874 = vrot.lane.b32.xlu0 %v5562_v38, %s4197_s21  ;;  %v2102_v43 = vmul.f32 %v6684_v3, %v6648_v0  ;;  %v2103_v24 = vmul.f32 %v6684_v3, %v6677_v50  ;;  %v1173_v39 = vsel %vm863_vm0, %v6652_v27, 0.0  ;;  %v2337_v48 = vadd.f32 %v2333_v19, %v2326_v49  ;;  %v6691_v19 = vld [vmem:[#allocation84_spill] sm:$0xff]  ;;  %s2275_s21 = sadd.s32 84, %s4643_s16 }
 0x2cc   : > { %v2338_v34 = vadd.f32 %v2334_v61, %v2327_v8  ;;  %v2344_v21 = vmul.f32 %v6686_v30, %v6685_v2  ;;  %v2345_v6 = vmul.f32 %v6686_v30, %v6687_v28  ;;  %v2382_v60 = vadd.f32 %v2378_v5, %v2371_v26 }
 0x2cd   : > { %v2388_v33 = vmul.f32 %v6688_v44, %v6678_v47  ;;  %v2389_v35 = vmul.f32 %v6688_v44, %v6680_v13  ;;  %v2106_v41 = vadd.f32 %v2102_v43, %v2095_v18  ;;  %v2107_v31 = vadd.f32 %v2103_v24, %v2096_v63  ;;  %v6694_v24 = vld [vmem:[#allocation44_spill] sm:$0xff] }
 0x2ce   : > { %vm2005_vm1 = vcmp.lt.f32.partialorder %v6685_v2, 12.0  ;;  %vm2006_vm4 = vcmp.lt.f32.partialorder %v6687_v28, 12.0  ;;  %v1176_v56 = vsel %vm863_vm0, %v5533_v29, 0.0  ;;  %v2348_v40 = vadd.f32 %v2344_v21, %v2337_v48  ;;  %v6696_v21 = vld [vmem:[#allocation80_spill] sm:$0xff] }
 0x2cf   : > { %3813 = vrot.lane.b32.xlu1 %v3812_v37, %s4193_s22  ;;  %1850 = vrot.lane.b32.xlu0 %v5562_v38, %s4196_s15  ;;  %v2381_v37 = vadd.f32 %v2377_v57, %v2370_v7  ;;  %v2349_v32 = vadd.f32 %v2345_v6, %v2338_v34  ;;  %v2393_v20 = vadd.f32 %v2389_v35, %v2382_v60  ;;  %v6692_v7 = vmov 0.0   ;;  %v6693_v57 = vld [vmem:[#allocation75_spill] sm:$0xff]  ;;  %v6697_v60 = vld [vmem:[#allocation85_spill] sm:$0xff] }
 0x2d0   : > { %v2399_v23 = vmul.f32 %v6690_v22, %v6685_v2  ;;  %v2400_v49 = vmul.f32 %v6690_v22, %v6687_v28  ;;  %v2124_v61 = vmul.f32 %v6691_v19, %v6685_v2  ;;  %v2125_v17 = vmul.f32 %v6691_v19, %v6687_v28 }
 0x2d1   : > { %v2392_v1 = vadd.f32 %v2388_v33, %v2381_v37  ;;  %v2009_v26 = vsel %vm2005_vm1, 1.0, %v6692_v7  ;;  %v2010_v4 = vsel %vm2006_vm4, 1.0, %v6692_v7  ;;  %v2355_v5 = vadd.f32 %v6693_v57, %v2348_v40 }
 0x2d2   : > { %v2356_v14 = vadd.f32 %v6693_v57, %v2349_v32  ;;  %v2404_v63 = vadd.f32 %v2400_v49, %v2393_v20  ;;  %v5805_v20 = vstv %s1411_s14  ;;  %v5807_v22 = vstv %s1418_s6  ;;  %s2276_s14 = sld [smem:[#allocation9 + %s2275_s21]] }
 0x2d3   : > { %3823 = vrot.lane.b32.xlu1 %v3822_v45, %s4194_s27  ;;  %3818 = vrot.lane.b32.xlu0 %v3817_v15, %s4193_s22  ;;  %v6689_v45 = vld [vmem:[#allocation83_spill] sm:$0xff]  ;;  %v2403_v18 = vadd.f32 %v2399_v23, %v2392_v1  ;;  %v2359_v34 = vmax.f32 %v2355_v5, 0.0  ;;  %v5814_v19 = vstv %s1429_s26  ;;  %v5825_v57 = vstv %s1440_s23  ;;  %s2045_s6 = sld [smem:[#allocation9 + %s2044_s20]]  ;;  %s2055_s26 = sadd.s32 80, %s4643_s16 }
 0x2d4   : > { %v2113_v15 = vmul.f32 %v6689_v45, %v6678_v47  ;;  %v2114_v42 = vmul.f32 %v6689_v45, %v6680_v13  ;;  %v2360_v30 = vmax.f32 %v2356_v14, 0.0  ;;  %v2411_v37 = vadd.f32 %v6696_v21, %v2404_v63  ;;  %s2287_s23 = sld [smem:[#allocation9 + %s2286_s18]] }
 0x2d5   : > { %v2410_v6 = vadd.f32 %v6696_v21, %v2403_v18  ;;  %v1432_v14 = vmul.f32 %v5814_v19, %v6680_v13  ;;  %v5830_v18 = vpop.permute.xlu1 %3773  ;;  %v6698_v21 = vld [vmem:[#allocation69_spill] sm:$0xff]  ;;  %s2056_s30 = sld [smem:[#allocation9 + %s2055_s26]] }
 0x2d6   : > { %v2117_v8 = vadd.f32 %v2113_v15, %v2106_v41  ;;  %v2118_v46 = vadd.f32 %v2114_v42, %v2107_v31  ;;  %v2415_v45 = vmax.f32 %v2411_v37, 0.0  ;;  %s6744_s18 = sld [smem:[#allocation27_spill]]  ;;  %s6745_s26 = sld [smem:[#allocation25_spill]] }
 0x2d7   : > { %3828 = vrot.lane.b32.xlu0 %v3827_v25, %s4194_s27  ;;  %v1179_v25 = vsel %vm863_vm0, %v5481_v16, 0.0  ;;  %v2414_v31 = vmax.f32 %v2410_v6, 0.0  ;;  %v5839_v6 = vstv %s1451_s10  ;;  %s2067_s10 = sld [smem:[#allocation9 + %s2066_s0]] }
 0x2d8   : > { %v2128_v3 = vadd.f32 %v2124_v61, %v2117_v8  ;;  %v2129_v43 = vadd.f32 %v2125_v17, %v2118_v46  ;;  %v1413_v8 = vmul.f32 %v5805_v20, %v6646_v11  ;;  %v1420_v46 = vmul.f32 %v5807_v22, %v6648_v0 }
 0x2d9   : > { %v1414_v61 = vmul.f32 %v5805_v20, %v6647_v9  ;;  %v1421_v17 = vmul.f32 %v5807_v22, %v6677_v50 }
 0x2da   : > { %v2135_v44 = vadd.f32 %v6697_v60, %v2128_v3  ;;  %v2136_v33 = vadd.f32 %v6697_v60, %v2129_v43  ;;  %v1442_v3 = vmul.f32 %v5825_v57, %v6685_v2 }
 0x2db   : > { %v1425_v5 = vadd.f32 %v1421_v17, %v1414_v61 }
 0x2dc   : > { %v2139_v15 = vmax.f32 %v2135_v44, 0.0  ;;  %v2140_v42 = vmax.f32 %v2136_v33, 0.0  ;;  %p6748_p0 = scmp.ne.s32.totalorder %s6745_s26, 0 }
 0x2dd   : > { %v1436_v43 = vadd.f32 %v1432_v14, %v1425_v5  ;;  %v3775_v5 = vunpack.i.l.bf16 %v5830_v18  ;;  %v1221_v14 = vstv %s1220_s2  ;;  %s6737_s2 = sld [smem:[#allocation121_spill]] }
 0x2e3   : > { %s808_s1 = scalar_lea.vmem %s6737_s2, %s6699_s8  ;;  %s3142_s2 = scalar_lea.sflag [#allocation4], %s6744_s18 }
 0x2f6   : > { %1174 = vadd.xlane.f32.xlu0 %v1173_v39  ;;  %v5786_v39 = vmul.f32 %v2009_v26, %v6694_v24  ;;  %v1424_v26 = vadd.f32 %v1420_v46, %v1413_v8  ;;  %v1443_v24 = vmul.f32 %v5825_v57, %v6687_v28 }
 0x2f7   : > { %1171 = vadd.xlane.f32.xlu1 %v1170_v53  ;;  %v6695_v53 = vld [vmem:[#allocation46_spill] sm:$0xff] }
 0x2f8   : > { %v5789_v48 = vmul.f32 %v2010_v4, %v6695_v53  ;;  %v2363_v35 = vmul.f32 %v2359_v34, %v5786_v39  ;;  %v2143_v32 = vmul.f32 %v2139_v15, %v5786_v39  ;;  %v1431_v4 = vmul.f32 %v5814_v19, %v6678_v47 }
 0x2f9   : > { %v1447_v37 = vadd.f32 %v1443_v24, %v1436_v43 }
 0x2fa   : > { %1177 = vadd.xlane.f32.xlu0 %v1176_v56  ;;  %v2364_v41 = vmul.f32 %v2360_v30, %v5789_v48  ;;  %v2419_v40 = vmul.f32 %v2415_v45, %v5789_v48  ;;  %v2144_v1 = vmul.f32 %v2140_v42, %v5789_v48  ;;  %v1435_v63 = vadd.f32 %v1431_v4, %v1424_v26 }
 0x2fb   : > { %1180 = vadd.xlane.f32.xlu1 %v1179_v25  ;;  %v2418_v25 = vmul.f32 %v2414_v31, %v5786_v39  ;;  %v1454_v31 = vadd.f32 %v5839_v6, %v1447_v37  ;;  %v1223_v37 = vmul.f32 %v1221_v14, %v6687_v28 }
 0x2fc   : > { %v3832_v56 = vpack.i.bf16 %v2364_v41, %v2363_v35  ;;  %v3837_v49 = vpack.i.bf16 %v2144_v1, %v2143_v32  ;;  %v1446_v30 = vadd.f32 %v1442_v3, %v1435_v63  ;;  %v1192_v35 = vstv %s1191_s12  ;;  %s2298_s12 = sld [smem:[#allocation9 + %s2297_s3]]  ;;  %s789_s3 = scalar_lea.vmem [#allocation13], %s6739_s11 }
 0x2fd   : > { %v3842_v23 = vpack.i.bf16 %v2419_v40, %v2418_v25  ;;  %v1199_v41 = vstv %s1198_s4  ;;  %v1193_v42 = vmul.f32 %v1192_v35, %v6646_v11  ;;  %v1210_v1 = vstv %s1209_s29  ;;  %s2077_s4 = sadd.s32 96, %s4643_s16  ;;  %s6747_s29 = sld [smem:[#allocation126_spill]] }
 0x2fe   : > { %v1453_v33 = vadd.f32 %v5839_v6, %v1446_v30  ;;  %v1200_v25 = vmul.f32 %v1199_v41, %v6648_v0  ;;  %v1201_v40 = vmul.f32 %v1199_v41, %v6677_v50  ;;  %v1211_v17 = vmul.f32 %v1210_v1, %v6678_v47  ;;  %s2078_s17 = sld [smem:[#allocation9 + %s2077_s4]] }
 0x2ff   : > { %v1212_v26 = vmul.f32 %v1210_v1, %v6680_v13  ;;  %v3776_v63 = vunpack.i.h.bf16 %v5830_v18  ;;  %v1416_v18 = vmul.f32 %v5805_v20, %v4657_v52 }
 0x300   : > { %v1457_v32 = vmax.f32 %v1453_v33, 0.0  ;;  %v1204_v46 = vadd.f32 %v1200_v25, %v1193_v42  ;;  %v1195_v25 = vmul.f32 %v1192_v35, %v4655_v51 }
 0x302   : > { %v1461_v4 = vmul.f32 %v1457_v32, %v6651_v10  ;;  %v1203_v32 = vmul.f32 %v1199_v41, %v4665_v62 }
 0x303   : > { %s6259_s9 = scalar_lea.hbm %s6747_s29, %s4643_s16 }
 0x304   : > { %v1740_v33 = vsel %vm863_vm0, %v1461_v4, %v3775_v5 }
 0x30c   : > { %3833 = vrot.lane.b32.xlu1 %v3832_v56, %s6660_s19  ;;  %v1194_v56 = vmul.f32 %v1192_v35, %v6647_v9 }
 0x30e   : > { %v1205_v61 = vadd.f32 %v1201_v40, %v1194_v56  ;;  %v1196_v40 = vmul.f32 %v1192_v35, %v4657_v52 }
 0x310   : > { %3843 = vrot.lane.b32.xlu1 %v3842_v23, %s4193_s22  ;;  %3838 = vrot.lane.b32.xlu0 %v3837_v49, %s6660_s19  ;;  %v1458_v23 = vmax.f32 %v1454_v31, 0.0  ;;  %v1216_v30 = vadd.f32 %v1212_v26, %v1205_v61  ;;  %v1423_v31 = vmul.f32 %v5807_v22, %v4665_v62  ;;  %v1433_v26 = vmul.f32 %v5814_v19, %v4662_v59 }
 0x312   : > { %v1462_v3 = vmul.f32 %v1458_v23, %v6652_v27  ;;  %v1427_v4 = vadd.f32 %v1423_v31, %v1416_v18 }
 0x314   : > { %v1741_v23 = vsel %vm863_vm0, %v1462_v3, %v3776_v63 }
 0x319   : > { %v1855_v53 = vpop.permute.xlu1 %1854  ;;  %v1837_v34 = vpop.permute.xlu0 %1836 }
 0x31a   : > { %3490 = vmatprep.subr.bf16.mxu1 %v1855_v53  ;;  %v1215_v53 = vadd.f32 %v1211_v17, %v1204_v46  ;;  %v5884_v46 = vstv %s1231_s24  ;;  %v1213_v17 = vmul.f32 %v1210_v1, %v4662_v59  ;;  %s6738_s24 = sld [smem:[#allocation30_spill]] }
 0x31b   : > { %3491 = vmatpush3.bf16.msra.mxu1 %v6698_v21  ;;  %v1222_v21 = vmul.f32 %v1221_v14, %v6685_v2 }
 0x31d   : > { %v1861_v60 = vpop.permute.xlu1 %1860  ;;  %v5842_v44 = vpop.permute.xlu0 %1842 }
 0x321   : > { %v5846_v45 = vpop.permute.xlu1 %1866  ;;  %v5848_v15 = vpop.permute.xlu0 %1848 }
 0x325   : > { %v5855_v49 = vpop.permute.xlu1 %1872  ;;  %v1857_v8 = vpop.permute.xlu0 %1856 }
 0x326   : > { %3492 = vmatprep.subr.bf16.mxu1 %v1857_v8  ;;  %v1227_v8 = vadd.f32 %v1223_v37, %v1216_v30  ;;  %v1214_v30 = vmul.f32 %v1210_v1, %v4683_v12  ;;  %v1445_v1 = vmul.f32 %v5825_v57, %v4923_v54 }
 0x327   : > { %3493 = vmatpush3.bf16.msra.mxu1 %v5562_v38  ;;  %v1415_v38 = vmul.f32 %v5805_v20, %v4655_v51  ;;  %v1226_v20 = vadd.f32 %v1222_v21, %v1215_v53  ;;  %v1207_v53 = vadd.f32 %v1203_v32, %v1196_v40 }
 0x328   : > { %3494 = vmatprep.subr.bf16.mxu1 %v1861_v60  ;;  %v1422_v60 = vmul.f32 %v5807_v22, %v4660_v58  ;;  %v1234_v21 = vadd.f32 %v5884_v46, %v1227_v8  ;;  %v1225_v8 = vmul.f32 %v1221_v14, %v4923_v54 }
 0x329   : > { %v3784_v43 = vpop.permute.xlu1 %3783  ;;  %v5864_v24 = vpop.permute.xlu0 %3778 }
 0x32a   : > { %v3786_v61 = vunpack.i.h.bf16 %v3784_v43  ;;  %v3785_v22 = vunpack.i.l.bf16 %v3784_v43  ;;  %v1426_v35 = vadd.f32 %v1422_v60, %v1415_v38  ;;  %v1233_v43 = vadd.f32 %v5884_v46, %v1226_v20 }
 0x32b   : > { %3495 = vmatpush3.bf16.msra.mxu1 %v1837_v34  ;;  %v1202_v34 = vmul.f32 %v1199_v41, %v4660_v58  ;;  %v1434_v41 = vmul.f32 %v5814_v19, %v4683_v12  ;;  %v1444_v19 = vmul.f32 %v5825_v57, %v4927_v55  ;;  %v1238_v57 = vmax.f32 %v1234_v21, 0.0 }
 0x32c   : > { %v1744_v38 = vsel %vm1730_vm5, %v1740_v33, %v3785_v22  ;;  %v1745_v18 = vsel %vm1730_vm5, %v1741_v23, %v3786_v61  ;;  %v1218_v23 = vadd.f32 %v1214_v30, %v1207_v53  ;;  %v1237_v61 = vmax.f32 %v1233_v43, 0.0 }
 0x32d   : > { %v1863_v42 = vpop.permute.xlu1 %1862  ;;  %v5877_v56 = vpop.permute.xlu0 %3788  ;;  %v1206_v3 = vadd.f32 %v1202_v34, %v1195_v25  ;;  %v1437_v25 = vadd.f32 %v1433_v26, %v1426_v35  ;;  %v1438_v40 = vadd.f32 %v1434_v41, %v1427_v4  ;;  %v3781_v4 = vunpack.i.h.bf16 %v5864_v24 }
 0x32e   : > { %3496 = vmatprep.subr.bf16.mxu1 %v1863_v42  ;;  %v3780_v41 = vunpack.i.l.bf16 %v5864_v24  ;;  %v3790_v53 = vunpack.i.l.bf16 %v5877_v56 }
 0x32f   : > { %v1217_v20 = vadd.f32 %v1213_v17, %v1206_v3  ;;  %v1448_v22 = vadd.f32 %v1444_v19, %v1437_v25  ;;  %v1241_v3 = vmul.f32 %v1237_v61, %v6651_v10 }
 0x331   : > { %v3794_v5 = vpop.permute.xlu1 %3793  ;;  %v1839_v63 = vpop.permute.xlu0 %1838  ;;  %v1455_v21 = vadd.f32 %v5839_v6, %v1448_v22  ;;  %v1726_v10 = vsel %vm863_vm0, %v1241_v3, %v3780_v41 }
 0x332   : > { %v3796_v37 = vunpack.i.h.bf16 %v3794_v5  ;;  %v3795_v42 = vunpack.i.l.bf16 %v3794_v5  ;;  %3497 = vmatpush3.bf16.msra.mxu1 %v1839_v63  ;;  %v1449_v5 = vadd.f32 %v1445_v1, %v1438_v40  ;;  %v1229_v63 = vadd.f32 %v1225_v8, %v1218_v23 }
 0x333   : > { %3498 = vmatprep.subr.bf16.mxu1 %v5846_v45  ;;  %v1224_v45 = vmul.f32 %v1221_v14, %v4927_v55  ;;  %v1242_v14 = vmul.f32 %v1238_v57, %v6652_v27  ;;  %v1731_v27 = vsel %vm1730_vm5, %v1726_v10, %v3790_v53  ;;  %v1459_v1 = vmax.f32 %v1455_v21, 0.0 }
 0x334   : > { %v1748_v60 = vsel %vm1735_vm6, %v1744_v38, %v3795_v42  ;;  %v1749_v31 = vsel %vm1735_vm6, %v1745_v18, %v3796_v37  ;;  %v1456_v37 = vadd.f32 %v5839_v6, %v1449_v5  ;;  %v1236_v18 = vadd.f32 %v5884_v46, %v1229_v63 }
 0x335   : > { %v1869_v34 = vpop.permute.xlu1 %1868  ;;  %v5903_v32 = vpop.permute.xlu0 %3808  ;;  %v1753_v33 = vpack.c.bf16 %v1749_v31, %v1748_v60  ;;  %v1228_v17 = vadd.f32 %v1224_v45, %v1217_v20  ;;  %v1727_v38 = vsel %vm863_vm0, %v1242_v14, %v3781_v4 }
 0x336   : > { %3499 = vmatpush3.bf16.msra.mxu1 %v5842_v44  ;;  %v3791_v44 = vunpack.i.h.bf16 %v5877_v56  ;;  %v1460_v60 = vmax.f32 %v1456_v37, 0.0  ;;  %v1240_v45 = vmax.f32 %v1236_v18, 0.0  ;;  %v3811_v61 = vunpack.i.h.bf16 %v5903_v32 }
 0x337   : > { %3500 = vmatprep.subr.bf16.mxu1 %v1869_v34  ;;  %1916 = vmatprep.mubr.bf16.mxu1 %v1753_v33  ;;  %v3810_v57 = vunpack.i.l.bf16 %v5903_v32 }
 0x338   : > { %v1732_v56 = vsel %vm1730_vm5, %v1727_v38, %v3791_v44  ;;  %v1464_v8 = vmul.f32 %v1460_v60, %v5481_v16  ;;  %v1244_v53 = vmul.f32 %v1240_v45, %v5481_v16  ;;  %v3899_v60 = vld [vmem:[%s4584_s25] ss:$12 sps:$4 sm:$0xff]  }
 0x339   : > { %v3799_v26 = vpop.permute.xlu1 %3798  ;;  %v1845_v35 = vpop.permute.xlu0 %1844 }
 0x33a   : > { %3501 = vmatpush3.bf16.msra.mxu1 %v1845_v35  ;;  %v3801_v30 = vunpack.i.h.bf16 %v3799_v26  ;;  %v3800_v43 = vunpack.i.l.bf16 %v3799_v26  ;;  %v1729_v37 = vsel %vm863_vm0, %v1244_v53, %v3811_v61 }
 0x33b   : > { %3502 = vmatprep.subr.bf16.mxu1 %v5855_v49  ;;  %v1235_v49 = vadd.f32 %v5884_v46, %v1228_v17  ;;  %v1463_v46 = vmul.f32 %v1459_v1, %v5533_v29  ;;  %v3901_v1 = vld [vmem:[%s4584_s25 + $0x4] ss:$12 sps:$4 sm:$0xff]  }
 0x33c   : > { %v1736_v19 = vsel %vm1735_vm6, %v1731_v27, %v3800_v43  ;;  %v1737_v6 = vsel %vm1735_vm6, %v1732_v56, %v3801_v30  ;;  %2627 = vmatprep.subr.bf16.mxu0 %v3901_v1 }
 0x33d   : > { %v3804_v24 = vpop.permute.xlu1 %3803  ;;  %v1875_v42 = vpop.permute.xlu0 %1874  ;;  %v1239_v23 = vmax.f32 %v1235_v49, 0.0  ;;  %2628 = vmatpush1.bf16.msra.mxu0 %v3899_v60 }
 0x33e   : > { %3503 = vmatpush3.bf16.msra.mxu1 %v5848_v15  ;;  %v3806_v40 = vunpack.i.h.bf16 %v3804_v24  ;;  %v3805_v34 = vunpack.i.l.bf16 %v3804_v24  ;;  %v1752_v15 = vpack.c.bf16 %v1737_v6, %v1736_v19 }
 0x33f   : > { %3504 = vmatprep.subr.bf16.mxu1 %v1875_v42  ;;  %v1243_v44 = vmul.f32 %v1239_v23, %v5533_v29 }
 0x340   : > { %v1743_v26 = vsel %vm863_vm0, %v1464_v8, %v3806_v40  ;;  %v1742_v35 = vsel %vm863_vm0, %v1463_v46, %v3805_v34 }
 0x341   : > { %v3814_v31 = vpop.permute.xlu1 %3813  ;;  %v1851_v25 = vpop.permute.xlu0 %1850  ;;  %v1728_v24 = vsel %vm863_vm0, %v1243_v44, %v3810_v57 }
 0x342   : > { %3505 = vmatpush3.bf16.msra.mxu1 %v1851_v25  ;;  %v3816_v33 = vunpack.i.h.bf16 %v3814_v31  ;;  %v3815_v20 = vunpack.i.l.bf16 %v3814_v31  ;;  %v3902_v31 = vld [vmem:[%s4584_s25 + $0x8] ss:$12 sps:$4 sm:$0xff]   ;;  %s2257_s25 = sadd.s32 68, %s4643_s16 }
 0x343   : > { %3588 = vmatprep.subr.bf16.mxu0 %v3902_v31  ;;  %s2258_s15 = sld [smem:[#allocation9 + %s2257_s25]] }
 0x344   : > { %v1746_v17 = vsel %vm1730_vm5, %v1742_v35, %v3815_v20  ;;  %v1747_v63 = vsel %vm1730_vm5, %v1743_v26, %v3816_v33 }
 0x345   : > { %v3824_v22 = vpop.permute.xlu1 %3823  ;;  %v3819_v5 = vpop.permute.xlu0 %3818  ;;  %1917 = vmatmul.mubr.bf16.vlgmr.msra.gmra.mrb[8].mxu1 %v1752_v15 }
 0x346   : > { %v3826_v4 = vunpack.i.h.bf16 %v3824_v22  ;;  %v3825_v41 = vunpack.i.l.bf16 %v3824_v22  ;;  %v3821_v3 = vunpack.i.h.bf16 %v3819_v5  ;;  %v3820_v14 = vunpack.i.l.bf16 %v3819_v5 }
 0x348   : > { %v1750_v32 = vsel %vm1735_vm6, %v1746_v17, %v3825_v41  ;;  %v1751_v30 = vsel %vm1735_vm6, %v1747_v63, %v3826_v4  ;;  %v1733_v10 = vsel %vm1730_vm5, %v1728_v24, %v3820_v14  ;;  %v1734_v29 = vsel %vm1730_vm5, %v1729_v37, %v3821_v3  ;;  %v3460_v4 = vld [vmem:[%s805_s13] ss:$0 sm:$0xff]  ;;  %s6740_s13 = sld [smem:[#allocation122_spill]] }
 0x349   : > { %v3829_v43 = vpop.permute.xlu0 %3828  ;;  %v1756_v21 = vpack.c.bf16 %v1751_v30, %v1750_v32 }
 0x34a   : > { %v3831_v42 = vunpack.i.h.bf16 %v3829_v43  ;;  %v3830_v38 = vunpack.i.l.bf16 %v3829_v43 }
 0x34b   : > { %1924 = vmatprep.mubr.bf16.mxu1 %v1756_v21 }
 0x34c   : > { %v1738_v16 = vsel %vm1735_vm6, %v1733_v10, %v3830_v38  ;;  %v1739_v27 = vsel %vm1735_vm6, %v1734_v29, %v3831_v42 }
 0x34d   : > { %v1755_v56 = vpack.c.bf16 %v1739_v27, %v1738_v16 }
 0x34e   : > { %s813_s25 = scalar_lea.vmem %s6740_s13, %s6738_s24 }
 0x34f   : > { %1925 = vmatmul.mubr.bf16.gmra.mrb[12].mxu1 %v1755_v56 }
 0x383   : > { %v1175_v40 = vpop.xlane.xlu0 %1174 }
 0x384   : > { %v1172_v25 = vpop.xlane.xlu1 %1171  ;;  %v1183_v15 = vmax.f32 %v1175_v40, 1.0 }
 0x385   : > { %v1182_v34 = vmax.f32 %v1172_v25, 1.0 }
 0x387   : > { %v3586_v49 = vpop.f32.mrb[4].mxu0  ;;  %3911 = vrcp.f32 %v1182_v34  ;;  %v1178_v33 = vpop.xlane.xlu0 %1177  ;;  %v6702_v34 = vld [vmem:[#allocation87_spill] sm:$0xff] }
 0x388   : > { %v1967_v18 = vpop.f32.mrb[5].mxu0  ;;  %3913 = vrcp.f32 %v1183_v15  ;;  %v1181_v20 = vpop.xlane.xlu1 %1180  ;;  %v1184_v45 = vmax.f32 %v1178_v33, 1.0  ;;  %v2157_v15 = vmul.f32 %v6702_v34, %v6648_v0  ;;  %v2158_v33 = vmul.f32 %v6702_v34, %v6677_v50  ;;  %v6712_v34 = vld [vmem:[#allocation98_spill] sm:$0xff] }
 0x389   : > { %v3587_v19 = vpop.f32.mrb[6].mxu0  ;;  %v1185_v57 = vmax.f32 %v1181_v20, 1.0 }
 0x38a   : > { %v1970_v6 = vpop.f32.mrb[7].mxu0  ;;  %3915 = vrcp.f32 %v1184_v45  ;;  %v6703_v45 = vld [vmem:[#allocation88_spill] sm:$0xff] }
 0x38b   : > { %3917 = vrcp.f32 %v1185_v57 }
 0x391   : > { %v3912_v35 = vpop.eup %3911 }
 0x392   : > { %v3914_v63 = vpop.eup %3913 }
 0x394   : > { %v3916_v29 = vpop.eup %3915 }
 0x395   : > { %v3918_v56 = vpop.eup %3917 }
 0x418   : > { %v3506_v23 = vpop.f32.mrb[8].mxu1 }
 0x419   : > { %v3507_v8 = vpop.f32.mrb[9].mxu1 }
 0x41a   : > { %v3508_v46 = vadd.f32 %v3507_v8, %v3506_v23  ;;  %v3509_v61 = vpop.f32.mrb[10].mxu1  ;;  %v2168_v8 = vmul.f32 %v6703_v45, %v6678_v47 }
 0x41b   : > { %v3510_v22 = vpop.f32.mrb[11].mxu1 }
 0x41c   : > { %v1968_v5 = vadd.f32 %v3508_v46, %v1967_v18  ;;  %v3511_v26 = vadd.f32 %v3510_v22, %v3509_v61  ;;  %v2169_v46 = vmul.f32 %v6703_v45, %v6680_v13  ;;  %v6704_v61 = vld [vmem:[#allocation91_spill] sm:$0xff] }
 0x41d   : > { %v2425_v57 = vmul.f32 %v6704_v61, %v6646_v11  ;;  %v2426_v22 = vmul.f32 %v6704_v61, %v6647_v9 }
 0x41e   : > { %v1982_v41 = vmul.f32 %v3912_v35, %v1968_v5  ;;  %v1971_v17 = vadd.f32 %v3511_v26, %v1970_v6  ;;  %v6705_v5 = vld [vmem:[#allocation92_spill] sm:$0xff] }
 0x41f   : > { %v2432_v26 = vmul.f32 %v6705_v5, %v6648_v0  ;;  %v2433_v35 = vmul.f32 %v6705_v5, %v6677_v50 }
 0x420   : > { %v1992_v3 = vadd.f32 %v3460_v4, %v1982_v41  ;;  %v1983_v14 = vmul.f32 %v3914_v63, %v1971_v17  ;;  %v6706_v17 = vld [vmem:[#allocation89_spill] sm:$0xff] }
 0x421   : > { %v2179_v63 = vmul.f32 %v6706_v17, %v6685_v2 }
 0x422   : > { %v1993_v44 = vadd.f32 %v3460_v4, %v1983_v14  ;;  %v3512_v53 = vpop.f32.mrb[12].mxu1  ;;  %v1996_v30 = vmax.f32 %v1992_v3, 0.0  ;;  %v2180_v3 = vmul.f32 %v6706_v17, %v6687_v28  ;;  %v2436_v14 = vadd.f32 %v2432_v26, %v2425_v57 }
 0x423   : > { %v3513_v32 = vpop.f32.mrb[13].mxu1 }
 0x424   : > { %v1997_v43 = vmax.f32 %v1993_v44, 0.0  ;;  %v3514_v21 = vadd.f32 %v3513_v32, %v3512_v53  ;;  %v3515_v37 = vpop.f32.mrb[14].mxu1  ;;  %v2437_v44 = vadd.f32 %v2433_v35, %v2426_v22  ;;  %v6707_v53 = vld [vmem:[#allocation93_spill] sm:$0xff]  ;;  %v6713_v22 = vld [vmem:[#allocation95_spill] sm:$0xff] }
 0x425   : > { %v3516_v24 = vpop.f32.mrb[15].mxu1  ;;  %v2443_v32 = vmul.f32 %v6707_v53, %v6678_v47 }
 0x426   : > { %v2603_v42 = vpack.c.bf16 %v1997_v43, %v1996_v30  ;;  %v1976_v38 = vadd.f32 %v3586_v49, %v3514_v21  ;;  %v3517_v10 = vadd.f32 %v3516_v24, %v3515_v37  ;;  %v2599_v49 = vpack.c.bf16 %v5789_v48, %v5786_v39 }
 0x427   : > { %v2444_v30 = vmul.f32 %v6707_v53, %v6680_v13  ;;  %v2447_v37 = vadd.f32 %v2443_v32, %v2436_v14 }
 0x428   : > { %v1984_v16 = vmul.f32 %v3916_v29, %v1976_v38  ;;  %v1979_v27 = vadd.f32 %v3587_v19, %v3517_v10  ;;  %3464 = vmatmul.mubr.msk.bf16.vlgmr.msra.gmra.mrb[8].mxu0 %vm1770_vm2, %v2603_v42  ;;  %v6709_v29 = vld [vmem:[#allocation96_spill] sm:$0xff] }
 0x429   : > { %2669 = vmatprep.mubr.bf16.mxu0 %v6667_v36  ;;  %3589 = vmatpush3.bf16.msra.mxu0 %v3902_v31  ;;  %v6701_v36 = vld [vmem:[#allocation86_spill] sm:$0xff]  ;;  %v2448_v24 = vadd.f32 %v2444_v30, %v2437_v44 }
 0x42a   : > { %v1994_v18 = vadd.f32 %v3460_v4, %v1984_v16  ;;  %v1985_v6 = vmul.f32 %v3918_v56, %v1979_v27  ;;  %v2150_v19 = vmul.f32 %v6701_v36, %v6646_v11  ;;  %v2151_v31 = vmul.f32 %v6701_v36, %v6647_v9  ;;  %v6710_v56 = vld [vmem:[#allocation97_spill] sm:$0xff] }
 0x42b   : > { %v2205_v16 = vmul.f32 %v6709_v29, %v6646_v11  ;;  %v2206_v27 = vmul.f32 %v6709_v29, %v6647_v9 }
 0x42c   : > { %v1995_v1 = vadd.f32 %v3460_v4, %v1985_v6  ;;  %v1998_v60 = vmax.f32 %v1994_v18, 0.0  ;;  %v2161_v20 = vadd.f32 %v2157_v15, %v2150_v19  ;;  %v2162_v23 = vadd.f32 %v2158_v33, %v2151_v31 }
 0x42d   : > { %v2212_v18 = vmul.f32 %v6710_v56, %v6648_v0  ;;  %v2213_v6 = vmul.f32 %v6710_v56, %v6677_v50  ;;  %v2223_v15 = vmul.f32 %v6712_v34, %v6678_v47 }
 0x42e   : > { %v1999_v25 = vmax.f32 %v1995_v1, 0.0  ;;  %v2172_v4 = vadd.f32 %v2168_v8, %v2161_v20  ;;  %v2173_v41 = vadd.f32 %v2169_v46, %v2162_v23  ;;  %v2224_v8 = vmul.f32 %v6712_v34, %v6680_v13 }
 0x42f   : > { %v2216_v23 = vadd.f32 %v2212_v18, %v2205_v16  ;;  %v2217_v45 = vadd.f32 %v2213_v6, %v2206_v27  ;;  %v6715_v27 = vld [vmem:[#allocation109_spill] sm:$0xff] }
 0x430   : > { %v2604_v40 = vpack.c.bf16 %v1999_v25, %v1998_v60  ;;  %v2183_v43 = vadd.f32 %v2179_v63, %v2172_v4  ;;  %v2184_v21 = vadd.f32 %v2180_v3, %v2173_v41  ;;  %v6711_v25 = vld [vmem:[#allocation90_spill] sm:$0xff]  ;;  %v6714_v41 = vld [vmem:[#allocation99_spill] sm:$0xff] }
 0x431   : > { %v2227_v35 = vadd.f32 %v2223_v15, %v2216_v23  ;;  %v2228_v4 = vadd.f32 %v2224_v8, %v2217_v45  ;;  %v2234_v17 = vmul.f32 %v6714_v41, %v6685_v2  ;;  %v2235_v63 = vmul.f32 %v6714_v41, %v6687_v28  ;;  %v6717_v23 = vld [vmem:[#allocation62_spill] sm:$0xff]  ;;  %v6719_v8 = vld [vmem:[#allocation101_spill] sm:$0xff]  ;;  %v6728_v41 = vld [vmem:[#allocation107_spill] sm:$0xff] }
 0x432   : > { %3465 = vmatmul.mubr.msk.bf16.gmra.mrb[12].mxu0 %vm1770_vm2, %v2604_v40  ;;  %v2191_v36 = vadd.f32 %v6711_v25, %v2184_v21 }
 0x433   : > { %3590 = vmatprep.mubr.msk.bf16.mxu0 %vm1770_vm2, %v2603_v42  ;;  %v6708_v42 = vld [vmem:[#allocation94_spill] sm:$0xff]  ;;  %v2239_v21 = vadd.f32 %v2235_v63, %v2228_v4 }
 0x434   : > { %v2454_v38 = vmul.f32 %v6708_v42, %v6685_v2  ;;  %v2455_v10 = vmul.f32 %v6708_v42, %v6687_v28  ;;  %v2195_v57 = vmax.f32 %v2191_v36, 0.0 }
 0x435   : > { %v2246_v18 = vadd.f32 %v6715_v27, %v2239_v21  ;;  %v2017_v21 = vsel %vm863_vm0, %v5786_v39, 0.0 }
 0x436   : > { %v2458_v19 = vadd.f32 %v2454_v38, %v2447_v37  ;;  %v2459_v31 = vadd.f32 %v2455_v10, %v2448_v24  ;;  %v2199_v44 = vmul.f32 %v2195_v57, %v5789_v48  ;;  %v6722_v57 = vld [vmem:[#allocation103_spill] sm:$0xff] }
 0x438   : > { %v2465_v5 = vadd.f32 %v6713_v22, %v2458_v19  ;;  %v2466_v26 = vadd.f32 %v6713_v22, %v2459_v31  ;;  %v6723_v22 = vld [vmem:[#allocation102_spill] sm:$0xff] }
 0x43a   : > { %3591 = vmatmul.mubr.msk.bf16.vlgmr.msra.gmra.mrb[16].mxu0 %vm1770_vm2, %v2604_v40  ;;  %v2190_v40 = vadd.f32 %v6711_v25, %v2183_v43  ;;  %v2469_v32 = vmax.f32 %v2465_v5, 0.0  ;;  %v2470_v30 = vmax.f32 %v2466_v26, 0.0  ;;  %v2238_v43 = vadd.f32 %v2234_v17, %v2227_v35  ;;  %v6725_v26 = vld [vmem:[#allocation105_spill] sm:$0xff]  ;;  %v6726_v35 = vld [vmem:[#allocation104_spill] sm:$0xff]  ;;  %v6729_v17 = vld [vmem:[#allocation106_spill] sm:$0xff] }
 0x43b   : > { %3598 = vmatprep.mubr.msk.bf16.mxu0 %vm863_vm0, %v2599_v49  ;;  %v6724_v5 = vpack.i.bf16 %v6722_v57, %v6723_v22  ;;  %v6727_v4 = vpack.i.bf16 %v6725_v26, %v6726_v35  ;;  %v6730_v63 = vpack.i.bf16 %v6728_v41, %v6729_v17  ;;  %vm4199_vm2 = vmmov 0  }
 0x43c   : > { %v2194_v61 = vmax.f32 %v2190_v40, 0.0  ;;  %v2473_v29 = vmul.f32 %v2469_v32, %v5786_v39  ;;  %v2474_v16 = vmul.f32 %v2470_v30, %v5789_v48  ;;  %v2245_v56 = vadd.f32 %v6715_v27, %v2238_v43  ;;  %v6735_v32 = vld [vmem:[#allocation51_spill] sm:$0xff] }
 0x43d   : > { %v2250_v40 = vmax.f32 %v2246_v18, 0.0  ;;  %v2020_v43 = vsel %vm863_vm0, %v5789_v48, 0.0 }
 0x43e   : > { %v2198_v14 = vmul.f32 %v2194_v61, %v5786_v39  ;;  %v2249_v25 = vmax.f32 %v2245_v56, 0.0 }
 0x43f   : > { %v2254_v15 = vmul.f32 %v2250_v40, %v5789_v48 }
 0x440   : > { %v3847_v10 = vpack.i.bf16 %v2199_v44, %v2198_v14  ;;  %v2253_v34 = vmul.f32 %v2249_v25, %v5786_v39  ;;  %v6732_v14 = vld [vmem:[#allocation108_spill] sm:$0xff] }
 0x4fb   : > { %v2661_v1 = vpop.f32.mrb[8].mxu0 }
 0x4fc   : > { %v2663_v60 = vpop.f32.mrb[9].mxu0 }
 0x4fd   : > { %v2665_v49 = vpop.f32.mrb[10].mxu0 }
 0x4fe   : > { %v2729_v33 = vpack.c.bf16 %v2665_v49, %v2661_v1  ;;  %v2667_v20 = vpop.f32.mrb[11].mxu0 }
 0x4ff   : > { %v2730_v46 = vpack.c.bf16 %v2667_v20, %v2663_v60  ;;  %v3852_v60 = vpack.i.bf16 %v2474_v16, %v2473_v29  ;;  %v6716_v20 = vld [vmem:[#allocation61_spill] sm:$0xff]  ;;  %v6080_v29 = vpop.permute.xlu1 %3833 }
 0x500   : > { %2743 = vrot.lane.b32.xlu0 %v2729_v33, %s4193_s22  ;;  %2737 = vrot.lane.b32.xlu1 %v2729_v33, %s4194_s27  ;;  %v6718_v45 = vpack.c.bf16 %v6716_v20, %v6717_v23 }
 0x501   : > { %3525 = vmatprep.subr.bf16.mxu1 %v2730_v46 }
 0x502   : > { %3526 = vmatpush3.bf16.msra.mxu1 %v2729_v33 }
 0x504   : > { %2749 = vrot.lane.b32.xlu0 %v2729_v33, %s6660_s19  ;;  %2763 = vrot.lane.b32.xlu1 %v2730_v46, %s4193_s22  ;;  %v3857_v33 = vpack.i.bf16 %v2254_v15, %v2253_v34  ;;  %v6103_v15 = vpop.permute.xlu0 %3838 }
 0x505   : > { %v2671_v3 = vpop.f32.mrb[12].mxu0 }
 0x506   : > { %v2673_v53 = vpop.f32.mrb[13].mxu0 }
 0x507   : > { %v2675_v37 = vpop.f32.mrb[14].mxu0 }
 0x508   : > { %v2732_v24 = vpack.c.bf16 %v2675_v37, %v2671_v3  ;;  %2769 = vrot.lane.b32.xlu1 %v2730_v46, %s6660_s19  ;;  %2757 = vrot.lane.b32.xlu0 %v2730_v46, %s4194_s27  ;;  %v2677_v42 = vpop.f32.mrb[15].mxu0  ;;  %v6720_v46 = vld [vmem:[#allocation100_spill] sm:$0xff]  ;;  %v6731_v3 = vld [vmem:[#allocation110_spill] sm:$0xff]  ;;  %v2023_v37 = vsel %vm863_vm0, %v6717_v23, 0.0 }
 0x509   : > { %v2733_v38 = vpack.c.bf16 %v2677_v42, %v2673_v53  ;;  %v6721_v61 = vpack.i.bf16 %v6719_v8, %v6720_v46  ;;  %v6733_v44 = vpack.i.bf16 %v6731_v3, %v6732_v14  ;;  %v6734_v53 = vld [vmem:[#allocation67_spill] sm:$0xff]  ;;  %v2259_v42 = vstv %s2258_s15 }
 0x50a   : > { %v6736_v30 = vpack.i.bf16 %v6734_v53, %v6735_v32  ;;  %v2260_v16 = vmul.f32 %v2259_v42, %v6646_v11  ;;  %v2261_v27 = vmul.f32 %v2259_v42, %v6647_v9  ;;  %v6111_v8 = vstv %s2067_s10 }
 0x50b   : > { %3527 = vmatprep.subr.bf16.mxu1 %v2733_v38  ;;  %v2070_v14 = vmul.f32 %v6111_v8, %v6687_v28 }
 0x50c   : > { %3848 = vrot.lane.b32.xlu0 %v3847_v10, %s4193_s22  ;;  %2759 = vrot.lane.b32.xlu1 %v2733_v38, %s4194_s27 }
 0x50d   : > { %3528 = vmatpush3.bf16.msra.mxu1 %v2732_v24  ;;  %v3592_v6 = vpop.f32.mrb[16].mxu0 }
 0x50e   : > { %v2714_v1 = vpop.f32.mrb[17].mxu0 }
 0x50f   : > { %v3593_v49 = vpop.f32.mrb[18].mxu0 }
 0x510   : > { %v2734_v36 = vpack.c.bf16 %v3593_v49, %v3592_v6  ;;  %2739 = vrot.lane.b32.xlu0 %v2732_v24, %s4194_s27  ;;  %3853 = vrot.lane.b32.xlu1 %v3852_v60, %s4194_s27  ;;  %v2717_v19 = vpop.f32.mrb[19].mxu0  ;;  %v6086_v6 = vstv %s2276_s14  ;;  %s6743_s14 = sld [smem:[#allocation123_spill]] }
 0x511   : > { %v2731_v31 = vpack.c.bf16 %v2717_v19, %v2714_v1  ;;  %v6088_v1 = vstv %s2045_s6  ;;  %v2278_v49 = vmul.f32 %v6086_v6, %v6678_v47 }
 0x512   : > { %v2048_v34 = vmul.f32 %v6088_v1, %v6677_v50 }
 0x513   : > { %3594 = vmatprep.subr.bf16.mxu0 %v2731_v31 }
 0x514   : > { %2745 = vrot.lane.b32.xlu0 %v2732_v24, %s4193_s22  ;;  %2765 = vrot.lane.b32.xlu1 %v2733_v38, %s4193_s22 }
 0x515   : > { %3595 = vmatpush3.bf16.msra.mxu0 %v2731_v31  ;;  %v2047_v31 = vmul.f32 %v6088_v1, %v6648_v0 }
 0x516   : > { %3596 = vmatprep.subr.bf16.mxu0 %v2734_v36  ;;  %s816_s6 = scalar_lea.vmem %s6743_s14, %s6699_s8 }
 0x518   : > { %2751 = vrot.lane.b32.xlu0 %v2732_v24, %s6660_s19  ;;  %3858 = vrot.lane.b32.xlu1 %v3857_v33, %s4194_s27  ;;  %v2026_v24 = vsel %vm863_vm0, %v6716_v20, 0.0  ;;  %v6107_v33 = vpop.permute.xlu1 %3843 }
 0x519   : > { %3597 = vmatpush3.bf16.msra.mxu0 %v2734_v36  ;;  %v2279_v36 = vmul.f32 %v6086_v6, %v6680_v13 }
 0x51c   : > { %3599 = vmatmul.mubr.msk.bf16.vlgmr.msra.gmra.mrb[20].mxu0 %vm863_vm0, %v6718_v45  ;;  %2771 = vrot.lane.b32.xlu0 %v2733_v38, %s6660_s19  ;;  %v6109_v45 = vstv %s2056_s30  ;;  %s6746_s30 = sld [smem:[#allocation125_spill]] }
 0x51d   : > { %3863 = vrot.lane.b32.xlu1 %v6721_v61, %s6660_s19  ;;  %v2058_v22 = vmul.f32 %v6109_v45, %v6678_v47  ;;  %3610 = vmatprep.mubr.msk.f32.mxu0 %vm4199_vm2, %v6692_v7 }
 0x520   : > { %3868 = vrot.lane.b32.xlu0 %v6724_v5, %s6660_s19  ;;  %v2059_v5 = vmul.f32 %v6109_v45, %v6680_v13 }
 0x521   : > { %3873 = vrot.lane.b32.xlu1 %v6727_v4, %s4193_s22  ;;  %v2069_v4 = vmul.f32 %v6111_v8, %v6685_v2 }
 0x522   : > { %s824_s10 = scalar_lea.vmem %s6746_s30, %s6699_s8  ;;  %s4200_s8 = smov [#allocation13]  }
 0x524   : > { %3878 = vrot.lane.b32.xlu0 %v6730_v63, %s4193_s22  ;;  %s2264_s22 = sadd.s32 76, %s4643_s16 }
 0x525   : > { %3883 = vrot.lane.b32.xlu1 %v6733_v44, %s4194_s27  ;;  %s2265_s19 = sld [smem:[#allocation9 + %s2264_s22]]  ;;  %v6128_v44 = vstv %s2298_s12  ;;  %s6741_s22 = scalar_lea.vmem [#allocation8], %s6739_s11 }
 0x526   : > { %s3155_s12 = sshll.u32 %s789_s3, 4  ;;  %s6261_s12 = int_to_ptr.vmem [resolvable:$true] %s3155_s12 }
 0x528   : > { %3888 = vrot.lane.b32.xlu0 %v6736_v30, %s4194_s27  ;;  %s2037_s27 = sadd.s32 64, %s4643_s16 }
 0x529   : > { %s2038_s7 = sld [smem:[#allocation9 + %s2037_s27]] }
 0x52b   : > { %v2266_v38 = vstv %s2265_s19  ;;  %s6742_s19 = sld [smem:[#allocation124_spill]] }
 0x52c   : > { %v2267_v56 = vmul.f32 %v2266_v38, %v6648_v0  ;;  %v2268_v18 = vmul.f32 %v2266_v38, %v6677_v50 }
 0x52e   : > { %v2271_v25 = vadd.f32 %v2267_v56, %v2260_v16  ;;  %v2272_v40 = vadd.f32 %v2268_v18, %v2261_v27  ;;  %v2269_v16 = vmul.f32 %v2266_v38, %v4660_v58  ;;  %v2270_v27 = vmul.f32 %v2266_v38, %v4665_v62 }
 0x52f   : > { %v6078_v10 = vstv %s2038_s7  ;;  %v2280_v38 = vmul.f32 %v6086_v6, %v4662_v59 }
 0x530   : > { %v2040_v60 = vmul.f32 %v6078_v10, %v6646_v11  ;;  %v2041_v19 = vmul.f32 %v6078_v10, %v6647_v9  ;;  %v6105_v11 = vstv %s2287_s23  ;;  %v2282_v46 = vadd.f32 %v2278_v49, %v2271_v25 }
 0x531   : > { %v2283_v9 = vadd.f32 %v2279_v36, %v2272_v40  ;;  %v2289_v0 = vmul.f32 %v6105_v11, %v6685_v2  ;;  %v2290_v50 = vmul.f32 %v6105_v11, %v6687_v28  ;;  %v2262_v28 = vmul.f32 %v2259_v42, %v4655_v51  ;;  %s821_s21 = scalar_lea.vmem %s6742_s19, %s6738_s24  ;;  %s4096_s24 = sshll.u32 %s4200_s8, 4  ;;  %s4097_s24 = int_to_ptr.vmem [resolvable:$false] %s4096_s24 }
 0x532   : > { %v2051_v61 = vadd.f32 %v2047_v31, %v2040_v60  ;;  %v2052_v57 = vadd.f32 %v2048_v34, %v2041_v19  ;;  %v2043_v36 = vmul.f32 %v6078_v10, %v4657_v52  ;;  %v2050_v19 = vmul.f32 %v6088_v1, %v4665_v62  ;;  %s4098_s11 = scalar_lea.vmem %s4097_s24, 256  ;;  %p4099_p7 = scmp.lt.s32.totalorder %s6261_s12, %s4097_s24 }
 0x533   : > { %v2293_v41 = vadd.f32 %v2289_v0, %v2282_v46  ;;  %v2294_v17 = vadd.f32 %v2290_v50, %v2283_v9  ;;  %v3835_v31 = vunpack.i.l.bf16 %v6080_v29  ;;  %v2281_v34 = vmul.f32 %v6086_v6, %v4683_v12 }
 0x534   : > { %v2062_v63 = vadd.f32 %v2058_v22, %v2051_v61  ;;  %v2063_v3 = vadd.f32 %v2059_v5, %v2052_v57  ;;  %v3846_v46 = vunpack.i.h.bf16 %v6107_v33  ;;  %v3845_v9 = vunpack.i.l.bf16 %v6107_v33 }
 0x535   : > { %v2300_v13 = vadd.f32 %v6128_v44, %v2293_v41  ;;  %v2301_v32 = vadd.f32 %v6128_v44, %v2294_v17  ;;  %v2273_v0 = vadd.f32 %v2269_v16, %v2262_v28  ;;  %v2049_v61 = vmul.f32 %v6088_v1, %v4660_v58 }
 0x536   : > { %v2073_v30 = vadd.f32 %v2069_v4, %v2062_v63  ;;  %v2291_v6 = vmul.f32 %v6105_v11, %v4927_v55  ;;  %v2292_v33 = vmul.f32 %v6105_v11, %v4923_v54  ;;  %v2054_v5 = vadd.f32 %v2050_v19, %v2043_v36 }
 0x537   : > { %v2304_v56 = vmax.f32 %v2300_v13, 0.0  ;;  %v2305_v18 = vmax.f32 %v2301_v32, 0.0  ;;  %v2284_v17 = vadd.f32 %v2280_v38, %v2273_v0 }
 0x539   : > { %v2308_v50 = vmul.f32 %v2304_v56, %v5786_v39  ;;  %v2309_v62 = vmul.f32 %v2305_v18, %v5789_v48  ;;  %v2071_v56 = vmul.f32 %v6111_v8, %v4927_v55 }
 0x53b   : > { %v2585_v41 = vsel %vm863_vm0, %v2308_v50, %v3835_v31 }
 0x53c   : > { %v2589_v58 = vsel %vm1730_vm5, %v2585_v41, %v3845_v9 }
 0x547   : > { %2021 = vadd.xlane.f32.xlu0 %v2020_v43  ;;  %v2074_v43 = vadd.f32 %v2070_v14, %v2063_v3 }
 0x549   : > { %2018 = vadd.xlane.f32.xlu1 %v2017_v21 }
 0x54b   : > { %2024 = vadd.xlane.f32.xlu0 %v2023_v37  ;;  %v6136_v37 = vstv %s2078_s17 }
 0x54c   : > { %v2080_v60 = vadd.f32 %v6136_v37, %v2073_v30  ;;  %v2081_v25 = vadd.f32 %v6136_v37, %v2074_v43 }
 0x54d   : > { %2027 = vadd.xlane.f32.xlu1 %v2026_v24  ;;  %v2263_v24 = vmul.f32 %v2259_v42, %v4657_v52  ;;  %v3836_v42 = vunpack.i.h.bf16 %v6080_v29  ;;  %v2042_v29 = vmul.f32 %v6078_v10, %v4655_v51 }
 0x54e   : > { %v2084_v43 = vmax.f32 %v2080_v60, 0.0  ;;  %v2085_v28 = vmax.f32 %v2081_v25, 0.0  ;;  %v3841_v60 = vunpack.i.h.bf16 %v6103_v15 }
 0x54f   : > { %v2274_v52 = vadd.f32 %v2270_v27, %v2263_v24  ;;  %v2586_v4 = vsel %vm863_vm0, %v2309_v62, %v3836_v42  ;;  %v2053_v14 = vadd.f32 %v2049_v61, %v2042_v29  ;;  %v2295_v24 = vadd.f32 %v2291_v6, %v2284_v17 }
 0x550   : > { %v2590_v1 = vsel %vm1730_vm5, %v2586_v4, %v3846_v46  ;;  %v2088_v18 = vmul.f32 %v2084_v43, %v5786_v39 }
 0x551   : > { %v2285_v63 = vadd.f32 %v2281_v34, %v2274_v52  ;;  %v2302_v55 = vadd.f32 %v6128_v44, %v2295_v24 }
 0x553   : > { %v2296_v16 = vadd.f32 %v2292_v33, %v2285_v63  ;;  %v2306_v46 = vmax.f32 %v2302_v55, 0.0 }
 0x555   : > { %v2303_v39 = vadd.f32 %v6128_v44, %v2296_v16 }
 0x557   : > { %v2307_v0 = vmax.f32 %v2303_v39, 0.0 }
 0x559   : > { %v2311_v6 = vmul.f32 %v2307_v0, %v6716_v20 }
 0x572   : > { %v6122_v26 = vpop.permute.xlu0 %2743  ;;  %v2738_v35 = vpop.permute.xlu1 %2737 }
 0x576   : > { %v6130_v47 = vpop.permute.xlu0 %2749  ;;  %v2764_v53 = vpop.permute.xlu1 %2763 }
 0x57a   : > { %v6134_v21 = vpop.permute.xlu1 %2769  ;;  %v2758_v2 = vpop.permute.xlu0 %2757 }
 0x57b   : > { %3529 = vmatprep.subr.bf16.mxu1 %v2758_v2 }
 0x57c   : > { %3530 = vmatpush3.bf16.msra.mxu1 %v2738_v35  ;;  %v2061_v35 = vmul.f32 %v6109_v45, %v4683_v12  ;;  %v2060_v12 = vmul.f32 %v6109_v45, %v4662_v59 }
 0x57e   : > { %v6144_v40 = vpop.permute.xlu0 %3848  ;;  %v2760_v49 = vpop.permute.xlu1 %2759  ;;  %v2065_v2 = vadd.f32 %v2061_v35, %v2054_v5  ;;  %v2064_v27 = vadd.f32 %v2060_v12, %v2053_v14 }
 0x57f   : > { %3531 = vmatprep.subr.bf16.mxu1 %v2760_v49  ;;  %v3851_v25 = vunpack.i.h.bf16 %v6144_v40  ;;  %v3850_v36 = vunpack.i.l.bf16 %v6144_v40 }
 0x580   : > { %v2075_v42 = vadd.f32 %v2071_v56, %v2064_v27 }
 0x582   : > { %v2740_v57 = vpop.permute.xlu0 %2739  ;;  %v3854_v22 = vpop.permute.xlu1 %3853  ;;  %v2082_v52 = vadd.f32 %v6136_v37, %v2075_v42 }
 0x583   : > { %v3856_v51 = vunpack.i.h.bf16 %v3854_v22  ;;  %v3855_v10 = vunpack.i.l.bf16 %v3854_v22  ;;  %3532 = vmatpush3.bf16.msra.mxu1 %v2740_v57  ;;  %v2310_v22 = vmul.f32 %v2306_v46, %v6717_v23 }
 0x584   : > { %3533 = vmatprep.subr.bf16.mxu1 %v2764_v53  ;;  %v2072_v53 = vmul.f32 %v6111_v8, %v4923_v54  ;;  %v2089_v54 = vmul.f32 %v2085_v28, %v5789_v48  ;;  %v2086_v33 = vmax.f32 %v2082_v52, 0.0 }
 0x585   : > { %v2593_v11 = vsel %vm1735_vm6, %v2589_v58, %v3855_v10  ;;  %v2594_v3 = vsel %vm1735_vm6, %v2590_v1, %v3856_v51 }
 0x586   : > { %v2746_v13 = vpop.permute.xlu0 %2745  ;;  %v2766_v32 = vpop.permute.xlu1 %2765  ;;  %v2598_v30 = vpack.c.bf16 %v2594_v3, %v2593_v11  ;;  %v2076_v49 = vadd.f32 %v2072_v53, %v2065_v2  ;;  %v2090_v14 = vmul.f32 %v2086_v33, %v6717_v23 }
 0x587   : > { %3534 = vmatpush3.bf16.msra.mxu1 %v6122_v26  ;;  %v3840_v26 = vunpack.i.l.bf16 %v6103_v15  ;;  %v2574_v15 = vsel %vm863_vm0, %v2089_v54, %v3841_v60 }
 0x588   : > { %3535 = vmatprep.subr.bf16.mxu1 %v2766_v32  ;;  %2813 = vmatprep.mubr.bf16.mxu1 %v2598_v30  ;;  %v2083_v48 = vadd.f32 %v6136_v37, %v2076_v49  ;;  %v2578_v40 = vsel %vm1730_vm5, %v2574_v15, %v3851_v25  ;;  %v4198_v49 = vmov 0.0|0.0  }
 0x589   : > { %v2573_v38 = vsel %vm863_vm0, %v2088_v18, %v3840_v26  ;;  %3635 = vmatprep.subr.bf16.mxu0 %v4198_v49 }
 0x58a   : > { %v2752_v59 = vpop.permute.xlu0 %2751  ;;  %v3859_v45 = vpop.permute.xlu1 %3858  ;;  %v2087_v61 = vmax.f32 %v2083_v48, 0.0 }
 0x58b   : > { %3536 = vmatpush3.bf16.msra.mxu1 %v2746_v13  ;;  %v3861_v8 = vunpack.i.h.bf16 %v3859_v45  ;;  %v3860_v19 = vunpack.i.l.bf16 %v3859_v45 }
 0x58c   : > { %3537 = vmatprep.subr.bf16.mxu1 %v6134_v21  ;;  %v2577_v21 = vsel %vm1730_vm5, %v2573_v38, %v3850_v36  ;;  %v2091_v10 = vmul.f32 %v2087_v61, %v6716_v20 }
 0x58d   : > { %v2582_v9 = vsel %vm1735_vm6, %v2578_v40, %v3861_v8  ;;  %v2581_v44 = vsel %vm1735_vm6, %v2577_v21, %v3860_v19 }
 0x58e   : > { %v2772_v31 = vpop.permute.xlu0 %2771  ;;  %v2597_v57 = vpack.c.bf16 %v2582_v9, %v2581_v44  ;;  %v3470_v9 = vld [vmem:[%s808_s1] ss:$0 sm:$0xff]  ;;  %s4092_s1 = scalar_lea.vmem %s6261_s12, 128 }
 0x58f   : > { %v3864_v34 = vpop.permute.xlu1 %3863  ;;  %3538 = vmatpush3.bf16.msra.mxu1 %v6130_v47  ;;  %p4093_p2 = scmp.ne.s32.totalorder %s6261_s12, %s4092_s1  ;;  %p4100_p6 = scmp.lt.s32.totalorder %s4098_s11, %s4092_s1 }
 0x590   : > { %3539 = vmatprep.subr.bf16.mxu1 %v2772_v31  ;;  %v3866_v62 = vunpack.i.h.bf16 %v3864_v34  ;;  %v3865_v29 = vunpack.i.l.bf16 %v3864_v34 }
 0x591   : > { %p4094_p9 = pnand %p4093_p2, %p6748_p0  ;;  %p4101_p5 = por %p4100_p6, %p4099_p7 }
 0x592   : > { %v3869_v50 = vpop.permute.xlu0 %3868  ;;  %v2588_v51 = vsel %vm863_vm0, %v2311_v6, %v3866_v62  ;;  %v2587_v37 = vsel %vm863_vm0, %v2310_v22, %v3865_v29 }
 0x593   : > { %v3874_v47 = vpop.permute.xlu1 %3873  ;;  %3540 = vmatpush3.bf16.msra.mxu1 %v2752_v59  ;;  %v3871_v4 = vunpack.i.h.bf16 %v3869_v50  ;;  %v3870_v58 = vunpack.i.l.bf16 %v3869_v50  ;;  %p4095_p13 = pneg %p4094_p9 }
 0x594   : > { %v3876_v5 = vunpack.i.h.bf16 %v3874_v47  ;;  %v3875_v35 = vunpack.i.l.bf16 %v3874_v47 }
 0x595   : > { %v2576_v32 = vsel %vm863_vm0, %v2091_v10, %v3871_v4  ;;  %v2575_v20 = vsel %vm863_vm0, %v2090_v14, %v3870_v58  ;;  %v2971_v14 = vld [vmem:[%s813_s25] sm:$0xff]  ;;  %p4102_p1 = pnand %p4101_p5, %p4095_p13 }
 0x596   : > { %v3879_v41 = vpop.permute.xlu0 %3878  ;;  %2814 = vmatmul.mubr.bf16.vlgmr.msra.gmra.mrb[16].mxu1 %v2597_v57  ;;  %v2591_v12 = vsel %vm1730_vm5, %v2587_v37, %v3875_v35  ;;  %v2592_v13 = vsel %vm1730_vm5, %v2588_v51, %v3876_v5 }
 0x597   : > { %v3884_v1 = vpop.permute.xlu1 %3883  ;;  %v3881_v17 = vunpack.i.h.bf16 %v3879_v41  ;;  %v3880_v63 = vunpack.i.l.bf16 %v3879_v41 }
 0x598   : > { %v3886_v11 = vunpack.i.h.bf16 %v3884_v1  ;;  %v3885_v3 = vunpack.i.l.bf16 %v3884_v1 }
 0x599   : > { %v2579_v16 = vsel %vm1730_vm5, %v2575_v20, %v3880_v63  ;;  %v2580_v23 = vsel %vm1730_vm5, %v2576_v32, %v3881_v17  ;;  %v2897_v32 = vld [vmem:[%s6741_s22] sm:$0xff] }
 0x59a   : > { %v3889_v30 = vpop.permute.xlu0 %3888  ;;  %v2595_v43 = vsel %vm1735_vm6, %v2591_v12, %v3885_v3  ;;  %v2596_v2 = vsel %vm1735_vm6, %v2592_v13, %v3886_v11  ;;  %v2972_v12 = vld [vmem:[%s813_s25 + $0x8] sm:$0xff] }
 0x59b   : > { %v3891_v53 = vunpack.i.h.bf16 %v3889_v30  ;;  %v3890_v28 = vunpack.i.l.bf16 %v3889_v30  ;;  %v2601_v24 = vpack.c.bf16 %v2596_v2, %v2595_v43  ;;  %v3642_v30 = vpack.c.bf16 %v2972_v12, %v2971_v14  ;;  %v2973_v43 = vld [vmem:[%s813_s25 + $0x10] sm:$0xff]  ;;  %v2974_v2 = vld [vmem:[%s813_s25 + $0x18] sm:$0xff] }
 0x59c   : > { %v3645_v20 = vpack.c.bf16 %v2974_v2, %v2973_v43 }
 0x59d   : > { %2821 = vmatprep.mubr.bf16.mxu1 %v2601_v24  ;;  %v2583_v27 = vsel %vm1735_vm6, %v2579_v16, %v3890_v28  ;;  %v2584_v56 = vsel %vm1735_vm6, %v2580_v23, %v3891_v53  ;;  %v3056_v53 = vld [vmem:[%s821_s21] sm:$0xff]  ;;  %v3057_v28 = vld [vmem:[%s821_s21 + $0x8] sm:$0xff] }
 0x59e   : > { %v2600_v59 = vpack.c.bf16 %v2584_v56, %v2583_v27  ;;  %v3648_v24 = vpack.c.bf16 %v3057_v28, %v3056_v53  ;;  %v3058_v27 = vld [vmem:[%s821_s21 + $0x10] sm:$0xff]  ;;  %v3059_v56 = vld [vmem:[%s821_s21 + $0x18] sm:$0xff] }
 0x5a0   : > { %2822 = vmatmul.mubr.bf16.gmra.mrb[20].mxu1 %v2600_v59  ;;  %v3651_v59 = vpack.c.bf16 %v3059_v56, %v3058_v27 }
 0x5d4   : > { %v2022_v25 = vpop.xlane.xlu0 %2021 }
 0x5d5   : > { %v2030_v55 = vmax.f32 %v2022_v25, 1.0 }
 0x5d6   : > { %v2019_v54 = vpop.xlane.xlu1 %2018 }
 0x5d7   : > { %v2029_v36 = vmax.f32 %v2019_v54, 1.0 }
 0x5d8   : > { %v2025_v8 = vpop.xlane.xlu0 %2024 }
 0x5d9   : > { %3919 = vrcp.f32 %v2029_v36  ;;  %v2031_v42 = vmax.f32 %v2025_v8, 1.0 }
 0x5da   : > { %3921 = vrcp.f32 %v2030_v55  ;;  %v2028_v19 = vpop.xlane.xlu1 %2027 }
 0x5db   : > { %v2032_v34 = vmax.f32 %v2028_v19, 1.0  ;;  %3923 = vrcp.f32 %v2031_v42 }
 0x5dd   : > { %3925 = vrcp.f32 %v2032_v34 }
 0x5e3   : > { %v3920_v46 = vpop.eup %3919 }
 0x5e4   : > { %v3922_v52 = vpop.eup %3921 }
 0x5e5   : > { %v3924_v51 = vpop.eup %3923 }
 0x5e7   : > { %v3926_v58 = vpop.eup %3925 }
 0x5ef   : > { %v3600_v45 = vpop.f32.mrb[20].mxu0 }
 0x5f0   : > { %v2864_v18 = vpop.f32.mrb[21].mxu0 }
 0x5f1   : > { %v3601_v60 = vpop.f32.mrb[22].mxu0 }
 0x5f2   : > { %v2867_v26 = vpop.f32.mrb[23].mxu0 }
 0x669   : > { %v3541_v39 = vpop.f32.mrb[16].mxu1 }
 0x66a   : > { %v3542_v31 = vpop.f32.mrb[17].mxu1 }
 0x66b   : > { %v3543_v15 = vadd.f32 %v3542_v31, %v3541_v39  ;;  %v3544_v38 = vpop.f32.mrb[18].mxu1 }
 0x66c   : > { %v3545_v48 = vpop.f32.mrb[19].mxu1 }
 0x66d   : > { %v2865_v40 = vadd.f32 %v3543_v15, %v2864_v18  ;;  %v3546_v21 = vadd.f32 %v3545_v48, %v3544_v38 }
 0x66f   : > { %v2879_v44 = vmul.f32 %v3920_v46, %v2865_v40  ;;  %v2868_v0 = vadd.f32 %v3546_v21, %v2867_v26 }
 0x671   : > { %v2889_v50 = vadd.f32 %v3470_v9, %v2879_v44  ;;  %v2880_v62 = vmul.f32 %v3922_v52, %v2868_v0 }
 0x673   : > { %v2890_v29 = vadd.f32 %v3470_v9, %v2880_v62  ;;  %v3547_v61 = vpop.f32.mrb[20].mxu1  ;;  %v2893_v57 = vmax.f32 %v2889_v50, 0.0 }
 0x674   : > { %v3548_v47 = vpop.f32.mrb[21].mxu1 }
 0x675   : > { %v2894_v22 = vmax.f32 %v2890_v29, 0.0  ;;  %v3549_v6 = vadd.f32 %v3548_v47, %v3547_v61  ;;  %v3550_v33 = vpop.f32.mrb[22].mxu1 }
 0x676   : > { %v3551_v5 = vpop.f32.mrb[23].mxu1 }
 0x677   : > { %v2873_v35 = vadd.f32 %v3600_v45, %v3549_v6  ;;  %v3552_v4 = vadd.f32 %v3551_v5, %v3550_v33  ;;  %v3636_v41 = vpack.c.bf16 %v2894_v22, %v2893_v57  ;;  %v3472_v45 = vld [vmem:[%s816_s6] ss:$0 sm:$0xff] }
 0x679   : > { %v2881_v37 = vmul.f32 %v3924_v51, %v2873_v35  ;;  %v2876_v10 = vadd.f32 %v3601_v60, %v3552_v4  ;;  %3637 = vmatpush3.bf16.msra.mxu0 %v3636_v41 }
 0x67a   : > { %3638 = vmatprep.subr.bf16.mxu0 %v4198_v49 }
 0x67b   : > { %v2891_v1 = vadd.f32 %v3470_v9, %v2881_v37  ;;  %v2882_v17 = vmul.f32 %v3926_v58, %v2876_v10 }
 0x67d   : > { %v2892_v63 = vadd.f32 %v3470_v9, %v2882_v17  ;;  %v2895_v11 = vmax.f32 %v2891_v1, 0.0 }
 0x67f   : > { %v2896_v3 = vmax.f32 %v2892_v63, 0.0 }
 0x681   : > { %v3639_v13 = vpack.c.bf16 %v2896_v3, %v2895_v11 }
 0x683   : > { %3640 = vmatpush3.bf16.msra.mxu0 %v3639_v13 }
 0x684   : > { %3641 = vmatprep.subr.bf16.mxu0 %v4198_v49 }
 0x686   : > { %3611 = vmatmul.mubr.msk.f32.vlgmr.msra.gmra.mrb[24].mxu0 %vm863_vm0, %v2897_v32 }
 0x687   : > { %3643 = vmatpush3.bf16.msra.mxu0 %v3642_v30  ;;  %3621 = vmatprep.mubr.msk.f32.mxu0 %vm4199_vm2, %v6692_v7 }
 0x688   : > { %3644 = vmatprep.subr.bf16.mxu0 %v4198_v49 }
 0x68b   : > { %3646 = vmatpush3.bf16.msra.mxu0 %v3645_v20 }
 0x68c   : > { %3647 = vmatprep.subr.bf16.mxu0 %v4198_v49 }
 0x759   : > { %v2967_v16 = vpop.f32.mrb[24].mxu0 }
 0x75a   : > { %v3612_v23 = vpop.f32.mrb[25].mxu0  ;;  %3622 = vmatmul.mubr.msk.f32.vlgmr.msra.gmra.mrb[26].mxu0 %vm863_vm0, %v2967_v16 }
 0x75b   : > { %3649 = vmatpush3.bf16.msra.mxu0 %v3648_v24  ;;  %3632 = vmatprep.mubr.msk.f32.mxu0 %vm4199_vm2, %v6692_v7  ;;  %v3474_v7 = vld [vmem:[%s824_s10] ss:$0 sm:$0xff] }
 0x75c   : > { %3650 = vmatprep.subr.bf16.mxu0 %v4198_v49 }
 0x75f   : > { %3652 = vmatpush3.bf16.msra.mxu0 %v3651_v59 }
 0x82d   : > { %v3051_v18 = vpop.f32.mrb[26].mxu0 }
 0x82e   : > { %v3052_v60 = vadd.f32 %v3472_v45, %v3051_v18  ;;  %v3623_v26 = vpop.f32.mrb[27].mxu0 }
 0x830   : > { %v3055_v54 = vmax.f32 %v3052_v60, 0.0 }
 0x832   : > { %3633 = vmatmul.mubr.msk.f32.vlgmr.msra.gmra.mrb[28].mxu0 %vm863_vm0, %v3055_v54 }
 0x905   : > { %v3136_v49 = vpop.f32.mrb[28].mxu0 }
 0x906   : > { %v3137_v25 = vadd.f32 %v3474_v7, %v3136_v49  ;;  %v3634_v36 = vpop.f32.mrb[29].mxu0 }
 0x908   : > { %3140 = vst [vmem:[%s789_s3] sm:$0xff] %v3137_v25 }
 0x909   : > { %4105 = shalt.err (!%p4102_p1)
}
 0x90a   : > { %s4106_s16 = scalar_lea.hbm %s6259_s9, 128  ;;  %s4110_s13 = scalar_lea.hbm %s6747_s29, 256 }
 0x90b   : > { %p4107_p12 = scmp.ne.s32.totalorder %s6259_s9, %s4106_s16  ;;  %p4111_p11 = scmp.lt.u32.totalorder %s6259_s9, %s6747_s29 }
 0x90c   : > { %p4112_p10 = scmp.lt.u32.totalorder %s4110_s13, %s4106_s16  ;;  %p4114_p2 = scmp.lt.u32.totalorder %s4106_s16, %s6259_s9 }
 0x90d   : > { %p4108_p8 = pnand %p4107_p12, %p6748_p0 }
 0x90e   : > { %p4113_p4 = por %p4112_p10, %p4111_p11 }
 0x90f   : > { %p4109_p3 = pneg %p4108_p8 }
 0x910   : > { %p4115_p9 = por %p4114_p2, %p4113_p4 }
 0x912   : > { %p4116_p13 = pnand %p4115_p9, %p4109_p3 }
 0x914   : > { %4119 = shalt.err (!%p4116_p13)
}
 0x915   : > { %3670 = dma.vmem_to_hbm [thread:$0]  (%p6748_p0), %s6261_s12, 128, %s6259_s9, %s3142_s2  }
 0x916 PF: > { %s6749_s27 = sld [smem:[#allocation19_spill]]  ;;  %s6750_s15 = sld [smem:[#allocation26_spill]] }
 0x917   : > { %s6751_s19 = sld [smem:[#allocation22_spill]] }
 0x91c   : > { %s3167_s21 = sand.u32 1, %s6749_s27   ;;  %p6752_p7 = scmp.ne.s32.totalorder %s6750_s15, 0 }
 0x91d   : > { %p6753_p6 = scmp.ge.s32.totalorder %s6751_s19, 2  ;;  %s3168_s7 = scalar_lea.sflag [#allocation4], %s3167_s21 }
 0x91f   : > { %p3693_p5 = pnand %p6753_p6, %p6752_p7 }
 0x921   : > { %4153 = dma.done.wait (!%p3693_p5), %s3168_s7, 128  }
 0x922   : > { %4155 = vsyncadd (!%p3693_p5), %s3168_s7, 4294967168  ;;  %s6754_s21 = sld [smem:[#allocation23_spill]]  ;;  %s6755_s18 = sld [smem:[#allocation20_spill]] }
 0x923   : > { %s6756_s19 = sld [smem:[#allocation21_spill]]  ;;  %s6757_s20 = sld [smem:[#allocation24_spill]] }
 0x928   : > { %p35_p1 = scmp.ge.s32.totalorder %s6754_s21, 4  }
 0x92a   :  { %37 = sbr.rel (!%p35_p1) target bundleno = 27 (0x1b), region = 205 }
 0x931   :  { %3173 = vsyncpa [#allocation3], 1 }
 0x932   :  { %3175 = vsyncpa [#allocation3 + $0x1], 1 }
 0x933   :  { %3176 = vsyncpa [#allocation7], 1 }
 0x934   :  { %3178 = vsyncpa [#allocation7 + $0x1], 1 }
 0x935   :  { %3179 = vsyncpa [#allocation11], 1 }
 0x936   :  { %3181 = vsyncpa [#allocation11 + $0x1], 1 }
 0x937   :  { %3182 = vsyncpa [#allocation4], 1 }
 0x938   :  { %3184 = vsyncpa [#allocation4 + $0x1], 1 }
 0x939   :  { %3185 = vsyncpa [#allocation5], 1 }
 0x93a   :  { %3187 = vsyncpa [#allocation5 + $0x1], 1 }

</bundles_post_ra>
